<compile_context>
chip_gen: v5e
topology: v5e:2x2
jax: 0.10.0
libtpu: 0.0.40
codegen_flags: <defaults>
</compile_context>

<pallas_src>
import jax
import jax.numpy as jnp
from jax.experimental import pallas as pl
from jax.experimental.pallas import tpu as pltpu

IN_FEATURES = 226
HIDDEN = 452
OUT_FEATURES = 904
BN_EPS = 1e-5

# lane-padded sizes (multiples of 128)
IN_PAD = 256
HIDDEN_PAD = 512
OUT_PAD = 1024


def _bn_relu(y, gamma, beta):
    """Training-mode BatchNorm1d (biased variance) + ReLU, fused scale/shift.

    y: (B, F) float32; gamma/beta: (1, F) float32.
    Centered (two-pass) variance for numerical safety.
    """
    m = jnp.mean(y, axis=0, keepdims=True)
    d = y - m
    var = jnp.mean(d * d, axis=0, keepdims=True)
    inv_std = jax.lax.rsqrt(var + BN_EPS)
    return jnp.maximum(d * (gamma.astype(jnp.float32) * inv_std)
                       + beta.astype(jnp.float32), 0.0)


def linear_mlp_kernel(x_ref,
                      w1_ref, g1_ref, b1_ref,
                      w2_ref, g2_ref, b2_ref,
                      w3_ref, g3_ref, b3_ref,
                      o_ref):
    # Single grid step: everything is VMEM-resident, three MXU matmuls with
    # f32 accumulation, BN+ReLU epilogues on the VPU.
    def layer(h_bf16, w_ref, g_ref, b_ref):
        y = jnp.dot(h_bf16, w_ref[...], preferred_element_type=jnp.float32)
        return _bn_relu(y, g_ref[...], b_ref[...])

    h = layer(x_ref[...].astype(jnp.bfloat16), w1_ref, g1_ref, b1_ref)
    h = layer(h.astype(jnp.bfloat16), w2_ref, g2_ref, b2_ref)
    h = layer(h.astype(jnp.bfloat16), w3_ref, g3_ref, b3_ref)
    o_ref[...] = h.astype(o_ref.dtype)


def linear_forward(x, params):
    """x: (B, 226) f32; params: pre-padded (see init_params). Returns (B, 904) f32."""
    (w1p, g1p, b1p, w2p, g2p, b2p, w3p, g3p, b3p) = params
    B = x.shape[0]

    # Only the (tiny) activation pad remains in the per-call path.
    xp = jnp.pad(x, ((0, 0), (0, IN_PAD - IN_FEATURES)))

    resident = lambda shape: pl.BlockSpec(shape, lambda i, _s=shape: (0,) * len(_s))
    in_specs = [
        resident((B, IN_PAD)),                                   # x
        resident((IN_PAD, HIDDEN_PAD)),                          # w1 (bf16)
        resident((1, HIDDEN_PAD)), resident((1, HIDDEN_PAD)),    # g1, b1
        resident((HIDDEN_PAD, HIDDEN_PAD)),                      # w2 (bf16)
        resident((1, HIDDEN_PAD)), resident((1, HIDDEN_PAD)),    # g2, b2
        resident((HIDDEN_PAD, OUT_PAD)),                         # w3 (bf16)
        resident((1, OUT_PAD)), resident((1, OUT_PAD)),          # g3, b3
    ]
    out_spec = resident((B, OUT_PAD))

    flops = 2 * B * (IN_PAD * HIDDEN_PAD
                     + HIDDEN_PAD * HIDDEN_PAD
                     + HIDDEN_PAD * OUT_PAD)
    bytes_accessed = (B * IN_PAD * 4
                      + (w1p.size + w2p.size + w3p.size) * 2
                      + (g1p.size + b1p.size + g2p.size + b2p.size
                         + g3p.size + b3p.size) * 4
                      + B * OUT_PAD * 4)

    out_padded = pl.pallas_call(
        linear_mlp_kernel,
        out_shape=jax.ShapeDtypeStruct((B, OUT_PAD), jnp.float32),
        grid_spec=pltpu.PrefetchScalarGridSpec(
            num_scalar_prefetch=0,
            grid=(1,),
            in_specs=in_specs,
            out_specs=out_spec,
        ),
        compiler_params=pltpu.CompilerParams(
            dimension_semantics=("arbitrary",)),
        cost_estimate=pl.CostEstimate(
            flops=flops,
            transcendentals=2 * HIDDEN_PAD + OUT_PAD,
            bytes_accessed=bytes_accessed),
    )(xp, w1p, g1p, b1p, w2p, g2p, b2p, w3p, g3p, b3p)

    return out_padded[:, :OUT_FEATURES]


linear_forward_jit = jax.jit(linear_forward)


def init_params(key):
    """Pre-padded parameters (padding done once, outside the per-call path).

    Weights: nn.Linear default init U(-1/sqrt(fan_in), 1/sqrt(fan_in)), stored
    transposed as (in, out) for x @ W, bf16, zero-padded to lane multiples.
    BatchNorm1d: gamma = 1, beta = 0, f32, zero-padded (padded features stay
    exactly zero through BN+ReLU, so downstream math is unchanged).
    """
    def linear_w(k, fan_in, fan_out, pad_in, pad_out):
        bound = 1.0 / jnp.sqrt(jnp.float32(fan_in))
        w = jax.random.uniform(k, (fan_in, fan_out), jnp.float32,
                               minval=-bound, maxval=bound)
        w = jnp.pad(w, ((0, pad_in - fan_in), (0, pad_out - fan_out)))
        return w.astype(jnp.bfloat16)

    k1, k2, k3 = jax.random.split(key, 3)
    w1p = linear_w(k1, IN_FEATURES, HIDDEN, IN_PAD, HIDDEN_PAD)
    w2p = linear_w(k2, HIDDEN, HIDDEN, HIDDEN_PAD, HIDDEN_PAD)
    w3p = linear_w(k3, HIDDEN, OUT_FEATURES, HIDDEN_PAD, OUT_PAD)

    def bn(f, pad_f):
        g = jnp.pad(jnp.ones((1, f), jnp.float32), ((0, 0), (0, pad_f - f)))
        b = jnp.zeros((1, pad_f), jnp.float32)
        return g, b

    g1p, b1p = bn(HIDDEN, HIDDEN_PAD)
    g2p, b2p = bn(HIDDEN, HIDDEN_PAD)
    g3p, b3p = bn(OUT_FEATURES, OUT_PAD)
    return (w1p, g1p, b1p, w2p, g2p, b2p, w3p, g3p, b3p)


def reference_forward(x, params):
    # Pure-JAX reference on the UNPADDED sizes, same numerics: bf16 matmul
    # inputs, f32 accumulation, f32 training-mode BatchNorm, ReLU.
    (w1p, g1p, b1p, w2p, g2p, b2p, w3p, g3p, b3p) = params
    w1 = w1p[:IN_FEATURES, :HIDDEN]
    w2 = w2p[:HIDDEN, :HIDDEN]
    w3 = w3p[:HIDDEN, :OUT_FEATURES]
    g1, b1 = g1p[:, :HIDDEN], b1p[:, :HIDDEN]
    g2, b2 = g2p[:, :HIDDEN], b2p[:, :HIDDEN]
    g3, b3 = g3p[:, :OUT_FEATURES], b3p[:, :OUT_FEATURES]

    def layer(h, w, g, b):
        y = jnp.dot(h.astype(jnp.bfloat16), w.astype(jnp.bfloat16),
                    preferred_element_type=jnp.float32)
        return _bn_relu(y, g, b)

    h = layer(x, w1, g1, b1)
    h = layer(h, w2, g2, b2)
    return layer(h, w3, g3, b3)


if __name__ == "__main__":
    key = jax.random.PRNGKey(0)
    kx, kp = jax.random.split(key)

    B = 8  # BatchNorm1d (training mode) needs batch > 1
    x = jax.random.normal(kx, (B, IN_FEATURES), jnp.float32)
    params = init_params(kp)

    out = linear_forward_jit(x, params)
    out = jax.block_until_ready(out)

    ref = reference_forward(x, params)
    assert out.shape == (B, OUT_FEATURES)
    assert jnp.allclose(out, ref, atol=1e-2, rtol=1e-2), (
        float(jnp.max(jnp.abs(out - ref))))

    print("KERNEL_OK")
</pallas_src>

<mosaic_0001>
module attributes {stable_mosaic.version = 11 : i64} {
  func.func @linear_mlp_kernel(%arg0: i32, %arg1: memref<8x256xf32, #tpu.memory_space<vmem>>, %arg2: memref<256x512xbf16, #tpu.memory_space<vmem>>, %arg3: memref<1x512xf32, #tpu.memory_space<vmem>>, %arg4: memref<1x512xf32, #tpu.memory_space<vmem>>, %arg5: memref<512x512xbf16, #tpu.memory_space<vmem>>, %arg6: memref<1x512xf32, #tpu.memory_space<vmem>>, %arg7: memref<1x512xf32, #tpu.memory_space<vmem>>, %arg8: memref<512x1024xbf16, #tpu.memory_space<vmem>>, %arg9: memref<1x1024xf32, #tpu.memory_space<vmem>>, %arg10: memref<1x1024xf32, #tpu.memory_space<vmem>>, %arg11: memref<8x1024xf32, #tpu.memory_space<vmem>>) attributes {dimension_semantics = [#tpu.dimension_semantics<arbitrary>], iteration_bounds = array<i64: 1>, scalar_prefetch = 0 : i64, scratch_operands = 0 : i64, tpu.core_type = #tpu.core_type<tc>, window_params = [{pipeline_mode = #tpu.pipeline_mode<synchronous>, transform_indices = @transform_0, window_bounds = array<i64: 8, 256>}, {pipeline_mode = #tpu.pipeline_mode<synchronous>, transform_indices = @transform_1, window_bounds = array<i64: 256, 512>}, {pipeline_mode = #tpu.pipeline_mode<synchronous>, transform_indices = @transform_2, window_bounds = array<i64: 1, 512>}, {pipeline_mode = #tpu.pipeline_mode<synchronous>, transform_indices = @transform_3, window_bounds = array<i64: 1, 512>}, {pipeline_mode = #tpu.pipeline_mode<synchronous>, transform_indices = @transform_4, window_bounds = array<i64: 512, 512>}, {pipeline_mode = #tpu.pipeline_mode<synchronous>, transform_indices = @transform_5, window_bounds = array<i64: 1, 512>}, {pipeline_mode = #tpu.pipeline_mode<synchronous>, transform_indices = @transform_6, window_bounds = array<i64: 1, 512>}, {pipeline_mode = #tpu.pipeline_mode<synchronous>, transform_indices = @transform_7, window_bounds = array<i64: 512, 1024>}, {pipeline_mode = #tpu.pipeline_mode<synchronous>, transform_indices = @transform_8, window_bounds = array<i64: 1, 1024>}, {pipeline_mode = #tpu.pipeline_mode<synchronous>, transform_indices = @transform_9, window_bounds = array<i64: 1, 1024>}, {pipeline_mode = #tpu.pipeline_mode<synchronous>, transform_indices = @transform_10, window_bounds = array<i64: 8, 1024>}]} {
    %c0 = arith.constant 0 : index
    %c0_0 = arith.constant 0 : index
    %0 = vector.load %arg1[%c0, %c0_0] : memref<8x256xf32, #tpu.memory_space<vmem>>, vector<8x256xf32>
    %1 = arith.truncf %0 : vector<8x256xf32> to vector<8x256xbf16>
    %c0_1 = arith.constant 0 : index
    %c0_2 = arith.constant 0 : index
    %2 = vector.load %arg2[%c0_1, %c0_2] : memref<256x512xbf16, #tpu.memory_space<vmem>>, vector<256x512xbf16>
    %cst = arith.constant dense<0.000000e+00> : vector<8x512xf32>
    %3 = tpu.matmul %1, %2, %cst {dimension_numbers = #tpu.dot_dimension_numbers<[1], [0], [0], [1], [0, 0, 1, 1], [], []>} : vector<8x256xbf16>, vector<256x512xbf16>, vector<8x512xf32> -> vector<8x512xf32>
    %c0_3 = arith.constant 0 : index
    %c0_4 = arith.constant 0 : index
    %4 = vector.load %arg3[%c0_3, %c0_4] : memref<1x512xf32, #tpu.memory_space<vmem>>, vector<1x512xf32>
    %c0_5 = arith.constant 0 : index
    %c0_6 = arith.constant 0 : index
    %5 = vector.load %arg4[%c0_5, %c0_6] : memref<1x512xf32, #tpu.memory_space<vmem>>, vector<1x512xf32>
    %cst_7 = arith.constant dense<0.000000e+00> : vector<512xf32>
    %6 = vector.multi_reduction <add>, %3, %cst_7 [0] : vector<8x512xf32> to vector<512xf32>
    %7 = vector.shape_cast %6 : vector<512xf32> to vector<1x512xf32>
    %cst_8 = arith.constant 8.000000e+00 : f32
    %8 = vector.broadcast %cst_8 : f32 to vector<1x512xf32>
    %9 = arith.divf %7, %8 : vector<1x512xf32>
    %10 = vector.broadcast %9 : vector<1x512xf32> to vector<8x512xf32>
    %11 = arith.subf %3, %10 : vector<8x512xf32>
    %12 = arith.mulf %11, %11 : vector<8x512xf32>
    %cst_9 = arith.constant dense<0.000000e+00> : vector<512xf32>
    %13 = vector.multi_reduction <add>, %12, %cst_9 [0] : vector<8x512xf32> to vector<512xf32>
    %14 = vector.shape_cast %13 : vector<512xf32> to vector<1x512xf32>
    %cst_10 = arith.constant 8.000000e+00 : f32
    %15 = vector.broadcast %cst_10 : f32 to vector<1x512xf32>
    %16 = arith.divf %14, %15 : vector<1x512xf32>
    %cst_11 = arith.constant 9.99999974E-6 : f32
    %17 = vector.broadcast %cst_11 : f32 to vector<1x512xf32>
    %18 = arith.addf %16, %17 : vector<1x512xf32>
    %19 = math.rsqrt %18 : vector<1x512xf32>
    %20 = arith.mulf %4, %19 : vector<1x512xf32>
    %21 = vector.broadcast %20 : vector<1x512xf32> to vector<8x512xf32>
    %22 = arith.mulf %11, %21 : vector<8x512xf32>
    %23 = vector.broadcast %5 : vector<1x512xf32> to vector<8x512xf32>
    %24 = arith.addf %22, %23 : vector<8x512xf32>
    %cst_12 = arith.constant 0.000000e+00 : f32
    %25 = vector.broadcast %cst_12 : f32 to vector<8x512xf32>
    %26 = arith.maximumf %24, %25 : vector<8x512xf32>
    %27 = arith.truncf %26 : vector<8x512xf32> to vector<8x512xbf16>
    %c0_13 = arith.constant 0 : index
    %c0_14 = arith.constant 0 : index
    %28 = vector.load %arg5[%c0_13, %c0_14] : memref<512x512xbf16, #tpu.memory_space<vmem>>, vector<512x512xbf16>
    %cst_15 = arith.constant dense<0.000000e+00> : vector<8x512xf32>
    %29 = tpu.matmul %27, %28, %cst_15 {dimension_numbers = #tpu.dot_dimension_numbers<[1], [0], [0], [1], [0, 0, 1, 1], [], []>} : vector<8x512xbf16>, vector<512x512xbf16>, vector<8x512xf32> -> vector<8x512xf32>
    %c0_16 = arith.constant 0 : index
    %c0_17 = arith.constant 0 : index
    %30 = vector.load %arg6[%c0_16, %c0_17] : memref<1x512xf32, #tpu.memory_space<vmem>>, vector<1x512xf32>
    %c0_18 = arith.constant 0 : index
    %c0_19 = arith.constant 0 : index
    %31 = vector.load %arg7[%c0_18, %c0_19] : memref<1x512xf32, #tpu.memory_space<vmem>>, vector<1x512xf32>
    %cst_20 = arith.constant dense<0.000000e+00> : vector<512xf32>
    %32 = vector.multi_reduction <add>, %29, %cst_20 [0] : vector<8x512xf32> to vector<512xf32>
    %33 = vector.shape_cast %32 : vector<512xf32> to vector<1x512xf32>
    %cst_21 = arith.constant 8.000000e+00 : f32
    %34 = vector.broadcast %cst_21 : f32 to vector<1x512xf32>
    %35 = arith.divf %33, %34 : vector<1x512xf32>
    %36 = vector.broadcast %35 : vector<1x512xf32> to vector<8x512xf32>
    %37 = arith.subf %29, %36 : vector<8x512xf32>
    %38 = arith.mulf %37, %37 : vector<8x512xf32>
    %cst_22 = arith.constant dense<0.000000e+00> : vector<512xf32>
    %39 = vector.multi_reduction <add>, %38, %cst_22 [0] : vector<8x512xf32> to vector<512xf32>
    %40 = vector.shape_cast %39 : vector<512xf32> to vector<1x512xf32>
    %cst_23 = arith.constant 8.000000e+00 : f32
    %41 = vector.broadcast %cst_23 : f32 to vector<1x512xf32>
    %42 = arith.divf %40, %41 : vector<1x512xf32>
    %cst_24 = arith.constant 9.99999974E-6 : f32
    %43 = vector.broadcast %cst_24 : f32 to vector<1x512xf32>
    %44 = arith.addf %42, %43 : vector<1x512xf32>
    %45 = math.rsqrt %44 : vector<1x512xf32>
    %46 = arith.mulf %30, %45 : vector<1x512xf32>
    %47 = vector.broadcast %46 : vector<1x512xf32> to vector<8x512xf32>
    %48 = arith.mulf %37, %47 : vector<8x512xf32>
    %49 = vector.broadcast %31 : vector<1x512xf32> to vector<8x512xf32>
    %50 = arith.addf %48, %49 : vector<8x512xf32>
    %cst_25 = arith.constant 0.000000e+00 : f32
    %51 = vector.broadcast %cst_25 : f32 to vector<8x512xf32>
    %52 = arith.maximumf %50, %51 : vector<8x512xf32>
    %53 = arith.truncf %52 : vector<8x512xf32> to vector<8x512xbf16>
    %c0_26 = arith.constant 0 : index
    %c0_27 = arith.constant 0 : index
    %54 = vector.load %arg8[%c0_26, %c0_27] : memref<512x1024xbf16, #tpu.memory_space<vmem>>, vector<512x1024xbf16>
    %cst_28 = arith.constant dense<0.000000e+00> : vector<8x1024xf32>
    %55 = tpu.matmul %53, %54, %cst_28 {dimension_numbers = #tpu.dot_dimension_numbers<[1], [0], [0], [1], [0, 0, 1, 1], [], []>} : vector<8x512xbf16>, vector<512x1024xbf16>, vector<8x1024xf32> -> vector<8x1024xf32>
    %c0_29 = arith.constant 0 : index
    %c0_30 = arith.constant 0 : index
    %56 = vector.load %arg9[%c0_29, %c0_30] : memref<1x1024xf32, #tpu.memory_space<vmem>>, vector<1x1024xf32>
    %c0_31 = arith.constant 0 : index
    %c0_32 = arith.constant 0 : index
    %57 = vector.load %arg10[%c0_31, %c0_32] : memref<1x1024xf32, #tpu.memory_space<vmem>>, vector<1x1024xf32>
    %cst_33 = arith.constant dense<0.000000e+00> : vector<1024xf32>
    %58 = vector.multi_reduction <add>, %55, %cst_33 [0] : vector<8x1024xf32> to vector<1024xf32>
    %59 = vector.shape_cast %58 : vector<1024xf32> to vector<1x1024xf32>
    %cst_34 = arith.constant 8.000000e+00 : f32
    %60 = vector.broadcast %cst_34 : f32 to vector<1x1024xf32>
    %61 = arith.divf %59, %60 : vector<1x1024xf32>
    %62 = vector.broadcast %61 : vector<1x1024xf32> to vector<8x1024xf32>
    %63 = arith.subf %55, %62 : vector<8x1024xf32>
    %64 = arith.mulf %63, %63 : vector<8x1024xf32>
    %cst_35 = arith.constant dense<0.000000e+00> : vector<1024xf32>
    %65 = vector.multi_reduction <add>, %64, %cst_35 [0] : vector<8x1024xf32> to vector<1024xf32>
    %66 = vector.shape_cast %65 : vector<1024xf32> to vector<1x1024xf32>
    %cst_36 = arith.constant 8.000000e+00 : f32
    %67 = vector.broadcast %cst_36 : f32 to vector<1x1024xf32>
    %68 = arith.divf %66, %67 : vector<1x1024xf32>
    %cst_37 = arith.constant 9.99999974E-6 : f32
    %69 = vector.broadcast %cst_37 : f32 to vector<1x1024xf32>
    %70 = arith.addf %68, %69 : vector<1x1024xf32>
    %71 = math.rsqrt %70 : vector<1x1024xf32>
    %72 = arith.mulf %56, %71 : vector<1x1024xf32>
    %73 = vector.broadcast %72 : vector<1x1024xf32> to vector<8x1024xf32>
    %74 = arith.mulf %63, %73 : vector<8x1024xf32>
    %75 = vector.broadcast %57 : vector<1x1024xf32> to vector<8x1024xf32>
    %76 = arith.addf %74, %75 : vector<8x1024xf32>
    %cst_38 = arith.constant 0.000000e+00 : f32
    %77 = vector.broadcast %cst_38 : f32 to vector<8x1024xf32>
    %78 = arith.maximumf %76, %77 : vector<8x1024xf32>
    %c0_39 = arith.constant 0 : index
    %c0_40 = arith.constant 0 : index
    %79 = vector.load %arg11[%c0_39, %c0_40] : memref<8x1024xf32, #tpu.memory_space<vmem>>, vector<8x1024xf32>
    tpu.vector_store %arg11[%c0_39, %c0_40], %78 {strides = array<i32>} : memref<8x1024xf32, #tpu.memory_space<vmem>>, vector<8x1024xf32>,
    return
  }
  func.func @transform_0(%arg0: i32) -> (i32, i32) {
    %c0_i32 = arith.constant 0 : i32
    %c0_i32_0 = arith.constant 0 : i32
    %c0_i32_1 = arith.constant 0 : i32
    return %c0_i32, %c0_i32_0 : i32, i32
  }
  func.func @transform_1(%arg0: i32) -> (i32, i32) {
    %c0_i32 = arith.constant 0 : i32
    %c0_i32_0 = arith.constant 0 : i32
    %c0_i32_1 = arith.constant 0 : i32
    return %c0_i32, %c0_i32_0 : i32, i32
  }
  func.func @transform_2(%arg0: i32) -> (i32, i32) {
    %c0_i32 = arith.constant 0 : i32
    %c0_i32_0 = arith.constant 0 : i32
    %c0_i32_1 = arith.constant 0 : i32
    return %c0_i32, %c0_i32_0 : i32, i32
  }
  func.func @transform_3(%arg0: i32) -> (i32, i32) {
    %c0_i32 = arith.constant 0 : i32
    %c0_i32_0 = arith.constant 0 : i32
    %c0_i32_1 = arith.constant 0 : i32
    return %c0_i32, %c0_i32_0 : i32, i32
  }
  func.func @transform_4(%arg0: i32) -> (i32, i32) {
    %c0_i32 = arith.constant 0 : i32
    %c0_i32_0 = arith.constant 0 : i32
    %c0_i32_1 = arith.constant 0 : i32
    return %c0_i32, %c0_i32_0 : i32, i32
  }
  func.func @transform_5(%arg0: i32) -> (i32, i32) {
    %c0_i32 = arith.constant 0 : i32
    %c0_i32_0 = arith.constant 0 : i32
    %c0_i32_1 = arith.constant 0 : i32
    return %c0_i32, %c0_i32_0 : i32, i32
  }
  func.func @transform_6(%arg0: i32) -> (i32, i32) {
    %c0_i32 = arith.constant 0 : i32
    %c0_i32_0 = arith.constant 0 : i32
    %c0_i32_1 = arith.constant 0 : i32
    return %c0_i32, %c0_i32_0 : i32, i32
  }
  func.func @transform_7(%arg0: i32) -> (i32, i32) {
    %c0_i32 = arith.constant 0 : i32
    %c0_i32_0 = arith.constant 0 : i32
    %c0_i32_1 = arith.constant 0 : i32
    return %c0_i32, %c0_i32_0 : i32, i32
  }
  func.func @transform_8(%arg0: i32) -> (i32, i32) {
    %c0_i32 = arith.constant 0 : i32
    %c0_i32_0 = arith.constant 0 : i32
    %c0_i32_1 = arith.constant 0 : i32
    return %c0_i32, %c0_i32_0 : i32, i32
  }
  func.func @transform_9(%arg0: i32) -> (i32, i32) {
    %c0_i32 = arith.constant 0 : i32
    %c0_i32_0 = arith.constant 0 : i32
    %c0_i32_1 = arith.constant 0 : i32
    return %c0_i32, %c0_i32_0 : i32, i32
  }
  func.func @transform_10(%arg0: i32) -> (i32, i32) {
    %c0_i32 = arith.constant 0 : i32
    %c0_i32_0 = arith.constant 0 : i32
    %c0_i32_1 = arith.constant 0 : i32
    return %c0_i32, %c0_i32_0 : i32, i32
  }
}

</mosaic_0001>

<bundles_post_ra>
// kernel: linear_forward.1
= control target key start
LH: loop header
LB: loop body
LE: loop exit
PB: predicated region body
PF: predicated region fallthrough
CT: control target
= control target key end

     0   :  { %15 = vsyncpa [#allocation3], 0  ;;  %s6943_s0 = inlined_call_operand.vmem [shape: f32[8,256], index: 0, kind: input, shape index: {}]   ;;  %s6944_s1 = inlined_call_operand.hbm [shape: bf16[256,512], index: 1, kind: input, shape index: {}]   ;;  %s6945_s2 = inlined_call_operand.vmem [shape: f32[1,512], index: 2, kind: input, shape index: {}]   ;;  %s6946_s3 = inlined_call_operand.vmem [shape: f32[1,512], index: 3, kind: input, shape index: {}]   ;;  %s6947_s4 = inlined_call_operand.hbm [shape: bf16[512,512], index: 4, kind: input, shape index: {}]   ;;  %s6948_s5 = inlined_call_operand.vmem [shape: f32[1,512], index: 5, kind: input, shape index: {}]   ;;  %s6949_s6 = inlined_call_operand.vmem [shape: f32[1,512], index: 6, kind: input, shape index: {}]   ;;  %s6950_s7 = inlined_call_operand.hbm [shape: bf16[512,1024], index: 7, kind: input, shape index: {}]   ;;  %s6951_s8 = inlined_call_operand.vmem [shape: f32[1,1024], index: 8, kind: input, shape index: {}]   ;;  %s6952_s9 = inlined_call_operand.vmem [shape: f32[1,1024], index: 9, kind: input, shape index: {}]   ;;  %s6953_s10 = inlined_call_operand.hbm [shape: f32[8,1024], index: 10, kind: output, shape index: {}]  }
   0x1   :  { %16 = vsyncpa [#allocation6], 0 }
   0x2   :  { %17 = vsyncpa [#allocation4], 0  ;;  %s41_s15 = sshll.u32 %s6947_s4, 4  ;;  %s6540_s16 = smov [#allocation5]   ;;  %s42_s15 = int_to_ptr.hbm [resolvable:$true] %s41_s15 }
   0x3   :  { %s43_s17 = sshll.u32 %s6540_s16, 4  ;;  %s24_s20 = sshll.u32 %s6944_s1, 4  ;;  %s44_s17 = int_to_ptr.vmem [resolvable:$true] %s43_s17  ;;  %s25_s20 = int_to_ptr.hbm [resolvable:$true] %s24_s20 }
   0x4   :  { %s6541_s21 = smov 256   ;;  %s6542_s22 = smov 16  }
   0x5   :  { %49 = dma.hbm_to_vmem [thread:$0]  %s42_s15, 16384, %s44_s17, [#allocation6], %s6541_s21, %s6541_s21, %s6542_s22  }
   0x6   :  { %s6543_s23 = smov [#allocation2]   ;;  %s58_s27 = sshll.u32 %s6950_s7, 4  ;;  %s59_s27 = int_to_ptr.hbm [resolvable:$true] %s58_s27 }
   0x7   :  { %s26_s24 = sshll.u32 %s6543_s23, 4  ;;  %s6544_s4 = smov [#allocation7]   ;;  %s27_s24 = int_to_ptr.vmem [resolvable:$true] %s26_s24 }
   0x8   :  { %32 = dma.hbm_to_vmem [thread:$0]  %s25_s20, 8192, %s27_s24, [#allocation3], %s6541_s21, %s6541_s21, %s6542_s22  }
   0x9   :  { %s60_s28 = sshll.u32 %s6544_s4, 4  ;;  %s6545_s29 = smov 512   ;;  %s61_s28 = int_to_ptr.vmem [resolvable:$true] %s60_s28 }
   0xa   :  { %s6546_s30 = smov 32  }
   0xb   :  { %66 = dma.hbm_to_vmem [thread:$0]  %s59_s27, 32768, %s61_s28, [#allocation6], %s6545_s29, %s6545_s29, %s6546_s30  }
   0xc   :  { %6534 = dma.done.wait [#allocation3], 8192  }
   0xd   :  { %6535 = vsyncadd [#allocation3], 4294959104 }
   0xe   :  { %6536 = dma.done.wait [#allocation6], 49152  }
   0xf   :  { %6537 = vsyncadd [#allocation6], 4294918144  ;;  %v4269_v0 = vld [vmem:[#allocation2 + $0xe0] sm:$0xf]  ;;  %v5977_v1 = vld [vmem:[#allocation2 + $0xec] sm:$0xf0] }
  0x10   :  { %v4397_v2 = vld [vmem:[#allocation2 + $0x1e0] sm:$0xf]  ;;  %v4270_v3 = vor.u32 %v5977_v1, %v4269_v0  ;;  %v6009_v4 = vld [vmem:[#allocation2 + $0x1ec] sm:$0xf0]  ;;  %v5975_v5 = vld [vmem:[#allocation2 + $0xe4] sm:$0xf] }
  0x11   :  { %v4271_v6 = vld [vmem:[#allocation2 + $0xf0] sm:$0xf0]  ;;  %v4398_v7 = vor.u32 %v6009_v4, %v4397_v2  ;;  %v6007_v9 = vld [vmem:[#allocation2 + $0x1e4] sm:$0xf]  ;;  %v4253_v11 = vld [vmem:[#allocation2 + $0xc0] sm:$0xf] }
  0x12   :  { %v4274_v8 = vor.u32 %v5975_v5, %v4271_v6  ;;  %v4399_v10 = vld [vmem:[#allocation2 + $0x1f0] sm:$0xf0]  ;;  %471 = vmatpush.bf16.msra.mxu0 %v4270_v3  ;;  %v5973_v13 = vld [vmem:[#allocation2 + $0xcc] sm:$0xf0]  ;;  %v4381_v14 = vld [vmem:[#allocation2 + $0x1c0] sm:$0xf] }
  0x13   :  { %v4402_v12 = vor.u32 %v6007_v9, %v4399_v10  ;;  %v6005_v15 = vld [vmem:[#allocation2 + $0x1cc] sm:$0xf0]  ;;  %484 = vmatpush.bf16.msra.mxu1 %v4398_v7  ;;  %v4254_v16 = vor.u32 %v5973_v13, %v4253_v11  ;;  %v5971_v18 = vld [vmem:[#allocation2 + $0xc4] sm:$0xf]  ;;  %v4255_v19 = vld [vmem:[#allocation2 + $0xd0] sm:$0xf0] }
  0x14   :  { %497 = vmatpush.bf16.msra.mxu2 %v4274_v8  ;;  %v4382_v17 = vor.u32 %v6005_v15, %v4381_v14  ;;  %v6003_v20 = vld [vmem:[#allocation2 + $0x1c4] sm:$0xf]  ;;  %v4258_v21 = vor.u32 %v5971_v18, %v4255_v19  ;;  %v4383_v22 = vld [vmem:[#allocation2 + $0x1d0] sm:$0xf0]  ;;  %v4237_v23 = vld [vmem:[#allocation2 + $0xa0] sm:$0xf] }
  0x15   :  { %510 = vmatpush.bf16.msra.mxu3 %v4402_v12  ;;  %v5969_v24 = vld [vmem:[#allocation2 + $0xac] sm:$0xf0]  ;;  %v4386_v25 = vor.u32 %v6003_v20, %v4383_v22  ;;  %v4365_v26 = vld [vmem:[#allocation2 + $0x1a0] sm:$0xf]  ;;  %v5967_v28 = vld [vmem:[#allocation2 + $0xa4] sm:$0xf] }
  0x16   :  { %v6001_v27 = vld [vmem:[#allocation2 + $0x1ac] sm:$0xf0]  ;;  %472 = vmatpush.bf16.msra.mxu0 %v4254_v16  ;;  %v4238_v29 = vor.u32 %v5969_v24, %v4237_v23  ;;  %v4239_v30 = vld [vmem:[#allocation2 + $0xb0] sm:$0xf0]  ;;  %v5999_v31 = vld [vmem:[#allocation2 + $0x1a4] sm:$0xf] }
  0x17   :  { %v4367_v32 = vld [vmem:[#allocation2 + $0x1b0] sm:$0xf0]  ;;  %485 = vmatpush.bf16.msra.mxu1 %v4382_v17  ;;  %v4366_v33 = vor.u32 %v6001_v27, %v4365_v26  ;;  %v4242_v34 = vor.u32 %v5967_v28, %v4239_v30  ;;  %v4221_v35 = vld [vmem:[#allocation2 + $0x80] sm:$0xf]  ;;  %v5965_v36 = vld [vmem:[#allocation2 + $0x8c] sm:$0xf0] }
  0x18   :  { %498 = vmatpush.bf16.msra.mxu2 %v4258_v21  ;;  %v4349_v37 = vld [vmem:[#allocation2 + $0x180] sm:$0xf]  ;;  %v4370_v38 = vor.u32 %v5999_v31, %v4367_v32  ;;  %v5997_v39 = vld [vmem:[#allocation2 + $0x18c] sm:$0xf0]  ;;  %v5963_v40 = vld [vmem:[#allocation2 + $0x84] sm:$0xf]  ;;  %v4222_v44 = vor.u32 %v5965_v36, %v4221_v35 }
  0x19   :  { %511 = vmatpush.bf16.msra.mxu3 %v4386_v25  ;;  %v4223_v41 = vld [vmem:[#allocation2 + $0x90] sm:$0xf0]  ;;  %v5995_v42 = vld [vmem:[#allocation2 + $0x184] sm:$0xf]  ;;  %v4350_v45 = vor.u32 %v5997_v39, %v4349_v37  ;;  %v4205_v47 = vld [vmem:[#allocation2 + $0x60] sm:$0xf] }
  0x1a   :  { %v4351_v43 = vld [vmem:[#allocation2 + $0x190] sm:$0xf0]  ;;  %473 = vmatpush.bf16.msra.mxu0 %v4238_v29  ;;  %v4226_v46 = vor.u32 %v5963_v40, %v4223_v41  ;;  %v5961_v48 = vld [vmem:[#allocation2 + $0x6c] sm:$0xf0]  ;;  %v4333_v49 = vld [vmem:[#allocation2 + $0x160] sm:$0xf] }
  0x1b   :  { %486 = vmatpush.bf16.msra.mxu1 %v4366_v33  ;;  %v4354_v50 = vor.u32 %v5995_v42, %v4351_v43  ;;  %v5993_v51 = vld [vmem:[#allocation2 + $0x16c] sm:$0xf0]  ;;  %v5959_v52 = vld [vmem:[#allocation2 + $0x64] sm:$0xf]  ;;  %v4207_v53 = vld [vmem:[#allocation2 + $0x70] sm:$0xf0]  ;;  %v4206_v56 = vor.u32 %v5961_v48, %v4205_v47 }
  0x1c   :  { %499 = vmatpush.bf16.msra.mxu2 %v4242_v34  ;;  %v5991_v54 = vld [vmem:[#allocation2 + $0x164] sm:$0xf]  ;;  %v4335_v55 = vld [vmem:[#allocation2 + $0x170] sm:$0xf0]  ;;  %v4334_v57 = vor.u32 %v5993_v51, %v4333_v49  ;;  %v4210_v58 = vor.u32 %v5959_v52, %v4207_v53  ;;  %v4189_v59 = vld [vmem:[#allocation2 + $0x40] sm:$0xf] }
  0x1d   :  { %512 = vmatpush.bf16.msra.mxu3 %v4370_v38  ;;  %v5957_v60 = vld [vmem:[#allocation2 + $0x4c] sm:$0xf0]  ;;  %v4317_v61 = vld [vmem:[#allocation2 + $0x140] sm:$0xf]  ;;  %v4338_v62 = vor.u32 %v5991_v54, %v4335_v55  ;;  %v5955_v0 = vld [vmem:[#allocation2 + $0x44] sm:$0xf] }
  0x1e   :  { %474 = vmatpush.bf16.msra.mxu0 %v4222_v44  ;;  %v5989_v63 = vld [vmem:[#allocation2 + $0x14c] sm:$0xf0]  ;;  %v4191_v1 = vld [vmem:[#allocation2 + $0x50] sm:$0xf0]  ;;  %v5987_v2 = vld [vmem:[#allocation2 + $0x144] sm:$0xf]  ;;  %v4190_v4 = vor.u32 %v5957_v60, %v4189_v59 }
  0x1f   :  { %487 = vmatpush.bf16.msra.mxu1 %v4350_v45  ;;  %v4319_v3 = vld [vmem:[#allocation2 + $0x150] sm:$0xf0]  ;;  %v4318_v5 = vor.u32 %v5989_v63, %v4317_v61  ;;  %v4194_v6 = vor.u32 %v5955_v0, %v4191_v1  ;;  %v4173_v7 = vld [vmem:[#allocation2 + $0x20] sm:$0xf]  ;;  %v5953_v8 = vld [vmem:[#allocation2 + $0x2c] sm:$0xf0] }
  0x20   :  { %500 = vmatpush.bf16.msra.mxu2 %v4226_v46  ;;  %v4301_v9 = vld [vmem:[#allocation2 + $0x120] sm:$0xf]  ;;  %v4322_v10 = vor.u32 %v5987_v2, %v4319_v3  ;;  %v5985_v11 = vld [vmem:[#allocation2 + $0x12c] sm:$0xf0]  ;;  %v5951_v12 = vld [vmem:[#allocation2 + $0x24] sm:$0xf]  ;;  %v4174_v16 = vor.u32 %v5953_v8, %v4173_v7 }
  0x21   :  { %513 = vmatpush.bf16.msra.mxu3 %v4354_v50  ;;  %v4175_v13 = vld [vmem:[#allocation2 + $0x30] sm:$0xf0]  ;;  %v5983_v14 = vld [vmem:[#allocation2 + $0x124] sm:$0xf]  ;;  %v4157_v17 = vld [vmem:[#allocation2] sm:$0xf]  ;;  %v4302_v19 = vor.u32 %v5985_v11, %v4301_v9 }
  0x22   :  { %475 = vmatpush.bf16.msra.mxu0 %v4206_v56  ;;  %v4303_v15 = vld [vmem:[#allocation2 + $0x130] sm:$0xf0]  ;;  %v5949_v18 = vld [vmem:[#allocation2 + $0xc] sm:$0xf0]  ;;  %v4178_v20 = vor.u32 %v5951_v12, %v4175_v13  ;;  %v4285_v21 = vld [vmem:[#allocation2 + $0x100] sm:$0xf] }
  0x23   :  { %488 = vmatpush.bf16.msra.mxu1 %v4334_v57  ;;  %v5981_v22 = vld [vmem:[#allocation2 + $0x10c] sm:$0xf0]  ;;  %v5947_v23 = vld [vmem:[#allocation2 + $0x4] sm:$0xf]  ;;  %v4306_v24 = vor.u32 %v5983_v14, %v4303_v15  ;;  %v4159_v25 = vld [vmem:[#allocation2 + $0x10] sm:$0xf0]  ;;  %v4158_v31 = vor.u32 %v5949_v18, %v4157_v17 }
  0x24   :  { %501 = vmatpush.bf16.msra.mxu2 %v4210_v58  ;;  %v5979_v26 = vld [vmem:[#allocation2 + $0x104] sm:$0xf]  ;;  %v4287_v27 = vld [vmem:[#allocation2 + $0x110] sm:$0xf0]  ;;  %v4277_v28 = vld [vmem:[#allocation2 + $0xe8] sm:$0xf]  ;;  %v4286_v35 = vor.u32 %v5981_v22, %v4285_v21  ;;  %v4162_v36 = vor.u32 %v5947_v23, %v4159_v25 }
  0x25   :  { %514 = vmatpush.bf16.msra.mxu3 %v4338_v62  ;;  %v5978_v29 = vld [vmem:[#allocation2 + $0xf4] sm:$0xf0]  ;;  %v4405_v30 = vld [vmem:[#allocation2 + $0x1e8] sm:$0xf]  ;;  %v5976_v33 = vld [vmem:[#allocation2 + $0xec] sm:$0xf]  ;;  %v4290_v40 = vor.u32 %v5979_v26, %v4287_v27 }
  0x26   :  { %476 = vmatpush.bf16.msra.mxu0 %v4190_v4  ;;  %v6010_v32 = vld [vmem:[#allocation2 + $0x1f4] sm:$0xf0]  ;;  %v4279_v34 = vld [vmem:[#allocation2 + $0xf8] sm:$0xf0]  ;;  %v6008_v37 = vld [vmem:[#allocation2 + $0x1ec] sm:$0xf]  ;;  %v4278_v41 = vor.u32 %v5978_v29, %v4277_v28 }
  0x27   :  { %489 = vmatpush.bf16.msra.mxu1 %v4318_v5  ;;  %v4407_v38 = vld [vmem:[#allocation2 + $0x1f8] sm:$0xf0]  ;;  %v83_v39 = vld [vmem:[%s6943_s0] sm:$0xff]  ;;  %v84_v42 = vld [vmem:[%s6943_s0 + $0x8] sm:$0xff]  ;;  %v4406_v43 = vor.u32 %v6010_v32, %v4405_v30  ;;  %v4282_v44 = vor.u32 %v5976_v33, %v4279_v34  ;;  %vm699_vm12 = vcmask 1040384   ;;  %vm701_vm13 = vcmask 1042434  }
  0x28   :  { %502 = vmatpush.bf16.msra.mxu2 %v4194_v6  ;;  %v4261_v45 = vld [vmem:[#allocation2 + $0xc8] sm:$0xf]  ;;  %v5974_v46 = vld [vmem:[#allocation2 + $0xd4] sm:$0xf0]  ;;  %v4410_v48 = vor.u32 %v6008_v37, %v4407_v38  ;;  %v6619_v49 = vpack.c.bf16 %v83_v39, %v83_v39  ;;  %v5972_v51 = vld [vmem:[#allocation2 + $0xcc] sm:$0xf]  ;;  %v6621_v53 = vpack.c.bf16 %v84_v42, %v84_v42 }
  0x29   :  { %515 = vmatpush.bf16.msra.mxu3 %v4322_v10  ;;  %v4389_v47 = vld [vmem:[#allocation2 + $0x1c8] sm:$0xf]  ;;  %v6006_v50 = vld [vmem:[#allocation2 + $0x1d4] sm:$0xf0]  ;;  %v4263_v52 = vld [vmem:[#allocation2 + $0xd8] sm:$0xf0]  ;;  %v4262_v56 = vor.u32 %v5974_v46, %v4261_v45 }
  0x2a   :  { %477 = vmatpush.bf16.msra.mxu0 %v4174_v16  ;;  %v6004_v54 = vld [vmem:[#allocation2 + $0x1cc] sm:$0xf]  ;;  %v4391_v55 = vld [vmem:[#allocation2 + $0x1d8] sm:$0xf0]  ;;  %v4390_v57 = vor.u32 %v6006_v50, %v4389_v47  ;;  %v4266_v58 = vor.u32 %v5972_v51, %v4263_v52  ;;  %v4245_v59 = vld [vmem:[#allocation2 + $0xa8] sm:$0xf] }
  0x2b   :  { %490 = vmatpush.bf16.msra.mxu1 %v4302_v19  ;;  %v5970_v60 = vld [vmem:[#allocation2 + $0xb4] sm:$0xf0]  ;;  %v4373_v61 = vld [vmem:[#allocation2 + $0x1a8] sm:$0xf]  ;;  %v4394_v62 = vor.u32 %v6004_v54, %v4391_v55  ;;  %v5968_v0 = vld [vmem:[#allocation2 + $0xac] sm:$0xf] }
  0x2c   :  { %503 = vmatpush.bf16.msra.mxu2 %v4178_v20  ;;  %v6002_v63 = vld [vmem:[#allocation2 + $0x1b4] sm:$0xf0]  ;;  %v4247_v1 = vld [vmem:[#allocation2 + $0xb8] sm:$0xf0]  ;;  %v6000_v2 = vld [vmem:[#allocation2 + $0x1ac] sm:$0xf]  ;;  %v4246_v4 = vor.u32 %v5970_v60, %v4245_v59 }
  0x2d   :  { %516 = vmatpush.bf16.msra.mxu3 %v4306_v24  ;;  %v4375_v3 = vld [vmem:[#allocation2 + $0x1b8] sm:$0xf0]  ;;  %v4374_v5 = vor.u32 %v6002_v63, %v4373_v61  ;;  %v4250_v6 = vor.u32 %v5968_v0, %v4247_v1  ;;  %v4229_v7 = vld [vmem:[#allocation2 + $0x88] sm:$0xf]  ;;  %v5966_v8 = vld [vmem:[#allocation2 + $0x94] sm:$0xf0] }
  0x2e   :  { %478 = vmatpush.bf16.msra.mxu0 %v4158_v31  ;;  %v4357_v9 = vld [vmem:[#allocation2 + $0x188] sm:$0xf]  ;;  %v4378_v10 = vor.u32 %v6000_v2, %v4375_v3  ;;  %v5998_v11 = vld [vmem:[#allocation2 + $0x194] sm:$0xf0]  ;;  %v5964_v12 = vld [vmem:[#allocation2 + $0x8c] sm:$0xf]  ;;  %v4230_v16 = vor.u32 %v5966_v8, %v4229_v7 }
  0x2f   :  { %491 = vmatpush.bf16.msra.mxu1 %v4286_v35  ;;  %v4231_v13 = vld [vmem:[#allocation2 + $0x98] sm:$0xf0]  ;;  %v5996_v14 = vld [vmem:[#allocation2 + $0x18c] sm:$0xf]  ;;  %v4358_v17 = vor.u32 %v5998_v11, %v4357_v9  ;;  %v4213_v19 = vld [vmem:[#allocation2 + $0x68] sm:$0xf] }
  0x30   :  { %504 = vmatpush.bf16.msra.mxu2 %v4162_v36  ;;  %v4359_v15 = vld [vmem:[#allocation2 + $0x198] sm:$0xf0]  ;;  %v4234_v18 = vor.u32 %v5964_v12, %v4231_v13  ;;  %v5962_v20 = vld [vmem:[#allocation2 + $0x74] sm:$0xf0]  ;;  %v4341_v21 = vld [vmem:[#allocation2 + $0x168] sm:$0xf] }
  0x31   :  { %517 = vmatpush.bf16.msra.mxu3 %v4290_v40  ;;  %479 = vmatmul.bf16.vlgmr.msra.gmra.mxu0 %v6619_v49  ;;  %v4362_v22 = vor.u32 %v5996_v14, %v4359_v15  ;;  %v5994_v23 = vld [vmem:[#allocation2 + $0x174] sm:$0xf0]  ;;  %v5960_v24 = vld [vmem:[#allocation2 + $0x6c] sm:$0xf]  ;;  %v4215_v25 = vld [vmem:[#allocation2 + $0x78] sm:$0xf0]  ;;  %v4214_v28 = vor.u32 %v5962_v20, %v4213_v19 }
  0x32   :  { %523 = vmatpush.bf16.msrb.mxu0 %v4278_v41  ;;  %492 = vmatmul.bf16.vlgmr.msra.gmra.mxu1 %v6621_v53  ;;  %v5992_v26 = vld [vmem:[#allocation2 + $0x16c] sm:$0xf]  ;;  %v4343_v27 = vld [vmem:[#allocation2 + $0x178] sm:$0xf0]  ;;  %v4342_v29 = vor.u32 %v5994_v23, %v4341_v21  ;;  %v4218_v30 = vor.u32 %v5960_v24, %v4215_v25  ;;  %v4197_v31 = vld [vmem:[#allocation2 + $0x48] sm:$0xf] }
  0x33   :  { %536 = vmatpush.bf16.msrb.mxu1 %v4406_v43  ;;  %505 = vmatmul.bf16.vlgmr.msra.gmra.mxu2 %v6619_v49  ;;  %v5958_v32 = vld [vmem:[#allocation2 + $0x54] sm:$0xf0]  ;;  %v4325_v33 = vld [vmem:[#allocation2 + $0x148] sm:$0xf]  ;;  %v4346_v34 = vor.u32 %v5992_v26, %v4343_v27  ;;  %v5956_v36 = vld [vmem:[#allocation2 + $0x4c] sm:$0xf] }
  0x34   :  { %549 = vmatpush.bf16.msrb.mxu2 %v4282_v44  ;;  %518 = vmatmul.bf16.vlgmr.msra.gmra.mxu3 %v6621_v53  ;;  %v5990_v35 = vld [vmem:[#allocation2 + $0x154] sm:$0xf0]  ;;  %v4199_v37 = vld [vmem:[#allocation2 + $0x58] sm:$0xf0]  ;;  %v5988_v38 = vld [vmem:[#allocation2 + $0x14c] sm:$0xf]  ;;  %v4198_v40 = vor.u32 %v5958_v32, %v4197_v31 }
  0x35   :  { %562 = vmatpush.bf16.msrb.mxu3 %v4410_v48  ;;  %v4327_v39 = vld [vmem:[#allocation2 + $0x158] sm:$0xf0]  ;;  %v4326_v41 = vor.u32 %v5990_v35, %v4325_v33  ;;  %v4202_v42 = vor.u32 %v5956_v36, %v4199_v37  ;;  %v4181_v43 = vld [vmem:[#allocation2 + $0x28] sm:$0xf]  ;;  %v5954_v44 = vld [vmem:[#allocation2 + $0x34] sm:$0xf0] }
  0x36   :  { %524 = vmatpush.bf16.msrb.mxu0 %v4262_v56  ;;  %v4309_v45 = vld [vmem:[#allocation2 + $0x128] sm:$0xf]  ;;  %v4330_v46 = vor.u32 %v5988_v38, %v4327_v39  ;;  %v5986_v47 = vld [vmem:[#allocation2 + $0x134] sm:$0xf0]  ;;  %v5952_v48 = vld [vmem:[#allocation2 + $0x2c] sm:$0xf]  ;;  %v4182_v54 = vor.u32 %v5954_v44, %v4181_v43 }
  0x37   :  { %537 = vmatpush.bf16.msrb.mxu1 %v4390_v57  ;;  %v4183_v50 = vld [vmem:[#allocation2 + $0x38] sm:$0xf0]  ;;  %v5984_v51 = vld [vmem:[#allocation2 + $0x12c] sm:$0xf]  ;;  %v4310_v55 = vor.u32 %v5986_v47, %v4309_v45  ;;  %v4165_v57 = vld [vmem:[#allocation2 + $0x8] sm:$0xf] }
  0x38   :  { %550 = vmatpush.bf16.msrb.mxu2 %v4266_v58  ;;  %v4311_v52 = vld [vmem:[#allocation2 + $0x138] sm:$0xf0]  ;;  %v4186_v56 = vor.u32 %v5952_v48, %v4183_v50  ;;  %v5950_v58 = vld [vmem:[#allocation2 + $0x14] sm:$0xf0]  ;;  %v4293_v59 = vld [vmem:[#allocation2 + $0x108] sm:$0xf] }
  0x39   :  { %563 = vmatpush.bf16.msrb.mxu3 %v4394_v62  ;;  %v4314_v60 = vor.u32 %v5984_v51, %v4311_v52  ;;  %v5982_v61 = vld [vmem:[#allocation2 + $0x114] sm:$0xf0]  ;;  %v5948_v62 = vld [vmem:[#allocation2 + $0xc] sm:$0xf]  ;;  %v4167_v63 = vld [vmem:[#allocation2 + $0x18] sm:$0xf0]  ;;  %v4166_v2 = vor.u32 %v5950_v58, %v4165_v57 }
  0x3a   :  { %525 = vmatpush.bf16.msrb.mxu0 %v4246_v4  ;;  %v5980_v0 = vld [vmem:[#allocation2 + $0x10c] sm:$0xf]  ;;  %v4295_v1 = vld [vmem:[#allocation2 + $0x118] sm:$0xf0]  ;;  %v4294_v3 = vor.u32 %v5982_v61, %v4293_v59  ;;  %v4170_v4 = vor.u32 %v5948_v62, %v4167_v63  ;;  %v6073_v35 = vld [vmem:[#allocation5 + $0x1ec] sm:$0xf0] }
  0x3b   :  { %538 = vmatpush.bf16.msrb.mxu1 %v4374_v5  ;;  %v4298_v5 = vor.u32 %v5980_v0, %v4295_v1  ;;  %v4781_v36 = vld [vmem:[#allocation5 + $0x2e0] sm:$0xf]  ;;  %v6105_v39 = vld [vmem:[#allocation5 + $0x2ec] sm:$0xf0]  ;;  %vm703_vm15 = vcmask 1041408   ;;  %s4144_s22 = sshll.u32 %s6953_s10, 4  ;;  %s4145_s22 = int_to_ptr.hbm [resolvable:$true] %s4144_s22 }
  0x3c   :  { %551 = vmatpush.bf16.msrb.mxu2 %v4250_v6  ;;  %v6547_v6 = vmov 8.0   ;;  %v4782_v43 = vor.u32 %v6105_v39, %v4781_v36  ;;  %v6037_v47 = vld [vmem:[#allocation5 + $0xcc] sm:$0xf0]  ;;  %v4637_v51 = vld [vmem:[#allocation5 + $0x1c0] sm:$0xf] }
  0x3d   :  { %564 = vmatpush.bf16.msrb.mxu3 %v4378_v10  ;;  %6404 = vrcp.f32 %v6547_v6  ;;  %v6069_v52 = vld [vmem:[#allocation5 + $0x1cc] sm:$0xf0]  ;;  %v4893_v58 = vld [vmem:[#allocation5 + $0x3c0] sm:$0xf] }
  0x3e   :  { %526 = vmatpush.bf16.msrb.mxu0 %v4230_v16  ;;  %v6101_v57 = vld [vmem:[#allocation5 + $0x2cc] sm:$0xf0]  ;;  %v4493_v0 = vld [vmem:[#allocation5 + $0xa0] sm:$0xf] }
  0x3f   :  { %539 = vmatpush.bf16.msrb.mxu1 %v4358_v17  ;;  %v6133_v59 = vld [vmem:[#allocation5 + $0x3cc] sm:$0xf0] }
  0x40   :  { %552 = vmatpush.bf16.msrb.mxu2 %v4234_v18  ;;  %v4894_v62 = vor.u32 %v6133_v59, %v4893_v58  ;;  %v6033_v1 = vld [vmem:[#allocation5 + $0xac] sm:$0xf0] }
  0x41   :  { %565 = vmatpush.bf16.msrb.mxu3 %v4362_v22  ;;  %v6097_v6 = vld [vmem:[#allocation5 + $0x2ac] sm:$0xf0] }
  0x42   :  { %527 = vmatpush.bf16.msrb.mxu0 %v4214_v28  ;;  %v6057_v36 = vld [vmem:[#allocation5 + $0x16c] sm:$0xf0] }
  0x43   :  { %540 = vmatpush.bf16.msrb.mxu1 %v4342_v29  ;;  %v6405_v7 = vpop.eup %6404  ;;  %v4525_v29 = vld [vmem:[#allocation5 + $0xe0] sm:$0xf] }
  0x44   :  { %553 = vmatpush.bf16.msrb.mxu2 %v4218_v30  ;;  %v602_v8 = vmul.f32 8.0, %v6405_v7  ;;  %vm606_vm0 = vweird.f32 %v6405_v7  ;;  %v6041_v30 = vld [vmem:[#allocation5 + $0xec] sm:$0xf0] }
  0x45   :  { %566 = vmatpush.bf16.msrb.mxu3 %v4346_v34  ;;  %v4526_v33 = vor.u32 %v6041_v30, %v4525_v29  ;;  %v4653_v34 = vld [vmem:[#allocation5 + $0x1e0] sm:$0xf] }
  0x46   :  { %528 = vmatpush.bf16.msrb.mxu0 %v4198_v40  ;;  %v603_v11 = vsub.f32 1.0, %v602_v8  ;;  %v4654_v38 = vor.u32 %v6073_v35, %v4653_v34  ;;  %v4909_v40 = vld [vmem:[#allocation5 + $0x3e0] sm:$0xf] }
  0x47   :  { %541 = vmatpush.bf16.msrb.mxu1 %v4326_v41  ;;  %v6137_v41 = vld [vmem:[#allocation5 + $0x3ec] sm:$0xf0] }
  0x48   :  { %554 = vmatpush.bf16.msrb.mxu2 %v4202_v42  ;;  %v604_v14 = vmul.f32 %v6405_v7, %v603_v11  ;;  %v4910_v44 = vor.u32 %v6137_v41, %v4909_v40  ;;  %v6129_v11 = vld [vmem:[#allocation5 + $0x3ac] sm:$0xf0] }
  0x49   :  { %567 = vmatpush.bf16.msrb.mxu3 %v4330_v46  ;;  %v4509_v46 = vld [vmem:[#allocation5 + $0xc0] sm:$0xf]  ;;  %v6089_v41 = vld [vmem:[#allocation5 + $0x26c] sm:$0xf0] }
  0x4a   :  { %529 = vmatpush.bf16.msrb.mxu0 %v4182_v54  ;;  %v605_v20 = vadd.f32 %v6405_v7, %v604_v14  ;;  %v4510_v50 = vor.u32 %v6037_v47, %v4509_v46  ;;  %v4765_v54 = vld [vmem:[#allocation5 + $0x2c0] sm:$0xf] }
  0x4b   :  { %542 = vmatpush.bf16.msrb.mxu1 %v4310_v55  ;;  %v4766_v61 = vor.u32 %v6101_v57, %v4765_v54  ;;  %v4477_v14 = vld [vmem:[#allocation5 + $0x80] sm:$0xf] }
  0x4c   :  { %555 = vmatpush.bf16.msrb.mxu2 %v4186_v56  ;;  %v6631_v24 = vsel %vm606_vm0, %v6405_v7, %v605_v20  ;;  %v4638_v56 = vor.u32 %v6069_v52, %v4637_v51  ;;  %v4733_v20 = vld [vmem:[#allocation5 + $0x280] sm:$0xf] }
  0x4d   :  { %568 = vmatpush.bf16.msrb.mxu3 %v4314_v60  ;;  %v4573_v51 = vld [vmem:[#allocation5 + $0x140] sm:$0xf] }
  0x4e   :  { %530 = vmatpush.bf16.msrb.mxu0 %v4166_v2  ;;  %v4621_v2 = vld [vmem:[#allocation5 + $0x1a0] sm:$0xf] }
  0x4f   :  { %543 = vmatpush.bf16.msrb.mxu1 %v4294_v3  ;;  %v4494_v3 = vor.u32 %v6033_v1, %v4493_v0  ;;  %v4701_v57 = vld [vmem:[#allocation5 + $0x240] sm:$0xf] }
  0x50   :  { %556 = vmatpush.bf16.msrb.mxu2 %v4170_v4  ;;  %v6065_v4 = vld [vmem:[#allocation5 + $0x1ac] sm:$0xf0]  ;;  %v4829_v0 = vld [vmem:[#allocation5 + $0x340] sm:$0xf] }
  0x51   :  { %569 = vmatpush.bf16.msrb.mxu3 %v4298_v5  ;;  %531 = vmatmul.bf16.vlgmr.msrb.gmra.mxu0 %v6619_v49  ;;  %v4749_v5 = vld [vmem:[#allocation5 + $0x2a0] sm:$0xf]  ;;  %v4622_v8 = vor.u32 %v6065_v4, %v4621_v2  ;;  %v6117_v4 = vld [vmem:[#allocation5 + $0x34c] sm:$0xf0] }
  0x52   :  { %544 = vmatmul.bf16.vlgmr.msrb.gmra.mxu1 %v6621_v53  ;;  %1509 = vmatpush.bf16.msra.mxu0 %v4526_v33  ;;  %v4589_v33 = vld [vmem:[#allocation5 + $0x160] sm:$0xf] }
  0x53   :  { %557 = vmatmul.bf16.vlgmr.msrb.gmra.mxu2 %v6619_v49  ;;  %1522 = vmatpush.bf16.msra.mxu1 %v4654_v38  ;;  %v4590_v40 = vor.u32 %v6057_v36, %v4589_v33  ;;  %v4669_v36 = vld [vmem:[#allocation5 + $0x200] sm:$0xf] }
  0x54   :  { %570 = vmatmul.bf16.vlgmr.msrb.gmra.mxu3 %v6621_v53  ;;  %1535 = vmatpush.bf16.msra.mxu2 %v4782_v43  ;;  %v4845_v43 = vld [vmem:[#allocation5 + $0x360] sm:$0xf] }
  0x55   :  { %1548 = vmatpush.bf16.msra.mxu3 %v4910_v44 }
  0x56   :  { %1510 = vmatpush.bf16.msra.mxu0 %v4510_v50  ;;  %v6021_v50 = vld [vmem:[#allocation5 + $0x4c] sm:$0xf0] }
  0x57   :  { %1523 = vmatpush.bf16.msra.mxu1 %v4638_v56  ;;  %v6053_v56 = vld [vmem:[#allocation5 + $0x14c] sm:$0xf0] }
  0x58   :  { %1536 = vmatpush.bf16.msra.mxu2 %v4766_v61 }
  0x59   :  { %1549 = vmatpush.bf16.msra.mxu3 %v4894_v62  ;;  %v4574_v62 = vor.u32 %v6053_v56, %v4573_v51  ;;  %v6103_v56 = vld [vmem:[#allocation5 + $0x2e4] sm:$0xf] }
  0x5a   :  { %1511 = vmatpush.bf16.msra.mxu0 %v4494_v3 }
  0x5b   :  { %1524 = vmatpush.bf16.msra.mxu1 %v4622_v8  ;;  %v4429_v8 = vld [vmem:[#allocation5 + $0x20] sm:$0xf] }
  0xae   :  { %v480_v9 = vpop.f32.mrf.mxu0 }
  0xaf   :  { %v493_v10 = vpop.f32.mrf.mxu1 }
  0xb0   :  { %v494_v12 = vadd.f32 %v493_v10, %v480_v9  ;;  %v4750_v9 = vor.u32 %v6097_v6, %v4749_v5  ;;  %v4877_v10 = vld [vmem:[#allocation5 + $0x3a0] sm:$0xf]  ;;  %v4830_v6 = vor.u32 %v6117_v4, %v4829_v0  ;;  %v6067_v4 = vld [vmem:[#allocation5 + $0x1c4] sm:$0xf] }
  0xb2   :  { %v577_v13 = vrot.slane %v494_v12, 4  ;;  %1537 = vmatpush.bf16.msra.mxu2 %v4750_v9  ;;  %v6017_v9 = vld [vmem:[#allocation5 + $0x2c] sm:$0xf0] }
  0xb4   :  { %v578_v15 = vadd.f32 %v577_v13, %v494_v12 }
  0xb6   :  { %v506_v16 = vpop.f32.mrf.mxu2  ;;  %v579_v17 = vrot.slane %v578_v15, 2  ;;  %v482_v19 = vpop.f32.mrf.mxu0 }
  0xb7   :  { %v519_v18 = vpop.f32.mrf.mxu3  ;;  %v495_v49 = vpop.f32.mrf.mxu1  ;;  %v6061_v19 = vld [vmem:[#allocation5 + $0x18c] sm:$0xf0] }
  0xb8   :  { %v520_v21 = vadd.f32 %v519_v18, %v506_v16  ;;  %v580_v22 = vadd.f32 %v579_v17, %v578_v15  ;;  %v6029_v15 = vld [vmem:[#allocation5 + $0x8c] sm:$0xf0]  ;;  %v4605_v16 = vld [vmem:[#allocation5 + $0x180] sm:$0xf] }
  0xb9   :  { %v4478_v18 = vor.u32 %v6029_v15, %v4477_v14  ;;  %v6049_v14 = vld [vmem:[#allocation5 + $0x12c] sm:$0xf0]  ;;  %v4685_v15 = vld [vmem:[#allocation5 + $0x220] sm:$0xf] }
  0xba   :  { %v583_v53 = vrot.slane %v520_v21, 4  ;;  %v581_v23 = vrot.slane %v580_v22, 1 }
  0xbb   :  { %1512 = vmatpush.bf16.msra.mxu0 %v4478_v18 }
  0xbc   :  { %v584_v25 = vadd.f32 %v583_v53, %v520_v21  ;;  %v582_v26 = vadd.f32 %v581_v23, %v580_v22  ;;  %v4606_v53 = vor.u32 %v6061_v19, %v4605_v16  ;;  %v6081_v19 = vld [vmem:[#allocation5 + $0x22c] sm:$0xf0] }
  0xbe   :  { %v585_v27 = vrot.slane %v584_v25, 2  ;;  %v508_v28 = vpop.f32.mrf.mxu2  ;;  %v608_v31 = vmul.f32 %v6631_v24, %v582_v26  ;;  %v6125_v26 = vld [vmem:[#allocation5 + $0x38c] sm:$0xf0]  ;;  %1525 = vmatpush.bf16.msra.mxu1 %v4606_v53 }
  0xbf   :  { %v521_v32 = vpop.f32.mrf.mxu3 }
  0xc0   :  { %v586_v37 = vadd.f32 %v585_v27, %v584_v25  ;;  %v6634_v42 = vsub.f32 %v494_v12, %v608_v31  ;;  %v4878_v12 = vor.u32 %v6129_v11, %v4877_v10  ;;  %v4861_v25 = vld [vmem:[#allocation5 + $0x380] sm:$0xf]  ;;  %v6025_v32 = vld [vmem:[#allocation5 + $0x6c] sm:$0xf0] }
  0xc1   :  { %v4862_v28 = vor.u32 %v6125_v26, %v4861_v25  ;;  %v4461_v31 = vld [vmem:[#allocation5 + $0x60] sm:$0xf]  ;;  %v6013_v26 = vld [vmem:[#allocation5 + $0xc] sm:$0xf0] }
  0xc2   :  { %v587_v45 = vrot.slane %v586_v37, 1  ;;  %v616_v48 = vmul.f32 %v6634_v42, %v6634_v42  ;;  %1550 = vmatpush.bf16.msra.mxu3 %v4878_v12  ;;  %v4462_v35 = vor.u32 %v6025_v32, %v4461_v31  ;;  %1526 = vmatpush.bf16.msra.mxu1 %v4590_v40  ;;  %v4557_v10 = vld [vmem:[#allocation5 + $0x120] sm:$0xf]  ;;  %v6045_v32 = vld [vmem:[#allocation5 + $0x10c] sm:$0xf0] }
  0xc3   :  { %v4558_v18 = vor.u32 %v6049_v14, %v4557_v10  ;;  %v4413_v25 = vld [vmem:[#allocation5] sm:$0xf] }
  0xc4   :  { %v588_v55 = vadd.f32 %v587_v45, %v586_v37  ;;  %v620_v60 = vrot.slane %v616_v48, 4  ;;  %v4717_v37 = vld [vmem:[#allocation5 + $0x260] sm:$0xf]  ;;  %1513 = vmatpush.bf16.msra.mxu0 %v4462_v35  ;;  %v6121_v45 = vld [vmem:[#allocation5 + $0x36c] sm:$0xf0] }
  0xc5   :  { %v4718_v44 = vor.u32 %v6089_v41, %v4717_v37  ;;  %v4846_v47 = vor.u32 %v6121_v45, %v4845_v43  ;;  %v4541_v31 = vld [vmem:[#allocation5 + $0x100] sm:$0xf]  ;;  %v6077_v37 = vld [vmem:[#allocation5 + $0x20c] sm:$0xf0]  ;;  %v6039_v45 = vld [vmem:[#allocation5 + $0xe4] sm:$0xf] }
  0xc6   :  { %v609_v63 = vmul.f32 %v6631_v24, %v588_v55  ;;  %v621_v17 = vadd.f32 %v620_v60, %v616_v48  ;;  %1551 = vmatpush.bf16.msra.mxu3 %v4862_v28  ;;  %v4445_v48 = vld [vmem:[#allocation5 + $0x40] sm:$0xf]  ;;  %1527 = vmatpush.bf16.msra.mxu1 %v4574_v62  ;;  %v4542_v41 = vor.u32 %v6045_v32, %v4541_v31  ;;  %v4911_v62 = vld [vmem:[#allocation5 + $0x3f0] sm:$0xf0]  ;;  %v6127_v31 = vld [vmem:[#allocation5 + $0x3a4] sm:$0xf] }
  0xc7   :  { %v4446_v55 = vor.u32 %v6021_v50, %v4445_v48  ;;  %v4670_v43 = vor.u32 %v6077_v37, %v4669_v36  ;;  %v6071_v48 = vld [vmem:[#allocation5 + $0x1e4] sm:$0xf]  ;;  %v4655_v50 = vld [vmem:[#allocation5 + $0x1f0] sm:$0xf0] }
  0xc8   :  { %v6639_v7 = vsub.f32 %v520_v21, %v609_v63  ;;  %v6093_v21 = vld [vmem:[#allocation5 + $0x28c] sm:$0xf0]  ;;  %v622_v34 = vrot.slane %v621_v17, 2  ;;  %v4879_v32 = vld [vmem:[#allocation5 + $0x3b0] sm:$0xf0] }
  0xc9   :  { %v4734_v23 = vor.u32 %v6093_v21, %v4733_v20  ;;  %v6085_v63 = vld [vmem:[#allocation5 + $0x24c] sm:$0xf0]  ;;  %1514 = vmatpush.bf16.msra.mxu0 %v4446_v55  ;;  %v4813_v20 = vld [vmem:[#allocation5 + $0x320] sm:$0xf]  ;;  %v4658_v55 = vor.u32 %v6071_v48, %v4655_v50  ;;  %v6059_v36 = vld [vmem:[#allocation5 + $0x184] sm:$0xf] }
  0xca   :  { %v617_v13 = vmul.f32 %v6639_v7, %v6639_v7  ;;  %v623_v52 = vadd.f32 %v622_v34, %v621_v17  ;;  %1552 = vmatpush.bf16.msra.mxu3 %v4846_v47  ;;  %v4702_v3 = vor.u32 %v6085_v63, %v4701_v57  ;;  %1528 = vmatpush.bf16.msra.mxu1 %v4558_v18  ;;  %v4527_v47 = vld [vmem:[#allocation5 + $0xf0] sm:$0xf0]  ;;  %v6023_v50 = vld [vmem:[#allocation5 + $0x64] sm:$0xf] }
  0xcb   :  { %1538 = vmatpush.bf16.msra.mxu2 %v4734_v23  ;;  %v4783_v57 = vld [vmem:[#allocation5 + $0x2f0] sm:$0xf0] }
  0xcc   :  { %v626_v49 = vrot.slane %v617_v13, 4  ;;  %v624_v11 = vrot.slane %v623_v52, 1 }
  0xce   :  { %v532_v22 = vpop.f32.mrf.mxu0  ;;  %v627_v29 = vadd.f32 %v626_v49, %v617_v13  ;;  %v4430_v13 = vor.u32 %v6017_v9, %v4429_v8  ;;  %1553 = vmatpush.bf16.msra.mxu3 %v4830_v6  ;;  %v4686_v49 = vor.u32 %v6081_v19, %v4685_v15  ;;  %v625_v33 = vadd.f32 %v624_v11, %v623_v52  ;;  %v4639_v6 = vld [vmem:[#allocation5 + $0x1d0] sm:$0xf0]  ;;  %v6099_v8 = vld [vmem:[#allocation5 + $0x2c4] sm:$0xf] }
  0xcf   :  { %v545_v27 = vpop.f32.mrf.mxu1  ;;  %1539 = vmatpush.bf16.msra.mxu2 %v4718_v44  ;;  %v6109_v44 = vld [vmem:[#allocation5 + $0x30c] sm:$0xf0]  ;;  %1529 = vmatpush.bf16.msra.mxu1 %v4542_v41  ;;  %v4767_v11 = vld [vmem:[#allocation5 + $0x2d0] sm:$0xf0]  ;;  %v4642_v14 = vor.u32 %v6067_v4, %v4639_v6  ;;  %v6091_v41 = vld [vmem:[#allocation5 + $0x284] sm:$0xf] }
  0xd0   :  { %v6643_v30 = vadd.f32 %v545_v27, %v532_v22  ;;  %v628_v38 = vrot.slane %v627_v29, 2  ;;  %1515 = vmatpush.bf16.msra.mxu0 %v4430_v13  ;;  %v6113_v22 = vld [vmem:[#allocation5 + $0x32c] sm:$0xf0]  ;;  %v4770_v15 = vor.u32 %v6099_v8, %v4767_v11  ;;  %v6019_v8 = vld [vmem:[#allocation5 + $0x44] sm:$0xf] }
  0xd1   :  { %v4814_v23 = vor.u32 %v6113_v22, %v4813_v20  ;;  %v6063_v22 = vld [vmem:[#allocation5 + $0x1a4] sm:$0xf]  ;;  %v4575_v11 = vld [vmem:[#allocation5 + $0x150] sm:$0xf0] }
  0xd2   :  { %v589_v39 = vrot.slane %v6643_v30, 4  ;;  %v629_v58 = vadd.f32 %v628_v38, %v627_v29  ;;  %v4414_v29 = vor.u32 %v6013_v26, %v4413_v25  ;;  %v4797_v38 = vld [vmem:[#allocation5 + $0x300] sm:$0xf]  ;;  %v6095_v25 = vld [vmem:[#allocation5 + $0x2a4] sm:$0xf] }
  0xd3   :  { %1540 = vmatpush.bf16.msra.mxu2 %v4702_v3  ;;  %1554 = vmatpush.bf16.msra.mxu3 %v4814_v23  ;;  %v4511_v3 = vld [vmem:[#allocation5 + $0xd0] sm:$0xf0] }
  0xd4   :  { %v590_v46 = vadd.f32 %v589_v39, %v6643_v30  ;;  %v630_v16 = vrot.slane %v629_v58, 1  ;;  %1516 = vmatpush.bf16.msra.mxu0 %v4414_v29  ;;  %1574 = vmatpush.bf16.msrb.mxu1 %v4658_v55  ;;  %v4623_v23 = vld [vmem:[#allocation5 + $0x1b0] sm:$0xf0] }
  0xd5   :  { %v4751_v26 = vld [vmem:[#allocation5 + $0x2b0] sm:$0xf0]  ;;  %v4626_v29 = vor.u32 %v6063_v22, %v4623_v23 }
  0xd6   :  { %v558_v54 = vpop.f32.mrf.mxu2  ;;  %v591_v59 = vrot.slane %v590_v46, 2  ;;  %v534_v61 = vpop.f32.mrf.mxu0  ;;  %v631_v34 = vadd.f32 %v630_v16, %v629_v58  ;;  %v644_v58 = vmul.f32 %v625_v33, %v6631_v24  ;;  %v4895_v16 = vld [vmem:[#allocation5 + $0x3d0] sm:$0xf0]  ;;  %v4882_v33 = vor.u32 %v6127_v31, %v4879_v32  ;;  %v6079_v31 = vld [vmem:[#allocation5 + $0x224] sm:$0xf] }
  0xd7   :  { %v571_v60 = vpop.f32.mrf.mxu3  ;;  %v547_v2 = vpop.f32.mrf.mxu1  ;;  %1541 = vmatpush.bf16.msra.mxu2 %v4686_v49  ;;  %v6135_v61 = vld [vmem:[#allocation5 + $0x3e4] sm:$0xf]  ;;  %v4495_v49 = vld [vmem:[#allocation5 + $0xb0] sm:$0xf0] }
  0xd8   :  { %v6647_v1 = vadd.f32 %v571_v60, %v558_v54  ;;  %v592_v5 = vadd.f32 %v591_v59, %v590_v46  ;;  %v4798_v46 = vor.u32 %v6109_v44, %v4797_v38  ;;  %v4530_v54 = vor.u32 %v6039_v45, %v4527_v47  ;;  %v6035_v2 = vld [vmem:[#allocation5 + $0xc4] sm:$0xf]  ;;  %1575 = vmatpush.bf16.msrb.mxu1 %v4642_v14  ;;  %v4735_v44 = vld [vmem:[#allocation5 + $0x290] sm:$0xf0] }
  0xd9   :  { %v645_v59 = vmul.f32 %v631_v34, %v6631_v24  ;;  %v4786_v60 = vor.u32 %v6103_v56, %v4783_v57  ;;  %v4914_v0 = vor.u32 %v6135_v61, %v4911_v62  ;;  %v6660_v13 = vadd.f32 1e-05, %v644_v58  ;;  %v6027_v34 = vld [vmem:[#allocation5 + $0x84] sm:$0xf]  ;;  %v4591_v57 = vld [vmem:[#allocation5 + $0x170] sm:$0xf0] }
  0xda   :  { %v595_v12 = vrot.slane %v6647_v1, 4  ;;  %v593_v17 = vrot.slane %v592_v5, 1  ;;  %1555 = vmatpush.bf16.msra.mxu3 %v4798_v46  ;;  %1561 = vmatpush.bf16.msrb.mxu0 %v4530_v54  ;;  %v6123_v45 = vld [vmem:[#allocation5 + $0x384] sm:$0xf]  ;;  %v4863_v46 = vld [vmem:[#allocation5 + $0x390] sm:$0xf0]  ;;  %v4738_v54 = vor.u32 %v6091_v41, %v4735_v44 }
  0xdb   :  { %1542 = vmatpush.bf16.msra.mxu2 %v4670_v43  ;;  %v6662_v18 = vadd.f32 1e-05, %v645_v59  ;;  %v4866_v55 = vor.u32 %v6123_v45, %v4863_v46  ;;  %v6055_v56 = vld [vmem:[#allocation5 + $0x164] sm:$0xf]  ;;  %v4719_v62 = vld [vmem:[#allocation5 + $0x270] sm:$0xf0]  ;;  %vm658_vm11 = vweird.f32 %v6660_v13 }
  0xdc   :  { %v596_v21 = vadd.f32 %v595_v12, %v6647_v1  ;;  %v594_v53 = vadd.f32 %v593_v17, %v592_v5  ;;  %v4514_v5 = vor.u32 %v6035_v2, %v4511_v3  ;;  %v6131_v12 = vld [vmem:[#allocation5 + $0x3c4] sm:$0xf]  ;;  %1576 = vmatpush.bf16.msrb.mxu1 %v4626_v29  ;;  %v4847_v2 = vld [vmem:[#allocation5 + $0x370] sm:$0xf0] }
  0xdd   :  { %v6031_v17 = vld [vmem:[#allocation5 + $0xa4] sm:$0xf]  ;;  %6406 = vrsqrt.f32 %v6662_v18  ;;  %v4703_v14 = vld [vmem:[#allocation5 + $0x250] sm:$0xf0]  ;;  %vm668_vm2 = vweird.f32 %v6662_v18 }
  0xde   :  { %v597_v27 = vrot.slane %v596_v21, 2  ;;  %v560_v28 = vpop.f32.mrf.mxu2  ;;  %v610_v39 = vmul.f32 %v6631_v24, %v594_v53  ;;  %1600 = vmatpush.bf16.msrb.mxu3 %v4914_v0  ;;  %1562 = vmatpush.bf16.msrb.mxu0 %v4514_v5  ;;  %v4498_v53 = vor.u32 %v6031_v17, %v4495_v49  ;;  %v6087_v58 = vld [vmem:[#allocation5 + $0x264] sm:$0xf]  ;;  %6408 = vrsqrt.f32 %v6660_v13  ;;  %v4559_v29 = vld [vmem:[#allocation5 + $0x130] sm:$0xf0] }
  0xdf   :  { %v573_v35 = vpop.f32.mrf.mxu3  ;;  %1587 = vmatpush.bf16.msrb.mxu2 %v4786_v60  ;;  %v4722_v0 = vor.u32 %v6087_v58, %v4719_v62  ;;  %v4687_v32 = vld [vmem:[#allocation5 + $0x230] sm:$0xf0] }
  0xe0   :  { %v598_v40 = vadd.f32 %v597_v27, %v596_v21  ;;  %v6653_v51 = vsub.f32 %v6643_v30, %v610_v39  ;;  %v4898_v21 = vor.u32 %v6131_v12, %v4895_v16  ;;  %v4479_v35 = vld [vmem:[#allocation5 + $0x90] sm:$0xf0]  ;;  %v6083_v12 = vld [vmem:[#allocation5 + $0x244] sm:$0xf] }
  0xe1   :  { %v4482_v39 = vor.u32 %v6027_v34, %v4479_v35  ;;  %v4706_v22 = vor.u32 %v6083_v12, %v4703_v14  ;;  %v6111_v35 = vld [vmem:[#allocation5 + $0x324] sm:$0xf]  ;;  %v4415_v41 = vld [vmem:[#allocation5 + $0x10] sm:$0xf0] }
  0xe2   :  { %v599_v52 = vrot.slane %v598_v40, 1  ;;  %v618_v63 = vmul.f32 %v6653_v51, %v6653_v51  ;;  %1601 = vmatpush.bf16.msrb.mxu3 %v4898_v21  ;;  %1563 = vmatpush.bf16.msrb.mxu0 %v4498_v53  ;;  %v4831_v53 = vld [vmem:[#allocation5 + $0x350] sm:$0xf0] }
  0xe3   :  { %1588 = vmatpush.bf16.msrb.mxu2 %v4770_v15  ;;  %v6670_v3 = vpop.eup %6406  ;;  %v4543_v44 = vld [vmem:[#allocation5 + $0x110] sm:$0xf0] }
  0xe4   :  { %v600_v30 = vadd.f32 %v599_v52, %v598_v40  ;;  %v632_v9 = vrot.slane %v618_v63, 4  ;;  %v4607_v40 = vld [vmem:[#allocation5 + $0x190] sm:$0xf0]  ;;  %v663_v21 = vmul.f32 %v6670_v3, %v6662_v18  ;;  %vm669_vm1 = vweird.f32 %v6670_v3 }
  0xe5   :  { %v4610_v43 = vor.u32 %v6059_v36, %v4607_v40  ;;  %v4463_v52 = vld [vmem:[#allocation5 + $0x70] sm:$0xf0]  ;;  %v4690_v40 = vor.u32 %v6079_v31, %v4687_v32  ;;  %vm670_vm4 = vmor %vm668_vm2, %vm669_vm1 }
  0xe6   :  { %v611_v10 = vmul.f32 %v6631_v24, %v600_v30  ;;  %v633_v19 = vadd.f32 %v632_v9, %v618_v63  ;;  %1602 = vmatpush.bf16.msrb.mxu3 %v4882_v33  ;;  %1564 = vmatpush.bf16.msrb.mxu0 %v4482_v39  ;;  %v4466_v61 = vor.u32 %v6023_v50, %v4463_v52  ;;  %v6119_v63 = vld [vmem:[#allocation5 + $0x364] sm:$0xf]  ;;  %v4447_v9 = vld [vmem:[#allocation5 + $0x50] sm:$0xf0] }
  0xe7   :  { %1577 = vmatpush.bf16.msrb.mxu1 %v4610_v43  ;;  %v4594_v30 = vor.u32 %v6055_v56, %v4591_v57  ;;  %v4850_v6 = vor.u32 %v6119_v63, %v4847_v2  ;;  %v4450_v17 = vor.u32 %v6019_v8, %v4447_v9  ;;  %v4815_v36 = vld [vmem:[#allocation5 + $0x330] sm:$0xf0]  ;;  %v6043_v43 = vld [vmem:[#allocation5 + $0x104] sm:$0xf] }
  0xe8   :  { %v6665_v20 = vsub.f32 %v6647_v1, %v611_v10  ;;  %v634_v27 = vrot.slane %v633_v19, 2  ;;  %v4754_v1 = vor.u32 %v6095_v25, %v4751_v26  ;;  %v6051_v10 = vld [vmem:[#allocation5 + $0x144] sm:$0xf]  ;;  %v4818_v46 = vor.u32 %v6111_v35, %v4815_v36 }
  0xe9   :  { %v4578_v49 = vor.u32 %v6051_v10, %v4575_v11  ;;  %v6015_v26 = vld [vmem:[#allocation5 + $0x24] sm:$0xf] }
  0xea   :  { %v619_v28 = vmul.f32 %v6665_v20, %v6665_v20  ;;  %v635_v37 = vadd.f32 %v634_v27, %v633_v19  ;;  %1589 = vmatpush.bf16.msrb.mxu2 %v4754_v1  ;;  %1603 = vmatpush.bf16.msrb.mxu3 %v4866_v55  ;;  %v6115_v19 = vld [vmem:[#allocation5 + $0x344] sm:$0xf]  ;;  %v4431_v27 = vld [vmem:[#allocation5 + $0x30] sm:$0xf0]  ;;  %v6679_v1 = vpop.eup %6408 }
  0xeb   :  { %1565 = vmatpush.bf16.msrb.mxu0 %v4466_v61  ;;  %1578 = vmatpush.bf16.msrb.mxu1 %v4594_v30  ;;  %v4834_v25 = vor.u32 %v6115_v19, %v4831_v53  ;;  %v4434_v34 = vor.u32 %v6015_v26, %v4431_v27  ;;  %v653_v50 = vmul.f32 %v6679_v1, %v6660_v13  ;;  %v6107_v52 = vld [vmem:[#allocation5 + $0x304] sm:$0xf]  ;;  %vm659_vm7 = vweird.f32 %v6679_v1  ;;  %v576_v13 = vld [vmem:[%s6946_s3] sm:$0xf] }
  0xec   :  { %v638_v38 = vrot.slane %v619_v28, 4  ;;  %v636_v47 = vrot.slane %v635_v37, 1  ;;  %vm660_vm14 = vmor %vm658_vm11, %vm659_vm7  ;;  %v723_v31 = vperm.slane %v576_v13, 2  ;;  %v724_v32 = vperm.slane %v576_v13, 3 }
  0xed   :  { %v654_v62 = vmul.f32 %v6679_v1, %v653_v50  ;;  %v4789_v50 = vld [vmem:[#allocation5 + $0x2e8] sm:$0xf] }
  0xee   :  { %v639_v48 = vadd.f32 %v638_v38, %v619_v28  ;;  %v637_v59 = vadd.f32 %v636_v47, %v635_v37  ;;  %1590 = vmatpush.bf16.msrb.mxu2 %v4738_v54  ;;  %1604 = vmatpush.bf16.msrb.mxu3 %v4850_v6  ;;  %v6047_v28 = vld [vmem:[#allocation5 + $0x124] sm:$0xf]  ;;  %v664_v38 = vmul.f32 %v6670_v3, %v663_v21  ;;  %v4799_v54 = vld [vmem:[#allocation5 + $0x310] sm:$0xf0] }
  0xef   :  { %1566 = vmatpush.bf16.msrb.mxu0 %v4450_v17  ;;  %v6011_v37 = vld [vmem:[#allocation5 + $0x4] sm:$0xf]  ;;  %1579 = vmatpush.bf16.msrb.mxu1 %v4578_v49  ;;  %v4562_v39 = vor.u32 %v6047_v28, %v4559_v29  ;;  %v4802_v61 = vor.u32 %v6107_v52, %v4799_v54  ;;  %v721_v28 = vperm.slane %v576_v13, 0  ;;  %v722_v29 = vperm.slane %v576_v13, 1  ;;  %v6106_v52 = vld [vmem:[#allocation5 + $0x2f4] sm:$0xf0] }
  0xf0   :  { %v640_v60 = vrot.slane %v639_v48, 2  ;;  %v646_v4 = vmul.f32 %v637_v59, %v6631_v24  ;;  %v6075_v47 = vld [vmem:[#allocation5 + $0x204] sm:$0xf]  ;;  %v4418_v56 = vor.u32 %v6011_v37, %v4415_v41  ;;  %v665_v57 = vmul.f32 0.5, %v664_v38  ;;  %v4917_v54 = vld [vmem:[#allocation5 + $0x3e8] sm:$0xf] }
  0xf1   :  { %v4546_v59 = vor.u32 %v6043_v43, %v4543_v44 }
  0xf2   :  { %v641_v5 = vadd.f32 %v640_v60, %v639_v48  ;;  %v6674_v15 = vadd.f32 1e-05, %v646_v4  ;;  %1591 = vmatpush.bf16.msrb.mxu2 %v4722_v0  ;;  %1605 = vmatpush.bf16.msrb.mxu3 %v4834_v25  ;;  %v4671_v48 = vld [vmem:[#allocation5 + $0x210] sm:$0xf0]  ;;  %v666_v30 = vsub.f32 1.5, %v665_v57  ;;  %v655_v4 = vmul.f32 0.5, %v654_v62 }
  0xf3   :  { %1567 = vmatpush.bf16.msrb.mxu0 %v4434_v34  ;;  %1580 = vmatpush.bf16.msrb.mxu1 %v4562_v39  ;;  %v4674_v60 = vor.u32 %v6075_v47, %v4671_v48  ;;  %v4661_v47 = vld [vmem:[#allocation5 + $0x1e8] sm:$0xf]  ;;  %v6074_v48 = vld [vmem:[#allocation5 + $0x1f4] sm:$0xf0] }
  0xf4   :  { %v642_v16 = vrot.slane %v641_v5, 1  ;;  %6410 = vrsqrt.f32 %v6674_v15  ;;  %v667_v8 = vmul.f32 %v6670_v3, %v666_v30  ;;  %v656_v10 = vsub.f32 1.5, %v655_v4  ;;  %v4517_v62 = vld [vmem:[#allocation5 + $0xc8] sm:$0xf]  ;;  %v6070_v4 = vld [vmem:[#allocation5 + $0x1d4] sm:$0xf0] }
  0xf5   :  { %vm678_vm5 = vweird.f32 %v6674_v15  ;;  %v4790_v30 = vor.u32 %v6106_v52, %v4789_v50  ;;  %v6022_v50 = vld [vmem:[#allocation5 + $0x54] sm:$0xf0] }
  0xf6   :  { %v643_v23 = vadd.f32 %v642_v16, %v641_v5  ;;  %1592 = vmatpush.bf16.msrb.mxu2 %v4706_v22  ;;  %1606 = vmatpush.bf16.msrb.mxu3 %v4818_v46  ;;  %v671_v14 = vsel %vm670_vm4, %v6670_v3, %v667_v8  ;;  %v657_v17 = vmul.f32 %v6679_v1, %v656_v10  ;;  %v575_v22 = vld [vmem:[%s6945_s2] sm:$0xf]  ;;  %v6042_v46 = vld [vmem:[#allocation5 + $0xf4] sm:$0xf0]  ;;  %v4901_v8 = vld [vmem:[#allocation5 + $0x3c8] sm:$0xf] }
  0xf7   :  { %1568 = vmatpush.bf16.msrb.mxu0 %v4418_v56  ;;  %1581 = vmatpush.bf16.msrb.mxu1 %v4546_v59  ;;  %v696_v18 = vrot.slane %v671_v14, 7  ;;  %v6034_v14 = vld [vmem:[#allocation5 + $0xb4] sm:$0xf0] }
  0xf8   :  { %v647_v33 = vmul.f32 %v643_v23, %v6631_v24  ;;  %v661_v53 = vsel %vm660_vm14, %v6679_v1, %v657_v17 }
  0xf9   :  { %v700_v23 = vsel %vm699_vm12, %v661_v53, %v696_v18  ;;  %v4757_v18 = vld [vmem:[#allocation5 + $0x2a8] sm:$0xf] }
  0xfa   :  { %v651_v45 = vadd.f32 1e-05, %v647_v33  ;;  %v6411_v55 = vpop.eup %6410  ;;  %1593 = vmatpush.bf16.msrb.mxu2 %v4690_v40  ;;  %1607 = vmatpush.bf16.msrb.mxu3 %v4802_v61  ;;  %v4533_v40 = vld [vmem:[#allocation5 + $0xe8] sm:$0xf] }
  0xfb   :  { %v673_v58 = vmul.f32 %v6411_v55, %v6674_v15  ;;  %vm679_vm3 = vweird.f32 %v6411_v55 }
  0xfc   :  { %6412 = vrsqrt.f32 %v651_v45  ;;  %vm680_vm8 = vmor %vm678_vm5, %vm679_vm3  ;;  %vm688_vm9 = vweird.f32 %v651_v45 }
  0xfd   :  { %v674_v63 = vmul.f32 %v6411_v55, %v673_v58  ;;  %v4534_v58 = vor.u32 %v6042_v46, %v4533_v40  ;;  %v6058_v40 = vld [vmem:[#allocation5 + $0x174] sm:$0xf0] }
  0xfe   :  { %1594 = vmatpush.bf16.msrb.mxu2 %v4674_v60 }
  0xff   :  { %v675_v0 = vmul.f32 0.5, %v674_v63  ;;  %v6038_v63 = vld [vmem:[#allocation5 + $0xd4] sm:$0xf0] }
 0x100   :  { %v4518_v10 = vor.u32 %v6038_v63, %v4517_v62  ;;  %v4437_v63 = vld [vmem:[#allocation5 + $0x28] sm:$0xf] }
 0x101   :  { %v676_v5 = vsub.f32 1.5, %v675_v0 }
 0x102   :  { %v6413_v2 = vpop.eup %6412 }
 0x103   :  { %v683_v6 = vmul.f32 %v6413_v2, %v651_v45  ;;  %v677_v11 = vmul.f32 %v6411_v55, %v676_v5  ;;  %vm689_vm6 = vweird.f32 %v6413_v2  ;;  %v4773_v5 = vld [vmem:[#allocation5 + $0x2c8] sm:$0xf] }
 0x104   :  { %vm690_vm10 = vmor %vm688_vm9, %vm689_vm6 }
 0x105   :  { %v684_v9 = vmul.f32 %v6413_v2, %v683_v6  ;;  %v681_v19 = vsel %vm680_vm8, %v6411_v55, %v677_v11  ;;  %v6102_v6 = vld [vmem:[#allocation5 + $0x2d4] sm:$0xf0] }
 0x106   :  { %v697_v3 = vrot.slane %v681_v19, 6  ;;  %v4629_v19 = vld [vmem:[#allocation5 + $0x1a8] sm:$0xf] }
 0x107   :  { %v685_v12 = vmul.f32 0.5, %v684_v9  ;;  %v6134_v9 = vld [vmem:[#allocation5 + $0x3d4] sm:$0xf0] }
 0x108   :  { %v4902_v17 = vor.u32 %v6134_v9, %v4901_v8  ;;  %v6082_v8 = vld [vmem:[#allocation5 + $0x234] sm:$0xf0]  ;;  %v4821_v9 = vld [vmem:[#allocation5 + $0x328] sm:$0xf] }
 0x109   :  { %v686_v16 = vsub.f32 1.5, %v685_v12  ;;  %v4501_v12 = vld [vmem:[#allocation5 + $0xa8] sm:$0xf] }
 0x10b   :  { %v687_v21 = vmul.f32 %v6413_v2, %v686_v16  ;;  %v4774_v16 = vor.u32 %v6102_v6, %v4773_v5  ;;  %v6050_v5 = vld [vmem:[#allocation5 + $0x134] sm:$0xf0]  ;;  %v4693_v6 = vld [vmem:[#allocation5 + $0x228] sm:$0xf] }
 0x10d   :  { %v691_v49 = vsel %vm690_vm10, %v6413_v2, %v687_v21  ;;  %v4645_v2 = vld [vmem:[#allocation5 + $0x1c8] sm:$0xf]  ;;  %v6066_v21 = vld [vmem:[#allocation5 + $0x1b4] sm:$0xf0] }
 0x10e   :  { %v698_v15 = vrot.slane %v691_v49, 5  ;;  %v4646_v11 = vor.u32 %v6070_v4, %v4645_v2  ;;  %v6098_v49 = vld [vmem:[#allocation5 + $0x2b4] sm:$0xf0]  ;;  %v4630_v53 = vor.u32 %v6066_v21, %v4629_v19  ;;  %v4565_v4 = vld [vmem:[#allocation5 + $0x128] sm:$0xf]  ;;  %v4694_v21 = vor.u32 %v6082_v8, %v4693_v6 }
 0x10f   :  { %v4758_v13 = vor.u32 %v6098_v49, %v4757_v18  ;;  %v6046_v19 = vld [vmem:[#allocation5 + $0x114] sm:$0xf0]  ;;  %v4677_v49 = vld [vmem:[#allocation5 + $0x208] sm:$0xf]  ;;  %v4615_v6 = vld [vmem:[#allocation5 + $0x198] sm:$0xf0] }
 0x110   :  { %v702_v25 = vsel %vm701_vm13, %v697_v3, %v698_v15  ;;  %v4885_v3 = vld [vmem:[#allocation5 + $0x3a8] sm:$0xf]  ;;  %v6130_v15 = vld [vmem:[#allocation5 + $0x3b4] sm:$0xf0]  ;;  %v6092_v8 = vld [vmem:[#allocation5 + $0x28c] sm:$0xf] }
 0x111   :  { %v704_v26 = vsel %vm703_vm15, %v700_v23, %v702_v25  ;;  %v4485_v23 = vld [vmem:[#allocation5 + $0x88] sm:$0xf]  ;;  %v6030_v25 = vld [vmem:[#allocation5 + $0x94] sm:$0xf0] }
 0x112   :  { %v706_v27 = vmul.f32 %v704_v26, %v575_v22  ;;  %v4502_v22 = vor.u32 %v6034_v14, %v4501_v12  ;;  %v4886_v26 = vor.u32 %v6130_v15, %v4885_v3  ;;  %v4566_v14 = vor.u32 %v6050_v5, %v4565_v4  ;;  %v6078_v3 = vld [vmem:[#allocation5 + $0x214] sm:$0xf0]  ;;  %v4805_v15 = vld [vmem:[#allocation5 + $0x308] sm:$0xf]  ;;  %v6060_v5 = vld [vmem:[#allocation5 + $0x18c] sm:$0xf] }
 0x114   :  { %v711_v33 = vperm.slane %v706_v27, 3  ;;  %v708_v34 = vperm.slane %v706_v27, 0  ;;  %v709_v35 = vperm.slane %v706_v27, 1  ;;  %v710_v36 = vperm.slane %v706_v27, 2  ;;  %v4613_v27 = vld [vmem:[#allocation5 + $0x188] sm:$0xf] }
 0x116   :  { %v719_v1 = vmul.f32 %v711_v33, %v6665_v20  ;;  %v716_v37 = vmul.f32 %v708_v34, %v6634_v42  ;;  %v717_v38 = vmul.f32 %v709_v35, %v6639_v7  ;;  %v718_v39 = vmul.f32 %v710_v36, %v6653_v51  ;;  %v6138_v42 = vld [vmem:[#allocation5 + $0x3f4] sm:$0xf0]  ;;  %v4469_v36 = vld [vmem:[#allocation5 + $0x68] sm:$0xf] }
 0x117   :  { %v4662_v7 = vor.u32 %v6074_v48, %v4661_v47  ;;  %v4918_v0 = vor.u32 %v6138_v42, %v4917_v54  ;;  %v6126_v33 = vld [vmem:[#allocation5 + $0x394] sm:$0xf0]  ;;  %v4486_v34 = vor.u32 %v6030_v25, %v4485_v23  ;;  %v4453_v48 = vld [vmem:[#allocation5 + $0x48] sm:$0xf]  ;;  %v4535_v23 = vld [vmem:[#allocation5 + $0xf8] sm:$0xf0] }
 0x118   :  { %v729_v41 = vadd.f32 %v721_v28, %v716_v37  ;;  %v730_v43 = vadd.f32 %v722_v29, %v717_v38  ;;  %v731_v44 = vadd.f32 %v723_v31, %v718_v39  ;;  %v732_v45 = vadd.f32 %v724_v32, %v719_v1  ;;  %v6062_v28 = vld [vmem:[#allocation5 + $0x194] sm:$0xf0]  ;;  %v4741_v29 = vld [vmem:[#allocation5 + $0x288] sm:$0xf]  ;;  %v6072_v25 = vld [vmem:[#allocation5 + $0x1ec] sm:$0xf] }
 0x119   :  { %v6094_v31 = vld [vmem:[#allocation5 + $0x294] sm:$0xf0]  ;;  %v4869_v32 = vld [vmem:[#allocation5 + $0x388] sm:$0xf]  ;;  %v4614_v35 = vor.u32 %v6062_v28, %v4613_v27 }
 0x11a   :  { %v733_v55 = vmax.f32 %v729_v41, 0.0  ;;  %v734_v56 = vmax.f32 %v730_v43, 0.0  ;;  %v735_v20 = vmax.f32 %v731_v44, 0.0  ;;  %v736_v57 = vmax.f32 %v732_v45, 0.0  ;;  %v6026_v1 = vld [vmem:[#allocation5 + $0x74] sm:$0xf0] }
 0x11b   :  { %v4742_v37 = vor.u32 %v6094_v31, %v4741_v29  ;;  %v4870_v38 = vor.u32 %v6126_v33, %v4869_v32  ;;  %v4597_v39 = vld [vmem:[#allocation5 + $0x168] sm:$0xf]  ;;  %v6090_v43 = vld [vmem:[#allocation5 + $0x274] sm:$0xf0]  ;;  %v4470_v46 = vor.u32 %v6026_v1, %v4469_v36  ;;  %v4791_v29 = vld [vmem:[#allocation5 + $0x2f8] sm:$0xf0]  ;;  %v4678_v33 = vor.u32 %v6078_v3, %v4677_v49 }
 0x11c   :  { %v6709_v59 = vpack.c.bf16 %v733_v55, %v733_v55  ;;  %v6711_v51 = vpack.c.bf16 %v734_v56, %v734_v56  ;;  %v6713_v60 = vpack.c.bf16 %v735_v20, %v735_v20  ;;  %v6715_v61 = vpack.c.bf16 %v736_v57, %v736_v57  ;;  %v4725_v41 = vld [vmem:[#allocation5 + $0x268] sm:$0xf]  ;;  %v6122_v45 = vld [vmem:[#allocation5 + $0x374] sm:$0xf0]  ;;  %v6136_v31 = vld [vmem:[#allocation5 + $0x3ec] sm:$0xf] }
 0x11d   :  { %v4853_v44 = vld [vmem:[#allocation5 + $0x368] sm:$0xf]  ;;  %v4598_v47 = vor.u32 %v6058_v40, %v4597_v39  ;;  %v4726_v52 = vor.u32 %v6090_v43, %v4725_v41  ;;  %v6054_v56 = vld [vmem:[#allocation5 + $0x154] sm:$0xf0]  ;;  %v4919_v32 = vld [vmem:[#allocation5 + $0x3f8] sm:$0xf0] }
 0x11e   :  { %1517 = vmatmul.bf16.vlgmr.msra.gmra.mxu0 %v6709_v59  ;;  %1530 = vmatmul.bf16.vlgmr.msra.gmra.mxu1 %v6711_v51  ;;  %v4854_v54 = vor.u32 %v6122_v45, %v4853_v44  ;;  %v4581_v55 = vld [vmem:[#allocation5 + $0x148] sm:$0xf]  ;;  %v6086_v57 = vld [vmem:[#allocation5 + $0x254] sm:$0xf0]  ;;  %v6036_v1 = vld [vmem:[#allocation5 + $0xcc] sm:$0xf]  ;;  %v4922_v39 = vor.u32 %v6136_v31, %v4919_v32 }
 0x11f   :  { %1543 = vmatmul.bf16.vlgmr.msra.gmra.mxu2 %v6713_v60  ;;  %1556 = vmatmul.bf16.vlgmr.msra.gmra.mxu3 %v6715_v61  ;;  %v4709_v20 = vld [vmem:[#allocation5 + $0x248] sm:$0xf]  ;;  %v4582_v62 = vor.u32 %v6054_v56, %v4581_v55  ;;  %v6068_v40 = vld [vmem:[#allocation5 + $0x1cc] sm:$0xf]  ;;  %v4647_v41 = vld [vmem:[#allocation5 + $0x1d8] sm:$0xf0] }
 0x120   :  { %1613 = vmatpush.bf16.msra.mxu0 %v4534_v58  ;;  %1626 = vmatpush.bf16.msra.mxu1 %v4662_v7  ;;  %v4837_v42 = vld [vmem:[#allocation5 + $0x348] sm:$0xf]  ;;  %v6118_v58 = vld [vmem:[#allocation5 + $0x354] sm:$0xf0]  ;;  %v4454_v7 = vor.u32 %v6022_v50, %v4453_v48  ;;  %v6100_v43 = vld [vmem:[#allocation5 + $0x2cc] sm:$0xf]  ;;  %v4650_v48 = vor.u32 %v6068_v40, %v4647_v41 }
 0x121   :  { %1639 = vmatpush.bf16.msra.mxu2 %v4790_v30  ;;  %1652 = vmatpush.bf16.msra.mxu3 %v4918_v0  ;;  %v6018_v30 = vld [vmem:[#allocation5 + $0x34] sm:$0xf0]  ;;  %v4710_v0 = vor.u32 %v6086_v57, %v4709_v20  ;;  %v4838_v2 = vor.u32 %v6118_v58, %v4837_v42  ;;  %v4775_v44 = vld [vmem:[#allocation5 + $0x2d8] sm:$0xf0]  ;;  %v6132_v45 = vld [vmem:[#allocation5 + $0x3cc] sm:$0xf] }
 0x122   :  { %v4438_v12 = vor.u32 %v6018_v30, %v4437_v63  ;;  %v6032_v50 = vld [vmem:[#allocation5 + $0xac] sm:$0xf]  ;;  %v4631_v20 = vld [vmem:[#allocation5 + $0x1b8] sm:$0xf0] }
 0x123   :  { %v6064_v56 = vld [vmem:[#allocation5 + $0x1ac] sm:$0xf]  ;;  %v4759_v42 = vld [vmem:[#allocation5 + $0x2b8] sm:$0xf0] }
 0x124   :  { %1614 = vmatpush.bf16.msra.mxu0 %v4518_v10  ;;  %1627 = vmatpush.bf16.msra.mxu1 %v4646_v11  ;;  %v6114_v10 = vld [vmem:[#allocation5 + $0x334] sm:$0xf0]  ;;  %v4421_v11 = vld [vmem:[#allocation5 + $0x8] sm:$0xf]  ;;  %v6096_v57 = vld [vmem:[#allocation5 + $0x2ac] sm:$0xf]  ;;  %v4634_v63 = vor.u32 %v6064_v56, %v4631_v20 }
 0x125   :  { %1640 = vmatpush.bf16.msra.mxu2 %v4774_v16  ;;  %1653 = vmatpush.bf16.msra.mxu3 %v4902_v17  ;;  %v6014_v16 = vld [vmem:[#allocation5 + $0x14] sm:$0xf0]  ;;  %v4549_v17 = vld [vmem:[#allocation5 + $0x108] sm:$0xf]  ;;  %v4822_v18 = vor.u32 %v6114_v10, %v4821_v9  ;;  %v6128_v58 = vld [vmem:[#allocation5 + $0x3ac] sm:$0xf] }
 0x126   :  { %v4422_v27 = vor.u32 %v6014_v16, %v4421_v11  ;;  %v4550_v28 = vor.u32 %v6046_v19, %v4549_v17  ;;  %v6028_v30 = vld [vmem:[#allocation5 + $0x8c] sm:$0xf]  ;;  %v4743_v9 = vld [vmem:[#allocation5 + $0x298] sm:$0xf0] }
 0x127   :  { %v6124_v10 = vld [vmem:[#allocation5 + $0x38c] sm:$0xf]  ;;  %v4871_v11 = vld [vmem:[#allocation5 + $0x398] sm:$0xf0]  ;;  %v4746_v19 = vor.u32 %v6092_v8, %v4743_v9 }
 0x128   :  { %1615 = vmatpush.bf16.msra.mxu0 %v4502_v22  ;;  %1628 = vmatpush.bf16.msra.mxu1 %v4630_v53  ;;  %v6110_v22 = vld [vmem:[#allocation5 + $0x314] sm:$0xf0]  ;;  %v6040_v53 = vld [vmem:[#allocation5 + $0xec] sm:$0xf]  ;;  %v4471_v17 = vld [vmem:[#allocation5 + $0x78] sm:$0xf0] }
 0x129   :  { %1641 = vmatpush.bf16.msra.mxu2 %v4758_v13  ;;  %1654 = vmatpush.bf16.msra.mxu3 %v4886_v26  ;;  %v4663_v13 = vld [vmem:[#allocation5 + $0x1f8] sm:$0xf0]  ;;  %v6104_v26 = vld [vmem:[#allocation5 + $0x2ec] sm:$0xf] }
 0x12a   :  { %v4666_v36 = vor.u32 %v6072_v25, %v4663_v13  ;;  %v6024_v16 = vld [vmem:[#allocation5 + $0x6c] sm:$0xf]  ;;  %v4599_v49 = vld [vmem:[#allocation5 + $0x178] sm:$0xf0] }
 0x12b   :  { %v6088_v3 = vld [vmem:[#allocation5 + $0x26c] sm:$0xf]  ;;  %v4583_v31 = vld [vmem:[#allocation5 + $0x158] sm:$0xf0] }
 0x12c   :  { %1616 = vmatpush.bf16.msra.mxu0 %v4486_v34  ;;  %1629 = vmatpush.bf16.msra.mxu1 %v4614_v35  ;;  %v4806_v34 = vor.u32 %v6110_v22, %v4805_v15  ;;  %v4538_v35 = vor.u32 %v6040_v53, %v4535_v23  ;;  %v4727_v15 = vld [vmem:[#allocation5 + $0x278] sm:$0xf0]  ;;  %v6120_v22 = vld [vmem:[#allocation5 + $0x36c] sm:$0xf]  ;;  %v4474_v23 = vor.u32 %v6024_v16, %v4471_v17 }
 0x12d   :  { %1642 = vmatpush.bf16.msra.mxu2 %v4742_v37  ;;  %1655 = vmatpush.bf16.msra.mxu3 %v4870_v38  ;;  %v4519_v37 = vld [vmem:[#allocation5 + $0xd8] sm:$0xf0]  ;;  %v4794_v38 = vor.u32 %v6104_v26, %v4791_v29  ;;  %v6020_v13 = vld [vmem:[#allocation5 + $0x4c] sm:$0xf] }
 0x12e   :  { %1569 = vmatmul.bf16.vlgmr.msrb.gmra.mxu0 %v6709_v59  ;;  %1582 = vmatmul.bf16.vlgmr.msrb.gmra.mxu1 %v6711_v51  ;;  %v4855_v53 = vld [vmem:[#allocation5 + $0x378] sm:$0xf0]  ;;  %v6052_v29 = vld [vmem:[#allocation5 + $0x14c] sm:$0xf] }
 0x12f   :  { %1595 = vmatmul.bf16.vlgmr.msrb.gmra.mxu2 %v6713_v60  ;;  %1608 = vmatmul.bf16.vlgmr.msrb.gmra.mxu3 %v6715_v61  ;;  %v4455_v26 = vld [vmem:[#allocation5 + $0x58] sm:$0xf0]  ;;  %v6084_v32 = vld [vmem:[#allocation5 + $0x24c] sm:$0xf] }
 0x130   :  { %1617 = vmatpush.bf16.msra.mxu0 %v4470_v46  ;;  %1630 = vmatpush.bf16.msra.mxu1 %v4598_v47  ;;  %v4903_v46 = vld [vmem:[#allocation5 + $0x3d8] sm:$0xf0]  ;;  %v4522_v47 = vor.u32 %v6036_v1, %v4519_v37  ;;  %v4586_v1 = vor.u32 %v6052_v29, %v4583_v31  ;;  %v6016_v37 = vld [vmem:[#allocation5 + $0x2c] sm:$0xf] }
 0x131   :  { %1643 = vmatpush.bf16.msra.mxu2 %v4726_v52  ;;  %1656 = vmatpush.bf16.msra.mxu3 %v4854_v54  ;;  %v4503_v52 = vld [vmem:[#allocation5 + $0xb8] sm:$0xf0]  ;;  %v4778_v54 = vor.u32 %v6100_v43, %v4775_v44  ;;  %v4906_v55 = vor.u32 %v6132_v45, %v4903_v46  ;;  %v6048_v41 = vld [vmem:[#allocation5 + $0x12c] sm:$0xf] }
 0x132   :  { %v4567_v43 = vld [vmem:[#allocation5 + $0x138] sm:$0xf0]  ;;  %v6080_v44 = vld [vmem:[#allocation5 + $0x22c] sm:$0xf] }
 0x133   :  { %v4695_v45 = vld [vmem:[#allocation5 + $0x238] sm:$0xf0]  ;;  %v6112_v46 = vld [vmem:[#allocation5 + $0x32c] sm:$0xf] }
 0x134   :  { %1618 = vmatpush.bf16.msra.mxu0 %v4454_v7  ;;  %1631 = vmatpush.bf16.msra.mxu1 %v4582_v62  ;;  %v4887_v7 = vld [vmem:[#allocation5 + $0x3b8] sm:$0xf0]  ;;  %v4506_v62 = vor.u32 %v6032_v50, %v4503_v52  ;;  %v4570_v50 = vor.u32 %v6048_v41, %v4567_v43  ;;  %v6012_v52 = vld [vmem:[#allocation5 + $0xc] sm:$0xf] }
 0x135   :  { %1644 = vmatpush.bf16.msra.mxu2 %v4710_v0  ;;  %1657 = vmatpush.bf16.msra.mxu3 %v4838_v2  ;;  %v4487_v0 = vld [vmem:[#allocation5 + $0x98] sm:$0xf0]  ;;  %v4762_v2 = vor.u32 %v6096_v57, %v4759_v42  ;;  %v4890_v4 = vor.u32 %v6128_v58, %v4887_v7  ;;  %v6044_v20 = vld [vmem:[#allocation5 + $0x10c] sm:$0xf] }
 0x136   :  { %v4551_v57 = vld [vmem:[#allocation5 + $0x118] sm:$0xf0]  ;;  %v6076_v42 = vld [vmem:[#allocation5 + $0x20c] sm:$0xf] }
 0x137   :  { %v4679_v58 = vld [vmem:[#allocation5 + $0x218] sm:$0xf0]  ;;  %v6108_v7 = vld [vmem:[#allocation5 + $0x30c] sm:$0xf] }
 0x138   :  { %1619 = vmatpush.bf16.msra.mxu0 %v4438_v12  ;;  %1632 = vmatpush.bf16.msra.mxu1 %v4566_v14  ;;  %v4490_v12 = vor.u32 %v6028_v30, %v4487_v0  ;;  %v4618_v14 = vor.u32 %v6060_v5, %v4615_v6  ;;  %v4554_v30 = vor.u32 %v6044_v20, %v4551_v57  ;;  %v5405_v20 = vld [vmem:[#allocation7 + $0x3c0] sm:$0xf] }
 0x139   :  { %1645 = vmatpush.bf16.msra.mxu2 %v4694_v21  ;;  %1658 = vmatpush.bf16.msra.mxu3 %v4822_v18  ;;  %v4874_v21 = vor.u32 %v6124_v10, %v4871_v11  ;;  %v6056_v18 = vld [vmem:[#allocation5 + $0x16c] sm:$0xf]  ;;  %v4682_v0 = vor.u32 %v6076_v42, %v4679_v58  ;;  %v6263_v57 = vld [vmem:[#allocation7 + $0x3dc] sm:$0xf0] }
 0x13a   :  { %v4602_v25 = vor.u32 %v6056_v18, %v4599_v49  ;;  %v5661_v42 = vld [vmem:[#allocation7 + $0x5c0] sm:$0xf] }
 0x13c   :  { %1620 = vmatpush.bf16.msra.mxu0 %v4422_v27  ;;  %1633 = vmatpush.bf16.msra.mxu1 %v4550_v28  ;;  %v4730_v27 = vor.u32 %v6088_v3, %v4727_v15  ;;  %v4858_v28 = vor.u32 %v6120_v22, %v4855_v53 }
 0x13d   :  { %1646 = vmatpush.bf16.msra.mxu2 %v4678_v33  ;;  %1659 = vmatpush.bf16.msra.mxu3 %v4806_v34  ;;  %v4711_v33 = vld [vmem:[#allocation5 + $0x258] sm:$0xf0]  ;;  %v6116_v34 = vld [vmem:[#allocation5 + $0x34c] sm:$0xf] }
 0x13f   :  { %1621 = vmatmul.bf16.vlgmr.msra.gmra.mxu0 %v6709_v59  ;;  %1634 = vmatmul.bf16.vlgmr.msra.gmra.mxu1 %v6711_v51 }
 0x140   :  { %1665 = vmatpush.bf16.msrb.mxu0 %v4538_v35  ;;  %1678 = vmatpush.bf16.msrb.mxu1 %v4666_v36  ;;  %v4839_v35 = vld [vmem:[#allocation5 + $0x358] sm:$0xf0]  ;;  %v4458_v36 = vor.u32 %v6020_v13, %v4455_v26 }
 0x141   :  { %1691 = vmatpush.bf16.msrb.mxu2 %v4794_v38  ;;  %1704 = vmatpush.bf16.msrb.mxu3 %v4922_v39  ;;  %v4439_v38 = vld [vmem:[#allocation5 + $0x38] sm:$0xf0]  ;;  %v4714_v39 = vor.u32 %v6084_v32, %v4711_v33  ;;  %v4842_v40 = vor.u32 %v6116_v34, %v4839_v35 }
 0x142   :  { %1647 = vmatmul.bf16.vlgmr.msra.gmra.mxu2 %v6713_v60  ;;  %1660 = vmatmul.bf16.vlgmr.msra.gmra.mxu3 %v6715_v61 }
 0x144   :  { %1666 = vmatpush.bf16.msrb.mxu0 %v4522_v47  ;;  %1679 = vmatpush.bf16.msrb.mxu1 %v4650_v48  ;;  %v4823_v47 = vld [vmem:[#allocation5 + $0x338] sm:$0xf0]  ;;  %v4442_v48 = vor.u32 %v6016_v37, %v4439_v38 }
 0x145   :  { %1692 = vmatpush.bf16.msrb.mxu2 %v4778_v54  ;;  %1705 = vmatpush.bf16.msrb.mxu3 %v4906_v55  ;;  %v4423_v54 = vld [vmem:[#allocation5 + $0x18] sm:$0xf0]  ;;  %v4698_v55 = vor.u32 %v6080_v44, %v4695_v45  ;;  %v4826_v56 = vor.u32 %v6112_v46, %v4823_v47 }
 0x148   :  { %1667 = vmatpush.bf16.msrb.mxu0 %v4506_v62  ;;  %1680 = vmatpush.bf16.msrb.mxu1 %v4634_v63  ;;  %v4807_v62 = vld [vmem:[#allocation5 + $0x318] sm:$0xf0]  ;;  %v4426_v63 = vor.u32 %v6012_v52, %v4423_v54  ;;  %v5149_v54 = vld [vmem:[#allocation7 + $0x1c0] sm:$0xf] }
 0x149   :  { %1693 = vmatpush.bf16.msrb.mxu2 %v4762_v2  ;;  %1706 = vmatpush.bf16.msrb.mxu3 %v4890_v4  ;;  %v4810_v2 = vor.u32 %v6108_v7, %v4807_v62  ;;  %v5406_v62 = vor.u32 %v6263_v57, %v5405_v20  ;;  %v5021_v57 = vld [vmem:[#allocation7 + $0xc0] sm:$0xf] }
 0x14c   :  { %1668 = vmatpush.bf16.msrb.mxu0 %v4490_v12  ;;  %1681 = vmatpush.bf16.msrb.mxu1 %v4618_v14 }
 0x14d   :  { %1694 = vmatpush.bf16.msrb.mxu2 %v4746_v19  ;;  %1707 = vmatpush.bf16.msrb.mxu3 %v4874_v21 }
 0x150   :  { %1669 = vmatpush.bf16.msrb.mxu0 %v4474_v23  ;;  %1682 = vmatpush.bf16.msrb.mxu1 %v4602_v25 }
 0x151   :  { %1695 = vmatpush.bf16.msrb.mxu2 %v4730_v27  ;;  %1708 = vmatpush.bf16.msrb.mxu3 %v4858_v28 }
 0x154   :  { %1670 = vmatpush.bf16.msrb.mxu0 %v4458_v36  ;;  %1683 = vmatpush.bf16.msrb.mxu1 %v4586_v1 }
 0x155   :  { %1696 = vmatpush.bf16.msrb.mxu2 %v4714_v39  ;;  %1709 = vmatpush.bf16.msrb.mxu3 %v4842_v40 }
 0x158   :  { %1671 = vmatpush.bf16.msrb.mxu0 %v4442_v48  ;;  %1684 = vmatpush.bf16.msrb.mxu1 %v4570_v50 }
 0x159   :  { %1697 = vmatpush.bf16.msrb.mxu2 %v4698_v55  ;;  %1710 = vmatpush.bf16.msrb.mxu3 %v4826_v56  ;;  %v6199_v55 = vld [vmem:[#allocation7 + $0x1dc] sm:$0xf0] }
 0x15a   :  { %v5150_v56 = vor.u32 %v6199_v55, %v5149_v54  ;;  %v6367_v54 = vld [vmem:[#allocation7 + $0x71c] sm:$0xf0] }
 0x15c   :  { %1672 = vmatpush.bf16.msrb.mxu0 %v4426_v63  ;;  %1685 = vmatpush.bf16.msrb.mxu1 %v4554_v30  ;;  %v6327_v63 = vld [vmem:[#allocation7 + $0x5dc] sm:$0xf0] }
 0x15d   :  { %1698 = vmatpush.bf16.msrb.mxu2 %v4682_v0  ;;  %1711 = vmatpush.bf16.msrb.mxu3 %v4810_v2  ;;  %v5917_v30 = vld [vmem:[#allocation7 + $0x7c0] sm:$0xf] }
 0x15e   :  { %v6391_v0 = vld [vmem:[#allocation7 + $0x7dc] sm:$0xf0] }
 0x15f   :  { %1673 = vmatmul.bf16.vlgmr.msrb.gmra.mxu0 %v6709_v59  ;;  %1686 = vmatmul.bf16.vlgmr.msrb.gmra.mxu1 %v6711_v51 }
 0x160   :  { %1699 = vmatmul.bf16.vlgmr.msrb.gmra.mxu2 %v6713_v60  ;;  %1712 = vmatmul.bf16.vlgmr.msrb.gmra.mxu3 %v6715_v61 }
 0x161   :  { %3409 = vmatpush.bf16.msra.mxu0 %v5150_v56  ;;  %3422 = vmatpush.bf16.msra.mxu1 %v5406_v62 }
 0x19b   :  { %v1518_v4 = vpop.f32.mrf.mxu0  ;;  %v1531_v5 = vpop.f32.mrf.mxu1 }
 0x19c   :  { %v1532_v6 = vadd.f32 %v1531_v5, %v1518_v4  ;;  %v5662_v4 = vor.u32 %v6327_v63, %v5661_v42  ;;  %v5918_v5 = vor.u32 %v6391_v0, %v5917_v30  ;;  %v6167_v42 = vld [vmem:[#allocation7 + $0xdc] sm:$0xf0] }
 0x19d   :  { %v5022_v63 = vor.u32 %v6167_v42, %v5021_v57  ;;  %v5533_v0 = vld [vmem:[#allocation7 + $0x4c0] sm:$0xf] }
 0x19e   :  { %3435 = vmatpush.bf16.msra.mxu2 %v5662_v4  ;;  %3448 = vmatpush.bf16.msra.mxu3 %v5918_v5  ;;  %v6207_v57 = vld [vmem:[#allocation7 + $0x21c] sm:$0xf0] }
 0x1a2   :  { %v1544_v8 = vpop.f32.mrf.mxu2  ;;  %v1557_v9 = vpop.f32.mrf.mxu3 }
 0x1a3   :  { %v1545_v10 = vadd.f32 %v1544_v8, %v1532_v6  ;;  %v1520_v11 = vpop.f32.mrf.mxu0  ;;  %v1533_v12 = vpop.f32.mrf.mxu1  ;;  %v5117_v8 = vld [vmem:[#allocation7 + $0x180] sm:$0xf] }
 0x1a4   :  { %v5373_v11 = vld [vmem:[#allocation7 + $0x380] sm:$0xf] }
 0x1a5   :  { %v6733_v14 = vadd.f32 %v1557_v9, %v1545_v10  ;;  %v6191_v9 = vld [vmem:[#allocation7 + $0x19c] sm:$0xf0] }
 0x1a6   :  { %v5118_v10 = vor.u32 %v6191_v9, %v5117_v8  ;;  %v6255_v12 = vld [vmem:[#allocation7 + $0x39c] sm:$0xf0] }
 0x1a7   :  { %v1719_v15 = vrot.slane %v6733_v14, 4  ;;  %v6359_v8 = vld [vmem:[#allocation7 + $0x6dc] sm:$0xf0] }
 0x1a8   :  { %3410 = vmatpush.bf16.msra.mxu0 %v5118_v10 }
 0x1a9   :  { %v1720_v13 = vadd.f32 %v1719_v15, %v6733_v14  ;;  %v5085_v15 = vld [vmem:[#allocation7 + $0x140] sm:$0xf] }
 0x1aa   :  { %v1546_v16 = vpop.f32.mrf.mxu2  ;;  %v1559_v17 = vpop.f32.mrf.mxu3 }
 0x1ab   :  { %v1570_v19 = vpop.f32.mrf.mxu0  ;;  %v1583_v59 = vpop.f32.mrf.mxu1  ;;  %v1721_v31 = vrot.slane %v1720_v13, 2  ;;  %v5629_v16 = vld [vmem:[#allocation7 + $0x580] sm:$0xf] }
 0x1ac   :  { %v1584_v21 = vadd.f32 %v1583_v59, %v1570_v19  ;;  %v5374_v59 = vor.u32 %v6255_v12, %v5373_v11 }
 0x1ad   :  { %v1722_v33 = vadd.f32 %v1721_v31, %v1720_v13 }
 0x1ae   :  { %3423 = vmatpush.bf16.msra.mxu1 %v5374_v59 }
 0x1af   :  { %v1723_v40 = vrot.slane %v1722_v33, 1 }
 0x1b1   :  { %v1724_v45 = vadd.f32 %v1723_v40, %v1722_v33 }
 0x1b2   :  { %v1596_v51 = vpop.f32.mrf.mxu2  ;;  %v1609_v18 = vpop.f32.mrf.mxu3 }
 0x1b3   :  { %v1597_v60 = vadd.f32 %v1596_v51, %v1584_v21  ;;  %v1572_v49 = vpop.f32.mrf.mxu0  ;;  %v1585_v61 = vpop.f32.mrf.mxu1  ;;  %v1743_v58 = vmul.f32 %v1724_v45, %v6631_v24  ;;  %v6319_v21 = vld [vmem:[#allocation7 + $0x59c] sm:$0xf0] }
 0x1b4   :  { %v5885_v51 = vld [vmem:[#allocation7 + $0x780] sm:$0xf]  ;;  %v5630_v49 = vor.u32 %v6319_v21, %v5629_v16 }
 0x1b5   :  { %v1610_v3 = vadd.f32 %v1609_v18, %v1597_v60  ;;  %v6744_v17 = vsub.f32 %v6733_v14, %v1743_v58  ;;  %v6383_v18 = vld [vmem:[#allocation7 + $0x79c] sm:$0xf0] }
 0x1b6   :  { %v5886_v61 = vor.u32 %v6383_v18, %v5885_v51  ;;  %3436 = vmatpush.bf16.msra.mxu2 %v5630_v49  ;;  %v6247_v14 = vld [vmem:[#allocation7 + $0x35c] sm:$0xf0] }
 0x1b7   :  { %v1725_v22 = vrot.slane %v1610_v3, 4  ;;  %v1751_v13 = vmul.f32 %v6744_v17, %v6744_v17  ;;  %v5277_v58 = vld [vmem:[#allocation7 + $0x2c0] sm:$0xf] }
 0x1b8   :  { %3449 = vmatpush.bf16.msra.mxu3 %v5886_v61  ;;  %v4989_v16 = vld [vmem:[#allocation7 + $0x80] sm:$0xf] }
 0x1b9   :  { %v1726_v53 = vadd.f32 %v1725_v22, %v1610_v3  ;;  %v6183_v22 = vld [vmem:[#allocation7 + $0x15c] sm:$0xf0]  ;;  %v1755_v45 = vrot.slane %v1751_v13, 4 }
 0x1ba   :  { %v1598_v23 = vpop.f32.mrf.mxu2  ;;  %v1611_v25 = vpop.f32.mrf.mxu3  ;;  %v5245_v49 = vld [vmem:[#allocation7 + $0x280] sm:$0xf] }
 0x1bb   :  { %v1727_v26 = vrot.slane %v1726_v53, 2  ;;  %v5086_v23 = vor.u32 %v6183_v22, %v5085_v15  ;;  %v5597_v25 = vld [vmem:[#allocation7 + $0x540] sm:$0xf]  ;;  %v1756_v62 = vadd.f32 %v1755_v45, %v1751_v13 }
 0x1bc   :  { %v1622_v28 = vpop.f32.mrf.mxu0  ;;  %v1635_v29 = vpop.f32.mrf.mxu1  ;;  %v6223_v61 = vld [vmem:[#allocation7 + $0x29c] sm:$0xf0] }
 0x1bd   :  { %v1728_v27 = vadd.f32 %v1727_v26, %v1726_v53  ;;  %v1636_v34 = vadd.f32 %v1635_v29, %v1622_v28  ;;  %v5341_v53 = vld [vmem:[#allocation7 + $0x340] sm:$0xf]  ;;  %3411 = vmatpush.bf16.msra.mxu0 %v5086_v23  ;;  %v1757_v15 = vrot.slane %v1756_v62, 2  ;;  %v5246_v22 = vor.u32 %v6223_v61, %v5245_v49  ;;  %v5919_v49 = vld [vmem:[#allocation7 + $0x7e0] sm:$0xf0] }
 0x1be   :  { %v6311_v28 = vld [vmem:[#allocation7 + $0x55c] sm:$0xf0]  ;;  %v6187_v61 = vld [vmem:[#allocation7 + $0x184] sm:$0xf] }
 0x1bf   :  { %v1729_v32 = vrot.slane %v1728_v27, 1  ;;  %v5853_v29 = vld [vmem:[#allocation7 + $0x740] sm:$0xf]  ;;  %v5598_v31 = vor.u32 %v6311_v28, %v5597_v25 }
 0x1c0   :  { %v5757_v23 = vld [vmem:[#allocation7 + $0x680] sm:$0xf] }
 0x1c1   :  { %v1730_v35 = vadd.f32 %v1729_v32, %v1728_v27  ;;  %v5342_v27 = vor.u32 %v6247_v14, %v5341_v53  ;;  %v6375_v32 = vld [vmem:[#allocation7 + $0x75c] sm:$0xf0]  ;;  %3437 = vmatpush.bf16.msra.mxu2 %v5598_v31 }
 0x1c2   :  { %v6287_v53 = vld [vmem:[#allocation7 + $0x49c] sm:$0xf0] }
 0x1c3   :  { %v1744_v43 = vmul.f32 %v1730_v35, %v6631_v24  ;;  %3424 = vmatpush.bf16.msra.mxu1 %v5342_v27  ;;  %v5854_v35 = vor.u32 %v6375_v32, %v5853_v29  ;;  %v6351_v13 = vld [vmem:[#allocation7 + $0x69c] sm:$0xf0] }
 0x1c4   :  { %v1624_v38 = vpop.f32.mrf.mxu0  ;;  %v1637_v39 = vpop.f32.mrf.mxu1  ;;  %v5758_v27 = vor.u32 %v6351_v13, %v5757_v23  ;;  %v4957_v28 = vld [vmem:[#allocation7 + $0x40] sm:$0xf]  ;;  %v5375_v23 = vld [vmem:[#allocation7 + $0x3a0] sm:$0xf0] }
 0x1c5   :  { %v1648_v36 = vpop.f32.mrf.mxu2  ;;  %v1661_v1 = vpop.f32.mrf.mxu3  ;;  %v6738_v47 = vsub.f32 %v1610_v3, %v1744_v43  ;;  %v5565_v43 = vld [vmem:[#allocation7 + $0x500] sm:$0xf]  ;;  %3450 = vmatpush.bf16.msra.mxu3 %v5854_v35 }
 0x1c6   :  { %v1649_v37 = vadd.f32 %v1648_v36, %v1636_v34  ;;  %v5053_v36 = vld [vmem:[#allocation7 + $0x100] sm:$0xf] }
 0x1c7   :  { %v1752_v2 = vmul.f32 %v6738_v47, %v6738_v47  ;;  %v6151_v29 = vld [vmem:[#allocation7 + $0x5c] sm:$0xf0] }
 0x1c8   :  { %v1662_v41 = vadd.f32 %v1661_v1, %v1649_v37  ;;  %v6175_v1 = vld [vmem:[#allocation7 + $0x11c] sm:$0xf0]  ;;  %v4958_v35 = vor.u32 %v6151_v29, %v4957_v28  ;;  %v6315_v28 = vld [vmem:[#allocation7 + $0x584] sm:$0xf] }
 0x1c9   :  { %v1761_v60 = vrot.slane %v1752_v2, 4  ;;  %v5309_v37 = vld [vmem:[#allocation7 + $0x300] sm:$0xf]  ;;  %v5054_v40 = vor.u32 %v6175_v1, %v5053_v36  ;;  %v5631_v29 = vld [vmem:[#allocation7 + $0x5a0] sm:$0xf0] }
 0x1ca   :  { %v1731_v44 = vrot.slane %v1662_v41, 4  ;;  %v5213_v31 = vld [vmem:[#allocation7 + $0x240] sm:$0xf] }
 0x1cb   :  { %v1762_v33 = vadd.f32 %v1761_v60, %v1752_v2  ;;  %3412 = vmatpush.bf16.msra.mxu0 %v5054_v40  ;;  %v6295_v2 = vld [vmem:[#allocation7 + $0x4dc] sm:$0xf0] }
 0x1cc   :  { %v1732_v46 = vadd.f32 %v1731_v44, %v1662_v41  ;;  %v6303_v44 = vld [vmem:[#allocation7 + $0x51c] sm:$0xf0]  ;;  %v5534_v5 = vor.u32 %v6295_v2, %v5533_v0 }
 0x1cd   :  { %v1650_v48 = vpop.f32.mrf.mxu2  ;;  %v1663_v50 = vpop.f32.mrf.mxu3  ;;  %v1763_v56 = vrot.slane %v1762_v33, 2  ;;  %v6215_v36 = vld [vmem:[#allocation7 + $0x25c] sm:$0xf0] }
 0x1ce   :  { %v1733_v52 = vrot.slane %v1732_v46, 2  ;;  %v5566_v50 = vor.u32 %v6303_v44, %v5565_v43  ;;  %v5469_v1 = vld [vmem:[#allocation7 + $0x440] sm:$0xf] }
 0x1cf   :  { %3413 = vmatpush.bf16.msra.mxu0 %v5022_v63  ;;  %v1764_v59 = vadd.f32 %v1763_v56, %v1762_v33  ;;  %v5725_v40 = vld [vmem:[#allocation7 + $0x640] sm:$0xf] }
 0x1d0   :  { %v1734_v7 = vadd.f32 %v1733_v52, %v1732_v46  ;;  %v5821_v52 = vld [vmem:[#allocation7 + $0x700] sm:$0xf]  ;;  %3438 = vmatpush.bf16.msra.mxu2 %v5566_v50 }
 0x1d1   :  { %v5822_v55 = vor.u32 %v6367_v54, %v5821_v52  ;;  %v1765_v32 = vrot.slane %v1764_v59, 1  ;;  %v4925_v50 = vld [vmem:[#allocation7] sm:$0xf] }
 0x1d2   :  { %v1735_v6 = vrot.slane %v1734_v7, 1  ;;  %v6143_v52 = vld [vmem:[#allocation7 + $0x1c] sm:$0xf0] }
 0x1d3   :  { %3451 = vmatpush.bf16.msra.mxu3 %v5822_v55  ;;  %v4926_v56 = vor.u32 %v6143_v52, %v4925_v50  ;;  %v6271_v63 = vld [vmem:[#allocation7 + $0x41c] sm:$0xf0] }
 0x1d4   :  { %v1736_v19 = vadd.f32 %v1735_v6, %v1734_v7  ;;  %v6231_v7 = vld [vmem:[#allocation7 + $0x2dc] sm:$0xf0]  ;;  %3439 = vmatpush.bf16.msra.mxu2 %v5534_v5  ;;  %v6195_v5 = vld [vmem:[#allocation7 + $0x1c4] sm:$0xf] }
 0x1d5   :  { %v5278_v30 = vor.u32 %v6231_v7, %v5277_v58  ;;  %v5789_v6 = vld [vmem:[#allocation7 + $0x6c0] sm:$0xf]  ;;  %v1766_v58 = vadd.f32 %v1765_v32, %v1764_v59  ;;  %v6323_v59 = vld [vmem:[#allocation7 + $0x5c4] sm:$0xf] }
 0x1d6   :  { %v1745_v3 = vmul.f32 %v1736_v19, %v6631_v24  ;;  %v5790_v12 = vor.u32 %v6359_v8, %v5789_v6  ;;  %v6159_v19 = vld [vmem:[#allocation7 + $0x9c] sm:$0xf0]  ;;  %v5151_v8 = vld [vmem:[#allocation7 + $0x1e0] sm:$0xf0] }
 0x1d7   :  { %v4990_v60 = vor.u32 %v6159_v19, %v4989_v16  ;;  %v5693_v2 = vld [vmem:[#allocation7 + $0x600] sm:$0xf]  ;;  %v5154_v16 = vor.u32 %v6195_v5, %v5151_v8 }
 0x1d8   :  { %v6749_v26 = vsub.f32 %v1662_v41, %v1745_v3  ;;  %v6239_v41 = vld [vmem:[#allocation7 + $0x31c] sm:$0xf0]  ;;  %3452 = vmatpush.bf16.msra.mxu3 %v5790_v12 }
 0x1d9   :  { %v5310_v48 = vor.u32 %v6239_v41, %v5309_v37  ;;  %v5501_v3 = vld [vmem:[#allocation7 + $0x480] sm:$0xf]  ;;  %3414 = vmatpush.bf16.msra.mxu0 %v4990_v60  ;;  %v1758_v37 = vadd.f32 %v1757_v15, %v1756_v62  ;;  %v6387_v60 = vld [vmem:[#allocation7 + $0x7c4] sm:$0xf] }
 0x1da   :  { %v1753_v34 = vmul.f32 %v6749_v26, %v6749_v26  ;;  %v5502_v25 = vor.u32 %v6287_v53, %v5501_v3  ;;  %v6343_v41 = vld [vmem:[#allocation7 + $0x65c] sm:$0xf0]  ;;  %v5922_v15 = vor.u32 %v6387_v60, %v5919_v49  ;;  %v6251_v53 = vld [vmem:[#allocation7 + $0x384] sm:$0xf] }
 0x1db   :  { %3425 = vmatpush.bf16.msra.mxu1 %v5310_v48  ;;  %v5726_v45 = vor.u32 %v6343_v41, %v5725_v40  ;;  %v1759_v42 = vrot.slane %v1758_v37, 1  ;;  %v5437_v62 = vld [vmem:[#allocation7 + $0x400] sm:$0xf]  ;;  %v6243_v40 = vld [vmem:[#allocation7 + $0x344] sm:$0xf] }
 0x1dc   :  { %v1674_v38 = vpop.f32.mrf.mxu0  ;;  %v1687_v39 = vpop.f32.mrf.mxu1  ;;  %v1767_v46 = vrot.slane %v1753_v34, 4  ;;  %3440 = vmatpush.bf16.msra.mxu2 %v5502_v25  ;;  %3453 = vmatpush.bf16.msra.mxu3 %v5758_v27  ;;  %v5438_v0 = vor.u32 %v6271_v63, %v5437_v62  ;;  %v5378_v27 = vor.u32 %v6251_v53, %v5375_v23  ;;  %v6355_v60 = vld [vmem:[#allocation7 + $0x6c4] sm:$0xf] }
 0x1dd   :  { %v1688_v4 = vadd.f32 %v1687_v39, %v1674_v38  ;;  %v5214_v38 = vor.u32 %v6215_v36, %v5213_v31  ;;  %v6279_v39 = vld [vmem:[#allocation7 + $0x45c] sm:$0xf0]  ;;  %3415 = vmatpush.bf16.msra.mxu0 %v4958_v35  ;;  %v1760_v25 = vadd.f32 %v1759_v42, %v1758_v37  ;;  %v6379_v31 = vld [vmem:[#allocation7 + $0x784] sm:$0xf] }
 0x1de   :  { %v1768_v20 = vadd.f32 %v1767_v46, %v1753_v34  ;;  %v5470_v44 = vor.u32 %v6279_v39, %v5469_v1  ;;  %v5887_v35 = vld [vmem:[#allocation7 + $0x7a0] sm:$0xf0] }
 0x1df   :  { %3426 = vmatpush.bf16.msra.mxu1 %v5278_v30  ;;  %v6179_v36 = vld [vmem:[#allocation7 + $0x144] sm:$0xf]  ;;  %v5890_v39 = vor.u32 %v6379_v31, %v5887_v35  ;;  %v1779_v50 = vmul.f32 %v1760_v25, %v6631_v24 }
 0x1e0   :  { %v1769_v9 = vrot.slane %v1768_v20, 2  ;;  %3441 = vmatpush.bf16.msra.mxu2 %v5470_v44  ;;  %3454 = vmatpush.bf16.msra.mxu3 %v5726_v45  ;;  %v5087_v1 = vld [vmem:[#allocation7 + $0x160] sm:$0xf0] }
 0x1e1   :  { %3416 = vmatpush.bf16.msra.mxu0 %v4926_v56  ;;  %v5343_v37 = vld [vmem:[#allocation7 + $0x360] sm:$0xf0] }
 0x1e2   :  { %v1770_v33 = vadd.f32 %v1769_v9, %v1768_v20  ;;  %v5181_v20 = vld [vmem:[#allocation7 + $0x200] sm:$0xf]  ;;  %v6259_v9 = vld [vmem:[#allocation7 + $0x3c4] sm:$0xf]  ;;  %v5346_v44 = vor.u32 %v6243_v40, %v5343_v37 }
 0x1e3   :  { %v1700_v10 = vpop.f32.mrf.mxu2  ;;  %v1713_v11 = vpop.f32.mrf.mxu3  ;;  %3427 = vmatpush.bf16.msra.mxu1 %v5246_v22  ;;  %v5182_v7 = vor.u32 %v6207_v57, %v5181_v20  ;;  %v5119_v22 = vld [vmem:[#allocation7 + $0x1a0] sm:$0xf0] }
 0x1e4   :  { %v1701_v21 = vadd.f32 %v1700_v10, %v1688_v4  ;;  %v1676_v51 = vpop.f32.mrf.mxu0  ;;  %v1689_v18 = vpop.f32.mrf.mxu1  ;;  %v1771_v54 = vrot.slane %v1770_v33, 1  ;;  %v6335_v4 = vld [vmem:[#allocation7 + $0x61c] sm:$0xf0]  ;;  %v5407_v10 = vld [vmem:[#allocation7 + $0x3e0] sm:$0xf0]  ;;  %3442 = vmatpush.bf16.msra.mxu2 %v5438_v0  ;;  %v5122_v13 = vor.u32 %v6187_v61, %v5119_v22 }
 0x1e5   :  { %v5694_v6 = vor.u32 %v6335_v4, %v5693_v2  ;;  %v5410_v19 = vor.u32 %v6259_v9, %v5407_v10  ;;  %v1780_v51 = vmul.f32 %v1766_v58, %v6631_v24  ;;  %3461 = vmatpush.bf16.msrb.mxu0 %v5154_v16  ;;  %v6307_v45 = vld [vmem:[#allocation7 + $0x544] sm:$0xf]  ;;  %v6771_v4 = vadd.f32 1e-05, %v1779_v50 }
 0x1e6   :  { %v6753_v14 = vadd.f32 %v1713_v11, %v1701_v21  ;;  %v1772_v11 = vadd.f32 %v1771_v54, %v1770_v33  ;;  %v5663_v21 = vld [vmem:[#allocation7 + $0x5e0] sm:$0xf0] }
 0x1e7   :  { %3428 = vmatpush.bf16.msra.mxu1 %v5214_v38  ;;  %3455 = vmatpush.bf16.msra.mxu3 %v5694_v6  ;;  %v5666_v18 = vor.u32 %v6323_v59, %v5663_v21  ;;  %v6760_v38 = vadd.f32 1e-05, %v1780_v51  ;;  %v5855_v54 = vld [vmem:[#allocation7 + $0x760] sm:$0xf0]  ;;  %vm1793_vm10 = vweird.f32 %v6771_v4 }
 0x1e8   :  { %v1737_v34 = vrot.slane %v6753_v14, 4  ;;  %v1781_v32 = vmul.f32 %v1772_v11, %v6631_v24  ;;  %v6171_v20 = vld [vmem:[#allocation7 + $0x104] sm:$0xf] }
 0x1e9   :  { %3487 = vmatpush.bf16.msrb.mxu2 %v5666_v18  ;;  %3462 = vmatpush.bf16.msrb.mxu0 %v5122_v13  ;;  %v5055_v57 = vld [vmem:[#allocation7 + $0x120] sm:$0xf0]  ;;  %6414 = vrsqrt.f32 %v6760_v38  ;;  %vm1803_vm1 = vweird.f32 %v6760_v38 }
 0x1ea   :  { %v1738_v43 = vadd.f32 %v1737_v34, %v6753_v14  ;;  %v5634_v34 = vor.u32 %v6315_v28, %v5631_v29  ;;  %v6235_v42 = vld [vmem:[#allocation7 + $0x304] sm:$0xf]  ;;  %v5058_v63 = vor.u32 %v6171_v20, %v5055_v57 }
 0x1eb   :  { %v1702_v46 = vpop.f32.mrf.mxu2  ;;  %v1715_v48 = vpop.f32.mrf.mxu3  ;;  %3429 = vmatpush.bf16.msra.mxu1 %v5182_v7  ;;  %3500 = vmatpush.bf16.msrb.mxu3 %v5922_v15  ;;  %v5311_v58 = vld [vmem:[#allocation7 + $0x320] sm:$0xf0] }
 0x1ec   :  { %v1739_v55 = vrot.slane %v1738_v43, 2  ;;  %v5599_v46 = vld [vmem:[#allocation7 + $0x560] sm:$0xf0] }
 0x1ed   :  { %v6371_v48 = vld [vmem:[#allocation7 + $0x744] sm:$0xf]  ;;  %3488 = vmatpush.bf16.msrb.mxu2 %v5634_v34  ;;  %v5602_v52 = vor.u32 %v6307_v45, %v5599_v46 }
 0x1ee   :  { %v1740_v30 = vadd.f32 %v1739_v55, %v1738_v43  ;;  %v5090_v43 = vor.u32 %v6179_v36, %v5087_v1  ;;  %v6766_v55 = vadd.f32 1e-05, %v1781_v32  ;;  %v6299_v7 = vld [vmem:[#allocation7 + $0x504] sm:$0xf] }
 0x1ef   :  { %3474 = vmatpush.bf16.msrb.mxu1 %v5410_v19  ;;  %3501 = vmatpush.bf16.msrb.mxu3 %v5890_v39  ;;  %v5567_v0 = vld [vmem:[#allocation7 + $0x520] sm:$0xf0] }
 0x1f0   :  { %v1741_v12 = vrot.slane %v1740_v30, 1  ;;  %3463 = vmatpush.bf16.msrb.mxu0 %v5090_v43  ;;  %v6363_v2 = vld [vmem:[#allocation7 + $0x704] sm:$0xf]  ;;  %v5570_v5 = vor.u32 %v6299_v7, %v5567_v0  ;;  %6416 = vrsqrt.f32 %v6766_v55  ;;  %vm1813_vm4 = vweird.f32 %v6766_v55 }
 0x1f1   :  { %3489 = vmatpush.bf16.msrb.mxu2 %v5602_v52  ;;  %v5823_v6 = vld [vmem:[#allocation7 + $0x720] sm:$0xf0]  ;;  %6418 = vrsqrt.f32 %v6771_v4 }
 0x1f2   :  { %v1742_v3 = vadd.f32 %v1741_v12, %v1740_v30  ;;  %v5314_v30 = vor.u32 %v6235_v42, %v5311_v58  ;;  %v5826_v9 = vor.u32 %v6363_v2, %v5823_v6  ;;  %v6163_v10 = vld [vmem:[#allocation7 + $0xc4] sm:$0xf] }
 0x1f3   :  { %3475 = vmatpush.bf16.msrb.mxu1 %v5378_v27  ;;  %v5023_v11 = vld [vmem:[#allocation7 + $0xe0] sm:$0xf0] }
 0x1f4   :  { %v1746_v33 = vmul.f32 %v1742_v3, %v6631_v24  ;;  %v6227_v12 = vld [vmem:[#allocation7 + $0x2c4] sm:$0xf]  ;;  %3464 = vmatpush.bf16.msrb.mxu0 %v5058_v63  ;;  %v5026_v51 = vor.u32 %v6163_v10, %v5023_v11  ;;  %v6775_v3 = vpop.eup %6414 }
 0x1f5   :  { %v5279_v16 = vld [vmem:[#allocation7 + $0x2e0] sm:$0xf0]  ;;  %3490 = vmatpush.bf16.msrb.mxu2 %v5570_v5  ;;  %v1798_v36 = vmul.f32 %v6775_v3, %v6760_v38  ;;  %vm1804_vm0 = vweird.f32 %v6775_v3 }
 0x1f6   :  { %v6763_v41 = vsub.f32 %v6753_v14, %v1746_v33  ;;  %v5858_v14 = vor.u32 %v6371_v48, %v5855_v54  ;;  %v6291_v19 = vld [vmem:[#allocation7 + $0x4c4] sm:$0xf]  ;;  %v5282_v18 = vor.u32 %v6227_v12, %v5279_v16  ;;  %v6777_v29 = vpop.eup %6416  ;;  %vm1805_vm3 = vmor %vm1803_vm1, %vm1804_vm0 }
 0x1f7   :  { %3476 = vmatpush.bf16.msrb.mxu1 %v5346_v44  ;;  %v5535_v59 = vld [vmem:[#allocation7 + $0x4e0] sm:$0xf0]  ;;  %v6781_v43 = vpop.eup %6418  ;;  %v1808_v44 = vmul.f32 %v6777_v29, %v6766_v55  ;;  %vm1814_vm2 = vweird.f32 %v6777_v29  ;;  %v1717_v55 = vld [vmem:[%s6948_s5] sm:$0xf] }
 0x1f8   :  { %v1754_v56 = vmul.f32 %v6763_v41, %v6763_v41  ;;  %3502 = vmatpush.bf16.msrb.mxu3 %v5858_v14  ;;  %v5791_v49 = vld [vmem:[#allocation7 + $0x6e0] sm:$0xf0]  ;;  %v5538_v61 = vor.u32 %v6291_v19, %v5535_v59  ;;  %3465 = vmatpush.bf16.msrb.mxu0 %v5026_v51  ;;  %v1799_v14 = vmul.f32 %v6775_v3, %v1798_v36  ;;  %vm1794_vm6 = vweird.f32 %v6781_v43  ;;  %vm1815_vm7 = vmor %vm1813_vm4, %vm1814_vm2 }
 0x1f9   :  { %v5794_v22 = vor.u32 %v6355_v60, %v5791_v49  ;;  %v6155_v53 = vld [vmem:[#allocation7 + $0x84] sm:$0xf]  ;;  %v1788_v7 = vmul.f32 %v6781_v43, %v6771_v4  ;;  %v1809_v2 = vmul.f32 %v6777_v29, %v1808_v44  ;;  %vm1795_vm11 = vmor %vm1793_vm10, %vm1794_vm6 }
 0x1fa   :  { %v1773_v62 = vrot.slane %v1754_v56, 4  ;;  %v4991_v23 = vld [vmem:[#allocation7 + $0xa0] sm:$0xf0]  ;;  %3491 = vmatpush.bf16.msrb.mxu2 %v5538_v61  ;;  %v1800_v19 = vmul.f32 0.5, %v1799_v14 }
 0x1fb   :  { %3477 = vmatpush.bf16.msrb.mxu1 %v5314_v30  ;;  %v6219_v25 = vld [vmem:[#allocation7 + $0x284] sm:$0xf]  ;;  %v4994_v32 = vor.u32 %v6155_v53, %v4991_v23 }
 0x1fc   :  { %v1774_v8 = vadd.f32 %v1773_v62, %v1754_v56  ;;  %3503 = vmatpush.bf16.msrb.mxu3 %v5826_v9  ;;  %v5247_v13 = vld [vmem:[#allocation7 + $0x2a0] sm:$0xf0]  ;;  %v1801_v60 = vsub.f32 1.5, %v1800_v19 }
 0x1fd   :  { %v6283_v27 = vld [vmem:[#allocation7 + $0x484] sm:$0xf]  ;;  %v5250_v33 = vor.u32 %v6219_v25, %v5247_v13  ;;  %3466 = vmatpush.bf16.msrb.mxu0 %v4994_v32 }
 0x1fe   :  { %v1775_v21 = vrot.slane %v1774_v8, 2  ;;  %v5503_v28 = vld [vmem:[#allocation7 + $0x4a0] sm:$0xf0]  ;;  %v1802_v53 = vmul.f32 %v6775_v3, %v1801_v60 }
 0x1ff   :  { %3478 = vmatpush.bf16.msrb.mxu1 %v5282_v18  ;;  %v6347_v34 = vld [vmem:[#allocation7 + $0x684] sm:$0xf]  ;;  %v5506_v1 = vor.u32 %v6283_v27, %v5503_v28  ;;  %v1810_v18 = vmul.f32 0.5, %v1809_v2  ;;  %v6264_v2 = vld [vmem:[#allocation7 + $0x3e4] sm:$0xf0] }
 0x200   :  { %v1776_v15 = vadd.f32 %v1775_v21, %v1774_v8  ;;  %v5759_v35 = vld [vmem:[#allocation7 + $0x6a0] sm:$0xf0]  ;;  %3504 = vmatpush.bf16.msrb.mxu3 %v5794_v22  ;;  %v1789_v21 = vmul.f32 %v6781_v43, %v1788_v7  ;;  %v1806_v28 = vsel %vm1805_vm3, %v6775_v3, %v1802_v53  ;;  %v5893_v53 = vld [vmem:[#allocation7 + $0x788] sm:$0xf] }
 0x201   :  { %v5762_v40 = vor.u32 %v6347_v34, %v5759_v35  ;;  %v6147_v37 = vld [vmem:[#allocation7 + $0x44] sm:$0xf]  ;;  %3492 = vmatpush.bf16.msrb.mxu2 %v5506_v1  ;;  %v1831_v34 = vrot.slane %v1806_v28, 7  ;;  %v6184_v28 = vld [vmem:[#allocation7 + $0x164] sm:$0xf0] }
 0x202   :  { %v1777_v31 = vrot.slane %v1776_v15, 1  ;;  %v4959_v45 = vld [vmem:[#allocation7 + $0x60] sm:$0xf0]  ;;  %v1790_v61 = vmul.f32 0.5, %v1789_v21  ;;  %v5125_v21 = vld [vmem:[#allocation7 + $0x188] sm:$0xf] }
 0x203   :  { %v6211_v46 = vld [vmem:[#allocation7 + $0x244] sm:$0xf]  ;;  %3479 = vmatpush.bf16.msrb.mxu1 %v5250_v33  ;;  %v4962_v50 = vor.u32 %v6147_v37, %v4959_v45 }
 0x204   :  { %v1778_v39 = vadd.f32 %v1777_v31, %v1776_v15  ;;  %v5215_v52 = vld [vmem:[#allocation7 + $0x260] sm:$0xf0]  ;;  %3505 = vmatpush.bf16.msrb.mxu3 %v5762_v40  ;;  %v1811_v15 = vsub.f32 1.5, %v1810_v18  ;;  %v1791_v25 = vsub.f32 1.5, %v1790_v61  ;;  %v6256_v61 = vld [vmem:[#allocation7 + $0x3a4] sm:$0xf0] }
 0x205   :  { %v6275_v54 = vld [vmem:[#allocation7 + $0x444] sm:$0xf]  ;;  %v5218_v20 = vor.u32 %v6211_v46, %v5215_v52  ;;  %3467 = vmatpush.bf16.msrb.mxu0 %v4962_v50 }
 0x206   :  { %v1782_v48 = vmul.f32 %v1778_v39, %v6631_v24  ;;  %v5471_v56 = vld [vmem:[#allocation7 + $0x460] sm:$0xf0]  ;;  %v1812_v13 = vmul.f32 %v6777_v29, %v1811_v15  ;;  %v1792_v32 = vmul.f32 %v6781_v43, %v1791_v25  ;;  %v5637_v15 = vld [vmem:[#allocation7 + $0x588] sm:$0xf] }
 0x207   :  { %v5474_v57 = vor.u32 %v6275_v54, %v5471_v56  ;;  %v6339_v42 = vld [vmem:[#allocation7 + $0x644] sm:$0xf]  ;;  %3480 = vmatpush.bf16.msrb.mxu1 %v5218_v20 }
 0x208   :  { %v5727_v58 = vld [vmem:[#allocation7 + $0x660] sm:$0xf0]  ;;  %v1786_v62 = vadd.f32 1e-05, %v1782_v48  ;;  %v1816_v33 = vsel %vm1815_vm7, %v6777_v29, %v1812_v13  ;;  %v1796_v1 = vsel %vm1795_vm11, %v6781_v43, %v1792_v32  ;;  %v1718_v29 = vld [vmem:[%s6949_s6] sm:$0xf] }
 0x209   :  { %v5730_v63 = vor.u32 %v6339_v42, %v5727_v58  ;;  %v6139_v30 = vld [vmem:[#allocation7 + $0x4] sm:$0xf]  ;;  %3493 = vmatpush.bf16.msrb.mxu2 %v5474_v57  ;;  %v1832_v3 = vrot.slane %v1816_v33, 6  ;;  %v1834_v39 = vsel %vm699_vm12, %v1796_v1, %v1831_v34  ;;  %v1853_v44 = vperm.slane %v1718_v29, 0  ;;  %v5157_v42 = vld [vmem:[#allocation7 + $0x1c8] sm:$0xf] }
 0x20a   :  { %v4927_v0 = vld [vmem:[#allocation7 + $0x20] sm:$0xf0]  ;;  %6420 = vrsqrt.f32 %v1786_v62  ;;  %vm1823_vm8 = vweird.f32 %v1786_v62  ;;  %v1854_v45 = vperm.slane %v1718_v29, 1  ;;  %v1855_v46 = vperm.slane %v1718_v29, 2  ;;  %v5349_v33 = vld [vmem:[#allocation7 + $0x348] sm:$0xf] }
 0x20b   :  { %v6203_v5 = vld [vmem:[#allocation7 + $0x204] sm:$0xf]  ;;  %v4930_v9 = vor.u32 %v6139_v30, %v4927_v0  ;;  %3506 = vmatpush.bf16.msrb.mxu3 %v5730_v63  ;;  %v1856_v48 = vperm.slane %v1718_v29, 3  ;;  %v6200_v30 = vld [vmem:[#allocation7 + $0x1e4] sm:$0xf0] }
 0x20c   :  { %v5183_v6 = vld [vmem:[#allocation7 + $0x220] sm:$0xf0]  ;;  %v5413_v0 = vld [vmem:[#allocation7 + $0x3c8] sm:$0xf] }
 0x20d   :  { %v6267_v8 = vld [vmem:[#allocation7 + $0x404] sm:$0xf]  ;;  %v5186_v10 = vor.u32 %v6203_v5, %v5183_v6  ;;  %3468 = vmatpush.bf16.msrb.mxu0 %v4930_v9  ;;  %v5669_v5 = vld [vmem:[#allocation7 + $0x5c8] sm:$0xf] }
 0x20e   :  { %v5439_v11 = vld [vmem:[#allocation7 + $0x420] sm:$0xf0]  ;;  %v6328_v6 = vld [vmem:[#allocation7 + $0x5e4] sm:$0xf0] }
 0x20f   :  { %v6331_v12 = vld [vmem:[#allocation7 + $0x604] sm:$0xf]  ;;  %v5442_v59 = vor.u32 %v6267_v8, %v5439_v11  ;;  %3481 = vmatpush.bf16.msrb.mxu1 %v5186_v10  ;;  %v5925_v8 = vld [vmem:[#allocation7 + $0x7c8] sm:$0xf]  ;;  %v5670_v18 = vor.u32 %v6328_v6, %v5669_v5 }
 0x210   :  { %v5695_v16 = vld [vmem:[#allocation7 + $0x620] sm:$0xf0]  ;;  %v6421_v49 = vpop.eup %6420  ;;  %v5605_v34 = vld [vmem:[#allocation7 + $0x548] sm:$0xf] }
 0x211   :  { %v5698_v51 = vor.u32 %v6331_v12, %v5695_v16  ;;  %3494 = vmatpush.bf16.msrb.mxu2 %v5442_v59  ;;  %v1818_v22 = vmul.f32 %v6421_v49, %v1786_v62  ;;  %vm1824_vm5 = vweird.f32 %v6421_v49  ;;  %v5158_v12 = vor.u32 %v6200_v30, %v5157_v42  ;;  %v5061_v29 = vld [vmem:[#allocation7 + $0x108] sm:$0xf] }
 0x212   :  { %vm1825_vm9 = vmor %vm1823_vm8, %vm1824_vm5  ;;  %v6232_v42 = vld [vmem:[#allocation7 + $0x2e4] sm:$0xf0] }
 0x213   :  { %3507 = vmatpush.bf16.msrb.mxu3 %v5698_v51  ;;  %v1819_v23 = vmul.f32 %v6421_v49, %v1818_v22  ;;  %v6192_v51 = vld [vmem:[#allocation7 + $0x1a4] sm:$0xf0] }
 0x214   :  { %v6320_v22 = vld [vmem:[#allocation7 + $0x5a4] sm:$0xf0]  ;;  %v5126_v25 = vor.u32 %v6192_v51, %v5125_v21 }
 0x215   :  { %v1820_v27 = vmul.f32 0.5, %v1819_v23  ;;  %v6384_v23 = vld [vmem:[#allocation7 + $0x7a4] sm:$0xf0] }
 0x216   :  { %v5894_v32 = vor.u32 %v6384_v23, %v5893_v53  ;;  %v6160_v5 = vld [vmem:[#allocation7 + $0xa4] sm:$0xf0] }
 0x217   :  { %v1821_v31 = vsub.f32 1.5, %v1820_v27  ;;  %v5093_v27 = vld [vmem:[#allocation7 + $0x148] sm:$0xf] }
 0x218   :  { %v4965_v51 = vld [vmem:[#allocation7 + $0x48] sm:$0xf] }
 0x219   :  { %v1822_v38 = vmul.f32 %v6421_v49, %v1821_v31  ;;  %v5638_v31 = vor.u32 %v6320_v22, %v5637_v15  ;;  %v6216_v15 = vld [vmem:[#allocation7 + $0x264] sm:$0xf0] }
 0x21a   :  { %v5477_v22 = vld [vmem:[#allocation7 + $0x448] sm:$0xf] }
 0x21b   :  { %v1826_v35 = vsel %vm1825_vm9, %v6421_v49, %v1822_v38  ;;  %v5381_v49 = vld [vmem:[#allocation7 + $0x388] sm:$0xf] }
 0x21c   :  { %v1833_v36 = vrot.slane %v1826_v35, 5  ;;  %v5382_v13 = vor.u32 %v6256_v61, %v5381_v49  ;;  %v6248_v38 = vld [vmem:[#allocation7 + $0x364] sm:$0xf0] }
 0x21d   :  { %v6312_v35 = vld [vmem:[#allocation7 + $0x564] sm:$0xf0]  ;;  %v5350_v1 = vor.u32 %v6248_v38, %v5349_v33 }
 0x21e   :  { %v1835_v40 = vsel %vm701_vm13, %v1832_v3, %v1833_v36  ;;  %v5861_v3 = vld [vmem:[#allocation7 + $0x748] sm:$0xf] }
 0x21f   :  { %v1836_v4 = vsel %vm703_vm15, %v1834_v39, %v1835_v40  ;;  %v6376_v36 = vld [vmem:[#allocation7 + $0x764] sm:$0xf0]  ;;  %v5606_v40 = vor.u32 %v6312_v35, %v5605_v34 }
 0x220   :  { %v1838_v37 = vmul.f32 %v1836_v4, %v1717_v55  ;;  %v5094_v55 = vor.u32 %v6184_v28, %v5093_v27  ;;  %v6176_v39 = vld [vmem:[#allocation7 + $0x124] sm:$0xf0]  ;;  %v5862_v4 = vor.u32 %v6376_v36, %v5861_v3 }
 0x221   :  { %v5221_v61 = vld [vmem:[#allocation7 + $0x248] sm:$0xf] }
 0x222   :  { %v1840_v50 = vperm.slane %v1838_v37, 0  ;;  %v1841_v52 = vperm.slane %v1838_v37, 1  ;;  %v1842_v54 = vperm.slane %v1838_v37, 2  ;;  %v1843_v56 = vperm.slane %v1838_v37, 3  ;;  %v5317_v37 = vld [vmem:[#allocation7 + $0x308] sm:$0xf] }
 0x223   :  { %v6280_v53 = vld [vmem:[#allocation7 + $0x464] sm:$0xf0]  ;;  %v5222_v28 = vor.u32 %v6216_v15, %v5221_v61  ;;  %v6236_v15 = vld [vmem:[#allocation7 + $0x30c] sm:$0xf] }
 0x224   :  { %v1848_v43 = vmul.f32 %v1840_v50, %v6744_v17  ;;  %v1849_v14 = vmul.f32 %v1841_v52, %v6738_v47  ;;  %v1850_v20 = vmul.f32 %v1842_v54, %v6749_v26  ;;  %v1851_v57 = vmul.f32 %v1843_v56, %v6763_v41  ;;  %v6392_v47 = vld [vmem:[#allocation7 + $0x7e4] sm:$0xf0] }
 0x225   :  { %v5414_v26 = vor.u32 %v6264_v2, %v5413_v0  ;;  %v5926_v60 = vor.u32 %v6392_v47, %v5925_v8  ;;  %v6368_v50 = vld [vmem:[#allocation7 + $0x724] sm:$0xf0]  ;;  %v5062_v52 = vor.u32 %v6176_v39, %v5061_v29  ;;  %v5478_v38 = vor.u32 %v6280_v53, %v5477_v22  ;;  %v5159_v29 = vld [vmem:[#allocation7 + $0x1e8] sm:$0xf0] }
 0x226   :  { %v1861_v58 = vadd.f32 %v1853_v44, %v1848_v43  ;;  %v1862_v7 = vadd.f32 %v1854_v45, %v1849_v14  ;;  %v1863_v62 = vadd.f32 %v1855_v46, %v1850_v20  ;;  %v1864_v63 = vadd.f32 %v1856_v48, %v1851_v57  ;;  %v6240_v44 = vld [vmem:[#allocation7 + $0x324] sm:$0xf0]  ;;  %v6260_v39 = vld [vmem:[#allocation7 + $0x3cc] sm:$0xf] }
 0x227   :  { %v5573_v45 = vld [vmem:[#allocation7 + $0x508] sm:$0xf]  ;;  %v5318_v54 = vor.u32 %v6240_v44, %v5317_v37  ;;  %v5319_v22 = vld [vmem:[#allocation7 + $0x328] sm:$0xf0] }
 0x228   :  { %v1865_v9 = vmax.f32 %v1861_v58, 0.0  ;;  %v1866_v10 = vmax.f32 %v1862_v7, 0.0  ;;  %v1867_v17 = vmax.f32 %v1863_v62, 0.0  ;;  %v1868_v11 = vmax.f32 %v1864_v63, 0.0  ;;  %v6304_v46 = vld [vmem:[#allocation7 + $0x524] sm:$0xf0] }
 0x229   :  { %v5829_v48 = vld [vmem:[#allocation7 + $0x708] sm:$0xf]  ;;  %v5574_v14 = vor.u32 %v6304_v46, %v5573_v45  ;;  %v5671_v45 = vld [vmem:[#allocation7 + $0x5e8] sm:$0xf0] }
 0x22a   :  { %v6816_v16 = vpack.c.bf16 %v1865_v9, %v1865_v9  ;;  %v6818_v41 = vpack.c.bf16 %v1866_v10, %v1866_v10  ;;  %v6820_v19 = vpack.c.bf16 %v1867_v17, %v1867_v17  ;;  %v6822_v59 = vpack.c.bf16 %v1868_v11, %v1868_v11  ;;  %v5029_v56 = vld [vmem:[#allocation7 + $0xc8] sm:$0xf]  ;;  %v6388_v46 = vld [vmem:[#allocation7 + $0x7cc] sm:$0xf] }
 0x22b   :  { %v6168_v43 = vld [vmem:[#allocation7 + $0xe4] sm:$0xf0]  ;;  %v5830_v20 = vor.u32 %v6368_v50, %v5829_v48  ;;  %v5927_v48 = vld [vmem:[#allocation7 + $0x7e8] sm:$0xf0] }
 0x22c   :  { %3417 = vmatmul.bf16.vlgmr.msra.gmra.mxu0 %v6816_v16  ;;  %3430 = vmatmul.bf16.vlgmr.msra.gmra.mxu1 %v6818_v41  ;;  %v5285_v57 = vld [vmem:[#allocation7 + $0x2c8] sm:$0xf]  ;;  %v5030_v30 = vor.u32 %v6168_v43, %v5029_v56  ;;  %v6188_v43 = vld [vmem:[#allocation7 + $0x18c] sm:$0xf] }
 0x22d   :  { %3443 = vmatmul.bf16.vlgmr.msra.gmra.mxu2 %v6820_v19  ;;  %3456 = vmatmul.bf16.vlgmr.msra.gmra.mxu3 %v6822_v59  ;;  %v5541_v58 = vld [vmem:[#allocation7 + $0x4c8] sm:$0xf]  ;;  %v5286_v0 = vor.u32 %v6232_v42, %v5285_v57  ;;  %v5930_v57 = vor.u32 %v6388_v46, %v5927_v48  ;;  %v6252_v42 = vld [vmem:[#allocation7 + $0x38c] sm:$0xf] }
 0x22e   :  { %3513 = vmatpush.bf16.msra.mxu0 %v5158_v12  ;;  %3526 = vmatpush.bf16.msra.mxu1 %v5414_v26  ;;  %v6296_v7 = vld [vmem:[#allocation7 + $0x4e4] sm:$0xf0]  ;;  %v6300_v53 = vld [vmem:[#allocation7 + $0x50c] sm:$0xf] }
 0x22f   :  { %3539 = vmatpush.bf16.msra.mxu2 %v5670_v18  ;;  %3552 = vmatpush.bf16.msra.mxu3 %v5926_v60  ;;  %v5797_v62 = vld [vmem:[#allocation7 + $0x6c8] sm:$0xf]  ;;  %v5542_v6 = vor.u32 %v6296_v7, %v5541_v58  ;;  %v5383_v58 = vld [vmem:[#allocation7 + $0x3a8] sm:$0xf0] }
 0x230   :  { %v6360_v63 = vld [vmem:[#allocation7 + $0x6e4] sm:$0xf0]  ;;  %v6316_v7 = vld [vmem:[#allocation7 + $0x58c] sm:$0xf] }
 0x231   :  { %v4997_v2 = vld [vmem:[#allocation7 + $0x88] sm:$0xf]  ;;  %v5798_v8 = vor.u32 %v6360_v63, %v5797_v62  ;;  %v5639_v62 = vld [vmem:[#allocation7 + $0x5a8] sm:$0xf0] }
 0x232   :  { %3514 = vmatpush.bf16.msra.mxu0 %v5126_v25  ;;  %3527 = vmatpush.bf16.msra.mxu1 %v5382_v13  ;;  %v5253_v9 = vld [vmem:[#allocation7 + $0x288] sm:$0xf]  ;;  %v4998_v26 = vor.u32 %v6160_v5, %v4997_v2  ;;  %v6380_v63 = vld [vmem:[#allocation7 + $0x78c] sm:$0xf]  ;;  %v5386_v2 = vor.u32 %v6252_v42, %v5383_v58 }
 0x233   :  { %3540 = vmatpush.bf16.msra.mxu2 %v5638_v31  ;;  %3553 = vmatpush.bf16.msra.mxu3 %v5894_v32  ;;  %v6224_v10 = vld [vmem:[#allocation7 + $0x2a4] sm:$0xf0]  ;;  %v6180_v5 = vld [vmem:[#allocation7 + $0x14c] sm:$0xf] }
 0x234   :  { %v5509_v17 = vld [vmem:[#allocation7 + $0x488] sm:$0xf]  ;;  %v5254_v21 = vor.u32 %v6224_v10, %v5253_v9  ;;  %v6244_v10 = vld [vmem:[#allocation7 + $0x34c] sm:$0xf] }
 0x235   :  { %v6288_v11 = vld [vmem:[#allocation7 + $0x4a4] sm:$0xf0]  ;;  %v5255_v46 = vld [vmem:[#allocation7 + $0x2a8] sm:$0xf0] }
 0x236   :  { %3515 = vmatpush.bf16.msra.mxu0 %v5094_v55  ;;  %3528 = vmatpush.bf16.msra.mxu1 %v5350_v1  ;;  %v5765_v47 = vld [vmem:[#allocation7 + $0x688] sm:$0xf]  ;;  %v5510_v60 = vor.u32 %v6288_v11, %v5509_v17  ;;  %v6196_v1 = vld [vmem:[#allocation7 + $0x1cc] sm:$0xf] }
 0x237   :  { %3541 = vmatpush.bf16.msra.mxu2 %v5606_v40  ;;  %3554 = vmatpush.bf16.msra.mxu3 %v5862_v4  ;;  %v6352_v12 = vld [vmem:[#allocation7 + $0x6a4] sm:$0xf0]  ;;  %v5415_v40 = vld [vmem:[#allocation7 + $0x3e8] sm:$0xf0] }
 0x238   :  { %v6152_v18 = vld [vmem:[#allocation7 + $0x64] sm:$0xf0]  ;;  %v5766_v49 = vor.u32 %v6352_v12, %v5765_v47  ;;  %v6324_v4 = vld [vmem:[#allocation7 + $0x5cc] sm:$0xf]  ;;  %v5418_v56 = vor.u32 %v6260_v39, %v5415_v40 }
 0x239   :  { %v5733_v23 = vld [vmem:[#allocation7 + $0x648] sm:$0xf]  ;;  %v4966_v27 = vor.u32 %v6152_v18, %v4965_v51  ;;  %v5351_v17 = vld [vmem:[#allocation7 + $0x368] sm:$0xf0] }
 0x23a   :  { %3516 = vmatpush.bf16.msra.mxu0 %v5062_v52  ;;  %3529 = vmatpush.bf16.msra.mxu1 %v5318_v54  ;;  %v6344_v25 = vld [vmem:[#allocation7 + $0x664] sm:$0xf0]  ;;  %v5162_v54 = vor.u32 %v6196_v1, %v5159_v29  ;;  %v6308_v11 = vld [vmem:[#allocation7 + $0x54c] sm:$0xf]  ;;  %v5354_v51 = vor.u32 %v6244_v10, %v5351_v17 }
 0x23b   :  { %3542 = vmatpush.bf16.msra.mxu2 %v5574_v14  ;;  %3555 = vmatpush.bf16.msra.mxu3 %v5830_v20  ;;  %v4933_v13 = vld [vmem:[#allocation7 + $0x8] sm:$0xf]  ;;  %v5734_v34 = vor.u32 %v6344_v25, %v5733_v23  ;;  %v5127_v14 = vld [vmem:[#allocation7 + $0x1a8] sm:$0xf0]  ;;  %v5674_v20 = vor.u32 %v6324_v4, %v5671_v45 }
 0x23c   :  { %3469 = vmatmul.bf16.vlgmr.msrb.gmra.mxu0 %v6816_v16  ;;  %3482 = vmatmul.bf16.vlgmr.msrb.gmra.mxu1 %v6818_v41  ;;  %v6144_v31 = vld [vmem:[#allocation7 + $0x24] sm:$0xf0]  ;;  %v5607_v47 = vld [vmem:[#allocation7 + $0x568] sm:$0xf0] }
 0x23d   :  { %3495 = vmatmul.bf16.vlgmr.msrb.gmra.mxu2 %v6820_v19  ;;  %3508 = vmatmul.bf16.vlgmr.msrb.gmra.mxu3 %v6822_v59  ;;  %v5189_v32 = vld [vmem:[#allocation7 + $0x208] sm:$0xf]  ;;  %v4934_v37 = vor.u32 %v6144_v31, %v4933_v13  ;;  %v6372_v12 = vld [vmem:[#allocation7 + $0x74c] sm:$0xf] }
 0x23e   :  { %3517 = vmatpush.bf16.msra.mxu0 %v5030_v30  ;;  %3530 = vmatpush.bf16.msra.mxu1 %v5286_v0  ;;  %v6208_v33 = vld [vmem:[#allocation7 + $0x224] sm:$0xf0]  ;;  %v5895_v30 = vld [vmem:[#allocation7 + $0x7a8] sm:$0xf0]  ;;  %v5130_v0 = vor.u32 %v6188_v43, %v5127_v14 }
 0x23f   :  { %3543 = vmatpush.bf16.msra.mxu2 %v5542_v6  ;;  %3556 = vmatpush.bf16.msra.mxu3 %v5798_v8  ;;  %v5445_v35 = vld [vmem:[#allocation7 + $0x408] sm:$0xf]  ;;  %v5190_v44 = vor.u32 %v6208_v33, %v5189_v32  ;;  %v5095_v6 = vld [vmem:[#allocation7 + $0x168] sm:$0xf0]  ;;  %v5642_v8 = vor.u32 %v6316_v7, %v5639_v62  ;;  %v5898_v9 = vor.u32 %v6380_v63, %v5895_v30 }
 0x240   :  { %v6272_v3 = vld [vmem:[#allocation7 + $0x424] sm:$0xf0]  ;;  %v6172_v18 = vld [vmem:[#allocation7 + $0x10c] sm:$0xf] }
 0x241   :  { %v5701_v36 = vld [vmem:[#allocation7 + $0x608] sm:$0xf]  ;;  %v5446_v50 = vor.u32 %v6272_v3, %v5445_v35  ;;  %v5575_v23 = vld [vmem:[#allocation7 + $0x528] sm:$0xf0] }
 0x242   :  { %3518 = vmatpush.bf16.msra.mxu0 %v4998_v26  ;;  %3531 = vmatpush.bf16.msra.mxu1 %v5254_v21  ;;  %v6336_v55 = vld [vmem:[#allocation7 + $0x624] sm:$0xf0]  ;;  %v5863_v26 = vld [vmem:[#allocation7 + $0x768] sm:$0xf0]  ;;  %v5098_v21 = vor.u32 %v6180_v5, %v5095_v6  ;;  %v5578_v33 = vor.u32 %v6300_v53, %v5575_v23  ;;  %v6329_v53 = vld [vmem:[#allocation7 + $0x5ec] sm:$0xf0] }
 0x243   :  { %3544 = vmatpush.bf16.msra.mxu2 %v5510_v60  ;;  %3557 = vmatpush.bf16.msra.mxu3 %v5766_v49  ;;  %v5702_v52 = vor.u32 %v6336_v55, %v5701_v36  ;;  %v5063_v60 = vld [vmem:[#allocation7 + $0x128] sm:$0xf0]  ;;  %v5610_v49 = vor.u32 %v6308_v11, %v5607_v47  ;;  %v5866_v61 = vor.u32 %v6372_v12, %v5863_v26  ;;  %v5933_v23 = vld [vmem:[#allocation7 + $0x7d0] sm:$0xf] }
 0x244   :  { %v6364_v25 = vld [vmem:[#allocation7 + $0x70c] sm:$0xf] }
 0x245   :  { %v5831_v13 = vld [vmem:[#allocation7 + $0x728] sm:$0xf0] }
 0x246   :  { %3519 = vmatpush.bf16.msra.mxu0 %v4966_v27  ;;  %3532 = vmatpush.bf16.msra.mxu1 %v5222_v28  ;;  %v5066_v27 = vor.u32 %v6172_v18, %v5063_v60  ;;  %v5322_v28 = vor.u32 %v6236_v15, %v5319_v22  ;;  %v6164_v31 = vld [vmem:[#allocation7 + $0xcc] sm:$0xf]  ;;  %v6201_v18 = vld [vmem:[#allocation7 + $0x1ec] sm:$0xf0] }
 0x247   :  { %3545 = vmatpush.bf16.msra.mxu2 %v5478_v38  ;;  %3558 = vmatpush.bf16.msra.mxu3 %v5734_v34  ;;  %v5031_v32 = vld [vmem:[#allocation7 + $0xe8] sm:$0xf0]  ;;  %v5834_v38 = vor.u32 %v6364_v25, %v5831_v13  ;;  %v5421_v60 = vld [vmem:[#allocation7 + $0x3d0] sm:$0xf] }
 0x248   :  { %v6228_v34 = vld [vmem:[#allocation7 + $0x2cc] sm:$0xf]  ;;  %v5034_v29 = vor.u32 %v6164_v31, %v5031_v32  ;;  %v6393_v25 = vld [vmem:[#allocation7 + $0x7ec] sm:$0xf0] }
 0x249   :  { %v5287_v35 = vld [vmem:[#allocation7 + $0x2e8] sm:$0xf0]  ;;  %v5133_v32 = vld [vmem:[#allocation7 + $0x190] sm:$0xf] }
 0x24a   :  { %3520 = vmatpush.bf16.msra.mxu0 %v4934_v37  ;;  %3533 = vmatpush.bf16.msra.mxu1 %v5190_v44  ;;  %v6292_v3 = vld [vmem:[#allocation7 + $0x4cc] sm:$0xf]  ;;  %v5290_v39 = vor.u32 %v6228_v34, %v5287_v35  ;;  %v5934_v34 = vor.u32 %v6393_v25, %v5933_v23  ;;  %v5389_v35 = vld [vmem:[#allocation7 + $0x390] sm:$0xf] }
 0x24b   :  { %3546 = vmatpush.bf16.msra.mxu2 %v5446_v50  ;;  %3559 = vmatpush.bf16.msra.mxu3 %v5702_v52  ;;  %v5543_v36 = vld [vmem:[#allocation7 + $0x4e8] sm:$0xf0]  ;;  %v6225_v23 = vld [vmem:[#allocation7 + $0x2ac] sm:$0xf0] }
 0x24c   :  { %v6356_v55 = vld [vmem:[#allocation7 + $0x6cc] sm:$0xf]  ;;  %v5546_v37 = vor.u32 %v6292_v3, %v5543_v36  ;;  %v6257_v3 = vld [vmem:[#allocation7 + $0x3ac] sm:$0xf0] }
 0x24d   :  { %3521 = vmatmul.bf16.vlgmr.msra.gmra.mxu0 %v6816_v16  ;;  %3534 = vmatmul.bf16.vlgmr.msra.gmra.mxu1 %v6818_v41  ;;  %v5799_v1 = vld [vmem:[#allocation7 + $0x6e8] sm:$0xf0]  ;;  %v5645_v36 = vld [vmem:[#allocation7 + $0x590] sm:$0xf] }
 0x24e   :  { %3565 = vmatpush.bf16.msrb.mxu0 %v5162_v54  ;;  %3578 = vmatpush.bf16.msrb.mxu1 %v5418_v56  ;;  %v6156_v40 = vld [vmem:[#allocation7 + $0x8c] sm:$0xf]  ;;  %v5802_v44 = vor.u32 %v6356_v55, %v5799_v1  ;;  %v6321_v55 = vld [vmem:[#allocation7 + $0x5ac] sm:$0xf0] }
 0x24f   :  { %3591 = vmatpush.bf16.msrb.mxu2 %v5674_v20  ;;  %3604 = vmatpush.bf16.msrb.mxu3 %v5930_v57  ;;  %v4999_v4 = vld [vmem:[#allocation7 + $0xa8] sm:$0xf0]  ;;  %v5901_v1 = vld [vmem:[#allocation7 + $0x790] sm:$0xf] }
 0x250   :  { %3547 = vmatmul.bf16.vlgmr.msra.gmra.mxu2 %v6820_v19  ;;  %3560 = vmatmul.bf16.vlgmr.msra.gmra.mxu3 %v6822_v59  ;;  %v6220_v45 = vld [vmem:[#allocation7 + $0x28c] sm:$0xf]  ;;  %v5002_v56 = vor.u32 %v6156_v40, %v4999_v4  ;;  %v5390_v40 = vor.u32 %v6257_v3, %v5389_v35  ;;  %v5101_v4 = vld [vmem:[#allocation7 + $0x150] sm:$0xf] }
 0x251   :  { %v6284_v48 = vld [vmem:[#allocation7 + $0x48c] sm:$0xf]  ;;  %v5258_v43 = vor.u32 %v6220_v45, %v5255_v46  ;;  %v5357_v46 = vld [vmem:[#allocation7 + $0x350] sm:$0xf] }
 0x252   :  { %3566 = vmatpush.bf16.msrb.mxu0 %v5130_v0  ;;  %3579 = vmatpush.bf16.msrb.mxu1 %v5386_v2  ;;  %v5511_v50 = vld [vmem:[#allocation7 + $0x4a8] sm:$0xf0]  ;;  %v5517_v25 = vld [vmem:[#allocation7 + $0x490] sm:$0xf] }
 0x253   :  { %3592 = vmatpush.bf16.msrb.mxu2 %v5642_v8  ;;  %3605 = vmatpush.bf16.msrb.mxu3 %v5898_v9  ;;  %v6348_v52 = vld [vmem:[#allocation7 + $0x68c] sm:$0xf]  ;;  %v5514_v57 = vor.u32 %v6284_v48, %v5511_v50  ;;  %v6249_v48 = vld [vmem:[#allocation7 + $0x36c] sm:$0xf0] }
 0x254   :  { %v5767_v54 = vld [vmem:[#allocation7 + $0x6a8] sm:$0xf0]  ;;  %v5613_v50 = vld [vmem:[#allocation7 + $0x550] sm:$0xf] }
 0x255   :  { %v6148_v14 = vld [vmem:[#allocation7 + $0x4c] sm:$0xf]  ;;  %v5770_v42 = vor.u32 %v6348_v52, %v5767_v54  ;;  %v6313_v52 = vld [vmem:[#allocation7 + $0x56c] sm:$0xf0] }
 0x256   :  { %3567 = vmatpush.bf16.msrb.mxu0 %v5098_v21  ;;  %3580 = vmatpush.bf16.msrb.mxu1 %v5354_v51  ;;  %v4967_v20 = vld [vmem:[#allocation7 + $0x68] sm:$0xf0]  ;;  %v5165_v51 = vld [vmem:[#allocation7 + $0x1d0] sm:$0xf] }
 0x257   :  { %3593 = vmatpush.bf16.msrb.mxu2 %v5610_v49  ;;  %3606 = vmatpush.bf16.msrb.mxu3 %v5866_v61  ;;  %v6212_v58 = vld [vmem:[#allocation7 + $0x24c] sm:$0xf]  ;;  %v4970_v5 = vor.u32 %v6148_v14, %v4967_v20  ;;  %v6265_v49 = vld [vmem:[#allocation7 + $0x3ec] sm:$0xf0]  ;;  %v5358_v14 = vor.u32 %v6249_v48, %v5357_v46 }
 0x258   :  { %v5223_v7 = vld [vmem:[#allocation7 + $0x268] sm:$0xf0]  ;;  %v5677_v61 = vld [vmem:[#allocation7 + $0x5d0] sm:$0xf]  ;;  %v5422_v31 = vor.u32 %v6265_v49, %v5421_v60 }
 0x259   :  { %v6276_v62 = vld [vmem:[#allocation7 + $0x44c] sm:$0xf]  ;;  %v5226_v6 = vor.u32 %v6212_v58, %v5223_v7  ;;  %v5869_v54 = vld [vmem:[#allocation7 + $0x750] sm:$0xf] }
 0x25a   :  { %3568 = vmatpush.bf16.msrb.mxu0 %v5066_v27  ;;  %3581 = vmatpush.bf16.msrb.mxu1 %v5322_v28  ;;  %v5479_v63 = vld [vmem:[#allocation7 + $0x468] sm:$0xf0]  ;;  %v5166_v28 = vor.u32 %v6201_v18, %v5165_v51  ;;  %v5069_v20 = vld [vmem:[#allocation7 + $0x110] sm:$0xf] }
 0x25b   :  { %3594 = vmatpush.bf16.msrb.mxu2 %v5578_v33  ;;  %3607 = vmatpush.bf16.msrb.mxu3 %v5834_v38  ;;  %v6340_v30 = vld [vmem:[#allocation7 + $0x64c] sm:$0xf]  ;;  %v5482_v17 = vor.u32 %v6276_v62, %v5479_v63  ;;  %v6193_v33 = vld [vmem:[#allocation7 + $0x1ac] sm:$0xf0]  ;;  %v5678_v38 = vor.u32 %v6329_v53, %v5677_v61 }
 0x25c   :  { %v5735_v0 = vld [vmem:[#allocation7 + $0x668] sm:$0xf0]  ;;  %v5325_v7 = vld [vmem:[#allocation7 + $0x310] sm:$0xf] }
 0x25d   :  { %v6140_v2 = vld [vmem:[#allocation7 + $0xc] sm:$0xf]  ;;  %v5738_v11 = vor.u32 %v6340_v30, %v5735_v0  ;;  %v6241_v62 = vld [vmem:[#allocation7 + $0x32c] sm:$0xf0] }
 0x25e   :  { %3569 = vmatpush.bf16.msrb.mxu0 %v5034_v29  ;;  %3582 = vmatpush.bf16.msrb.mxu1 %v5290_v39  ;;  %v4935_v8 = vld [vmem:[#allocation7 + $0x28] sm:$0xf0]  ;;  %v6385_v29 = vld [vmem:[#allocation7 + $0x7ac] sm:$0xf0]  ;;  %v5134_v39 = vor.u32 %v6193_v33, %v5133_v32 }
 0x25f   :  { %3595 = vmatpush.bf16.msrb.mxu2 %v5546_v37  ;;  %3608 = vmatpush.bf16.msrb.mxu3 %v5802_v44  ;;  %v6204_v9 = vld [vmem:[#allocation7 + $0x20c] sm:$0xf]  ;;  %v4938_v15 = vor.u32 %v6140_v2, %v4935_v8  ;;  %v6185_v37 = vld [vmem:[#allocation7 + $0x16c] sm:$0xf0]  ;;  %v5646_v44 = vor.u32 %v6321_v55, %v5645_v36  ;;  %v5902_v45 = vor.u32 %v6385_v29, %v5901_v1 }
 0x260   :  { %v5191_v10 = vld [vmem:[#allocation7 + $0x228] sm:$0xf0]  ;;  %v5581_v63 = vld [vmem:[#allocation7 + $0x510] sm:$0xf] }
 0x261   :  { %v6268_v47 = vld [vmem:[#allocation7 + $0x40c] sm:$0xf]  ;;  %v5194_v22 = vor.u32 %v6204_v9, %v5191_v10  ;;  %v6305_v30 = vld [vmem:[#allocation7 + $0x52c] sm:$0xf0] }
 0x262   :  { %3570 = vmatpush.bf16.msrb.mxu0 %v5002_v56  ;;  %3583 = vmatpush.bf16.msrb.mxu1 %v5258_v43  ;;  %v5447_v12 = vld [vmem:[#allocation7 + $0x428] sm:$0xf0]  ;;  %v6377_v56 = vld [vmem:[#allocation7 + $0x76c] sm:$0xf0]  ;;  %v5102_v43 = vor.u32 %v6185_v37, %v5101_v4  ;;  %v5582_v10 = vor.u32 %v6305_v30, %v5581_v63  ;;  %v5679_v63 = vld [vmem:[#allocation7 + $0x5f0] sm:$0xf0] }
 0x263   :  { %3596 = vmatpush.bf16.msrb.mxu2 %v5514_v57  ;;  %3609 = vmatpush.bf16.msrb.mxu3 %v5770_v42  ;;  %v6332_v26 = vld [vmem:[#allocation7 + $0x60c] sm:$0xf]  ;;  %v5450_v13 = vor.u32 %v6268_v47, %v5447_v12  ;;  %v6177_v57 = vld [vmem:[#allocation7 + $0x12c] sm:$0xf0]  ;;  %v5614_v42 = vor.u32 %v6313_v52, %v5613_v50  ;;  %v5870_v58 = vor.u32 %v6377_v56, %v5869_v54  ;;  %v6389_v30 = vld [vmem:[#allocation7 + $0x7d4] sm:$0xf] }
 0x264   :  { %v5703_v21 = vld [vmem:[#allocation7 + $0x628] sm:$0xf0]  ;;  %v5837_v0 = vld [vmem:[#allocation7 + $0x710] sm:$0xf] }
 0x265   :  { %v5706_v27 = vor.u32 %v6332_v26, %v5703_v21  ;;  %v6369_v2 = vld [vmem:[#allocation7 + $0x72c] sm:$0xf0] }
 0x266   :  { %3571 = vmatpush.bf16.msrb.mxu0 %v4970_v5  ;;  %3584 = vmatpush.bf16.msrb.mxu1 %v5226_v6  ;;  %v5070_v5 = vor.u32 %v6177_v57, %v5069_v20  ;;  %v5326_v6 = vor.u32 %v6241_v62, %v5325_v7  ;;  %v5037_v8 = vld [vmem:[#allocation7 + $0xd0] sm:$0xf]  ;;  %v5167_v20 = vld [vmem:[#allocation7 + $0x1f0] sm:$0xf0] }
 0x267   :  { %3597 = vmatpush.bf16.msrb.mxu2 %v5482_v17  ;;  %3610 = vmatpush.bf16.msrb.mxu3 %v5738_v11  ;;  %v6169_v9 = vld [vmem:[#allocation7 + $0xec] sm:$0xf0]  ;;  %v5838_v17 = vor.u32 %v6369_v2, %v5837_v0  ;;  %v6261_v57 = vld [vmem:[#allocation7 + $0x3d4] sm:$0xf] }
 0x268   :  { %v5293_v11 = vld [vmem:[#allocation7 + $0x2d0] sm:$0xf]  ;;  %v5038_v18 = vor.u32 %v6169_v9, %v5037_v8  ;;  %v5935_v0 = vld [vmem:[#allocation7 + $0x7f0] sm:$0xf0] }
 0x269   :  { %v6233_v47 = vld [vmem:[#allocation7 + $0x2ec] sm:$0xf0]  ;;  %v6189_v9 = vld [vmem:[#allocation7 + $0x194] sm:$0xf] }
 0x26a   :  { %3572 = vmatpush.bf16.msrb.mxu0 %v4938_v15  ;;  %3585 = vmatpush.bf16.msrb.mxu1 %v5194_v22  ;;  %v5549_v12 = vld [vmem:[#allocation7 + $0x4d0] sm:$0xf]  ;;  %v5294_v60 = vor.u32 %v6233_v47, %v5293_v11  ;;  %v5938_v11 = vor.u32 %v6389_v30, %v5935_v0  ;;  %v6253_v47 = vld [vmem:[#allocation7 + $0x394] sm:$0xf] }
 0x26b   :  { %3598 = vmatpush.bf16.msrb.mxu2 %v5450_v13  ;;  %3611 = vmatpush.bf16.msrb.mxu3 %v5706_v27  ;;  %v6297_v26 = vld [vmem:[#allocation7 + $0x4ec] sm:$0xf0]  ;;  %v5263_v30 = vld [vmem:[#allocation7 + $0x2b0] sm:$0xf0] }
 0x26c   :  { %v5805_v21 = vld [vmem:[#allocation7 + $0x6d0] sm:$0xf]  ;;  %v5550_v15 = vor.u32 %v6297_v26, %v5549_v12  ;;  %v5391_v12 = vld [vmem:[#allocation7 + $0x3b0] sm:$0xf0] }
 0x26d   :  { %3573 = vmatmul.bf16.vlgmr.msrb.gmra.mxu0 %v6816_v16  ;;  %3586 = vmatmul.bf16.vlgmr.msrb.gmra.mxu1 %v6818_v41  ;;  %v6361_v51 = vld [vmem:[#allocation7 + $0x6ec] sm:$0xf0]  ;;  %v6317_v26 = vld [vmem:[#allocation7 + $0x594] sm:$0xf] }
 0x26e   :  { %3617 = vmatpush.bf16.msra.mxu0 %v5166_v28  ;;  %3630 = vmatpush.bf16.msra.mxu1 %v5422_v31  ;;  %v5005_v49 = vld [vmem:[#allocation7 + $0x90] sm:$0xf]  ;;  %v5806_v22 = vor.u32 %v6361_v51, %v5805_v21  ;;  %v5647_v21 = vld [vmem:[#allocation7 + $0x5b0] sm:$0xf0] }
 0x26f   :  { %3643 = vmatpush.bf16.msra.mxu2 %v5678_v38  ;;  %3656 = vmatpush.bf16.msra.mxu3 %v5934_v34  ;;  %v6161_v61 = vld [vmem:[#allocation7 + $0xac] sm:$0xf0]  ;;  %v6381_v51 = vld [vmem:[#allocation7 + $0x794] sm:$0xf] }
 0x270   :  { %3599 = vmatmul.bf16.vlgmr.msrb.gmra.mxu2 %v6820_v19  ;;  %3612 = vmatmul.bf16.vlgmr.msrb.gmra.mxu3 %v6822_v59  ;;  %v5261_v53 = vld [vmem:[#allocation7 + $0x290] sm:$0xf]  ;;  %v5006_v31 = vor.u32 %v6161_v61, %v5005_v49  ;;  %v5394_v49 = vor.u32 %v6253_v47, %v5391_v12  ;;  %v6181_v61 = vld [vmem:[#allocation7 + $0x154] sm:$0xf] }
 0x271   :  { %v6289_v13 = vld [vmem:[#allocation7 + $0x4ac] sm:$0xf0]  ;;  %v5262_v32 = vor.u32 %v6225_v23, %v5261_v53  ;;  %v6245_v23 = vld [vmem:[#allocation7 + $0x354] sm:$0xf] }
 0x272   :  { %3618 = vmatpush.bf16.msra.mxu0 %v5134_v39  ;;  %3631 = vmatpush.bf16.msra.mxu1 %v5390_v40  ;;  %v5773_v27 = vld [vmem:[#allocation7 + $0x690] sm:$0xf]  ;;  %v5518_v34 = vor.u32 %v6289_v13, %v5517_v25  ;;  %v5359_v25 = vld [vmem:[#allocation7 + $0x370] sm:$0xf0] }
 0x273   :  { %3644 = vmatpush.bf16.msra.mxu2 %v5646_v44  ;;  %3657 = vmatpush.bf16.msra.mxu3 %v5902_v45  ;;  %v6353_v28 = vld [vmem:[#allocation7 + $0x6ac] sm:$0xf0]  ;;  %v6309_v13 = vld [vmem:[#allocation7 + $0x554] sm:$0xf] }
 0x274   :  { %v4973_v33 = vld [vmem:[#allocation7 + $0x50] sm:$0xf]  ;;  %v5774_v35 = vor.u32 %v6353_v28, %v5773_v27  ;;  %v5615_v27 = vld [vmem:[#allocation7 + $0x570] sm:$0xf0] }
 0x275   :  { %v6153_v38 = vld [vmem:[#allocation7 + $0x6c] sm:$0xf0]  ;;  %v6373_v28 = vld [vmem:[#allocation7 + $0x754] sm:$0xf] }
 0x276   :  { %3619 = vmatpush.bf16.msra.mxu0 %v5102_v43  ;;  %3632 = vmatpush.bf16.msra.mxu1 %v5358_v14  ;;  %v5229_v3 = vld [vmem:[#allocation7 + $0x250] sm:$0xf]  ;;  %v4974_v4 = vor.u32 %v6153_v38, %v4973_v33  ;;  %v6197_v14 = vld [vmem:[#allocation7 + $0x1d4] sm:$0xf]  ;;  %v5362_v33 = vor.u32 %v6245_v23, %v5359_v25 }
 0x277   :  { %3645 = vmatpush.bf16.msra.mxu2 %v5614_v42  ;;  %3658 = vmatpush.bf16.msra.mxu3 %v5870_v58  ;;  %v6217_v36 = vld [vmem:[#allocation7 + $0x26c] sm:$0xf0]  ;;  %v5423_v42 = vld [vmem:[#allocation7 + $0x3f0] sm:$0xf0] }
 0x278   :  { %v5485_v55 = vld [vmem:[#allocation7 + $0x450] sm:$0xf]  ;;  %v5230_v37 = vor.u32 %v6217_v36, %v5229_v3  ;;  %v6325_v58 = vld [vmem:[#allocation7 + $0x5d4] sm:$0xf]  ;;  %v5426_v8 = vor.u32 %v6261_v57, %v5423_v42 }
 0x279   :  { %v6281_v1 = vld [vmem:[#allocation7 + $0x46c] sm:$0xf0]  ;;  %v6173_v38 = vld [vmem:[#allocation7 + $0x114] sm:$0xf] }
 0x27a   :  { %3620 = vmatpush.bf16.msra.mxu0 %v5070_v5  ;;  %3633 = vmatpush.bf16.msra.mxu1 %v5326_v6  ;;  %v5741_v29 = vld [vmem:[#allocation7 + $0x650] sm:$0xf]  ;;  %v5486_v48 = vor.u32 %v6281_v1, %v5485_v55  ;;  %v5170_v6 = vor.u32 %v6197_v14, %v5167_v20  ;;  %v6237_v36 = vld [vmem:[#allocation7 + $0x314] sm:$0xf] }
 0x27b   :  { %3646 = vmatpush.bf16.msra.mxu2 %v5582_v10  ;;  %3659 = vmatpush.bf16.msra.mxu3 %v5838_v17  ;;  %v6345_v39 = vld [vmem:[#allocation7 + $0x66c] sm:$0xf0]  ;;  %v5135_v10 = vld [vmem:[#allocation7 + $0x1b0] sm:$0xf0]  ;;  %v5682_v17 = vor.u32 %v6325_v58, %v5679_v63 }
 0x27c   :  { %v4941_v40 = vld [vmem:[#allocation7 + $0x10] sm:$0xf]  ;;  %v5742_v50 = vor.u32 %v6345_v39, %v5741_v29  ;;  %v5327_v55 = vld [vmem:[#allocation7 + $0x330] sm:$0xf0] }
 0x27d   :  { %v6145_v44 = vld [vmem:[#allocation7 + $0x2c] sm:$0xf0]  ;;  %v6301_v1 = vld [vmem:[#allocation7 + $0x514] sm:$0xf] }
 0x27e   :  { %3621 = vmatpush.bf16.msra.mxu0 %v5038_v18  ;;  %3634 = vmatpush.bf16.msra.mxu1 %v5294_v60  ;;  %v5197_v45 = vld [vmem:[#allocation7 + $0x210] sm:$0xf]  ;;  %v4942_v7 = vor.u32 %v6145_v44, %v4941_v40  ;;  %v5903_v18 = vld [vmem:[#allocation7 + $0x7b0] sm:$0xf0]  ;;  %v5138_v60 = vor.u32 %v6189_v9, %v5135_v10 }
 0x27f   :  { %3647 = vmatpush.bf16.msra.mxu2 %v5550_v15  ;;  %3660 = vmatpush.bf16.msra.mxu3 %v5806_v22  ;;  %v6209_v46 = vld [vmem:[#allocation7 + $0x22c] sm:$0xf0]  ;;  %v5103_v15 = vld [vmem:[#allocation7 + $0x170] sm:$0xf0]  ;;  %v5650_v22 = vor.u32 %v6317_v26, %v5647_v21  ;;  %v5906_v53 = vor.u32 %v6381_v51, %v5903_v18 }
 0x280   :  { %v5453_v52 = vld [vmem:[#allocation7 + $0x410] sm:$0xf]  ;;  %v5198_v62 = vor.u32 %v6209_v46, %v5197_v45  ;;  %v5583_v29 = vld [vmem:[#allocation7 + $0x530] sm:$0xf0] }
 0x281   :  { %v6273_v54 = vld [vmem:[#allocation7 + $0x42c] sm:$0xf0]  ;;  %v6365_v39 = vld [vmem:[#allocation7 + $0x714] sm:$0xf]  ;;  %v5586_v46 = vor.u32 %v6301_v1, %v5583_v29  ;;  %v6330_v1 = vld [vmem:[#allocation7 + $0x5f4] sm:$0xf0] }
 0x282   :  { %3622 = vmatpush.bf16.msra.mxu0 %v5006_v31  ;;  %3635 = vmatpush.bf16.msra.mxu1 %v5262_v32  ;;  %v5709_v56 = vld [vmem:[#allocation7 + $0x610] sm:$0xf]  ;;  %v5454_v2 = vor.u32 %v6273_v54, %v5453_v52  ;;  %v5871_v31 = vld [vmem:[#allocation7 + $0x770] sm:$0xf0]  ;;  %v5106_v32 = vor.u32 %v6181_v61, %v5103_v15  ;;  %v5941_v29 = vld [vmem:[#allocation7 + $0x7d8] sm:$0xf] }
 0x283   :  { %3648 = vmatpush.bf16.msra.mxu2 %v5518_v34  ;;  %3661 = vmatpush.bf16.msra.mxu3 %v5774_v35  ;;  %v6337_v43 = vld [vmem:[#allocation7 + $0x62c] sm:$0xf0]  ;;  %v5071_v34 = vld [vmem:[#allocation7 + $0x130] sm:$0xf0]  ;;  %v5618_v35 = vor.u32 %v6309_v13, %v5615_v27  ;;  %v5874_v3 = vor.u32 %v6373_v28, %v5871_v31 }
 0x284   :  { %v5710_v5 = vor.u32 %v6337_v43, %v5709_v56  ;;  %v5839_v40 = vld [vmem:[#allocation7 + $0x730] sm:$0xf0] }
 0x285   :  { %v6165_v44 = vld [vmem:[#allocation7 + $0xd4] sm:$0xf] }
 0x286   :  { %3623 = vmatpush.bf16.msra.mxu0 %v4974_v4  ;;  %3636 = vmatpush.bf16.msra.mxu1 %v5230_v37  ;;  %v5074_v4 = vor.u32 %v6173_v38, %v5071_v34  ;;  %v5330_v37 = vor.u32 %v6237_v36, %v5327_v55  ;;  %v5039_v45 = vld [vmem:[#allocation7 + $0xf0] sm:$0xf0]  ;;  %v6202_v38 = vld [vmem:[#allocation7 + $0x1f4] sm:$0xf0] }
 0x287   :  { %3649 = vmatpush.bf16.msra.mxu2 %v5486_v48  ;;  %3662 = vmatpush.bf16.msra.mxu3 %v5742_v50  ;;  %v5842_v48 = vor.u32 %v6365_v39, %v5839_v40  ;;  %v6229_v50 = vld [vmem:[#allocation7 + $0x2d4] sm:$0xf]  ;;  %v5042_v20 = vor.u32 %v6165_v44, %v5039_v45  ;;  %v5429_v34 = vld [vmem:[#allocation7 + $0x3d8] sm:$0xf] }
 0x288   :  { %v5295_v52 = vld [vmem:[#allocation7 + $0x2f0] sm:$0xf0]  ;;  %v6394_v39 = vld [vmem:[#allocation7 + $0x7f4] sm:$0xf0] }
 0x289   :  { %v6293_v54 = vld [vmem:[#allocation7 + $0x4d4] sm:$0xf]  ;;  %v5298_v57 = vor.u32 %v6229_v50, %v5295_v52  ;;  %v5141_v45 = vld [vmem:[#allocation7 + $0x198] sm:$0xf]  ;;  %v5942_v50 = vor.u32 %v6394_v39, %v5941_v29 }
 0x28a   :  { %3624 = vmatpush.bf16.msra.mxu0 %v4942_v7  ;;  %3637 = vmatpush.bf16.msra.mxu1 %v5198_v62  ;;  %v5551_v56 = vld [vmem:[#allocation7 + $0x4f0] sm:$0xf0]  ;;  %v5397_v52 = vld [vmem:[#allocation7 + $0x398] sm:$0xf] }
 0x28b   :  { %3650 = vmatpush.bf16.msra.mxu2 %v5454_v2  ;;  %3663 = vmatpush.bf16.msra.mxu3 %v5710_v5  ;;  %v6357_v43 = vld [vmem:[#allocation7 + $0x6d4] sm:$0xf]  ;;  %v5554_v7 = vor.u32 %v6293_v54, %v5551_v56  ;;  %v6258_v54 = vld [vmem:[#allocation7 + $0x3b4] sm:$0xf0] }
 0x28c   :  { %v5807_v14 = vld [vmem:[#allocation7 + $0x6f0] sm:$0xf0]  ;;  %v5653_v56 = vld [vmem:[#allocation7 + $0x598] sm:$0xf] }
 0x28d   :  { %3625 = vmatmul.bf16.vlgmr.msra.gmra.mxu0 %v6816_v16  ;;  %3638 = vmatmul.bf16.vlgmr.msra.gmra.mxu1 %v6818_v41  ;;  %v6157_v42 = vld [vmem:[#allocation7 + $0x94] sm:$0xf]  ;;  %v5810_v62 = vor.u32 %v6357_v43, %v5807_v14  ;;  %v6322_v43 = vld [vmem:[#allocation7 + $0x5b4] sm:$0xf0] }
 0x28e   :  { %3669 = vmatpush.bf16.msrb.mxu0 %v5170_v6  ;;  %3682 = vmatpush.bf16.msrb.mxu1 %v5426_v8  ;;  %v5007_v58 = vld [vmem:[#allocation7 + $0xb0] sm:$0xf0]  ;;  %v5909_v14 = vld [vmem:[#allocation7 + $0x798] sm:$0xf] }
 0x28f   :  { %3695 = vmatpush.bf16.msrb.mxu2 %v5682_v17  ;;  %3708 = vmatpush.bf16.msrb.mxu3 %v5938_v11  ;;  %v6221_v63 = vld [vmem:[#allocation7 + $0x294] sm:$0xf]  ;;  %v5010_v8 = vor.u32 %v6157_v42, %v5007_v58  ;;  %v5398_v42 = vor.u32 %v6258_v54, %v5397_v52  ;;  %v5109_v58 = vld [vmem:[#allocation7 + $0x158] sm:$0xf] }
 0x290   :  { %3651 = vmatmul.bf16.vlgmr.msra.gmra.mxu2 %v6820_v19  ;;  %3664 = vmatmul.bf16.vlgmr.msra.gmra.mxu3 %v6822_v59  ;;  %v6285_v0 = vld [vmem:[#allocation7 + $0x494] sm:$0xf]  ;;  %v5266_v9 = vor.u32 %v6221_v63, %v5263_v30  ;;  %v5365_v30 = vld [vmem:[#allocation7 + $0x358] sm:$0xf] }
 0x291   :  { %v5519_v2 = vld [vmem:[#allocation7 + $0x4b0] sm:$0xf0]  ;;  %v5525_v52 = vld [vmem:[#allocation7 + $0x498] sm:$0xf] }
 0x292   :  { %3670 = vmatpush.bf16.msrb.mxu0 %v5138_v60  ;;  %3683 = vmatpush.bf16.msrb.mxu1 %v5394_v49  ;;  %v6349_v5 = vld [vmem:[#allocation7 + $0x694] sm:$0xf]  ;;  %v5522_v11 = vor.u32 %v6285_v0, %v5519_v2  ;;  %v6250_v0 = vld [vmem:[#allocation7 + $0x374] sm:$0xf0] }
 0x293   :  { %3696 = vmatpush.bf16.msrb.mxu2 %v5650_v22  ;;  %3709 = vmatpush.bf16.msrb.mxu3 %v5906_v53  ;;  %v5775_v6 = vld [vmem:[#allocation7 + $0x6b0] sm:$0xf0]  ;;  %v5621_v2 = vld [vmem:[#allocation7 + $0x558] sm:$0xf] }
 0x294   :  { %v6149_v10 = vld [vmem:[#allocation7 + $0x54] sm:$0xf]  ;;  %v5778_v47 = vor.u32 %v6349_v5, %v5775_v6  ;;  %v6314_v5 = vld [vmem:[#allocation7 + $0x574] sm:$0xf0] }
 0x295   :  { %v4975_v17 = vld [vmem:[#allocation7 + $0x70] sm:$0xf0]  ;;  %v5877_v6 = vld [vmem:[#allocation7 + $0x758] sm:$0xf] }
 0x296   :  { %3671 = vmatpush.bf16.msrb.mxu0 %v5106_v32  ;;  %3684 = vmatpush.bf16.msrb.mxu1 %v5362_v33  ;;  %v6213_v12 = vld [vmem:[#allocation7 + $0x254] sm:$0xf]  ;;  %v4978_v61 = vor.u32 %v6149_v10, %v4975_v17  ;;  %v5173_v33 = vld [vmem:[#allocation7 + $0x1d8] sm:$0xf] }
 0x297   :  { %3697 = vmatpush.bf16.msrb.mxu2 %v5618_v35  ;;  %3710 = vmatpush.bf16.msrb.mxu3 %v5874_v3  ;;  %v5231_v26 = vld [vmem:[#allocation7 + $0x270] sm:$0xf0]  ;;  %v6266_v35 = vld [vmem:[#allocation7 + $0x3f4] sm:$0xf0] }
 0x298   :  { %v6277_v21 = vld [vmem:[#allocation7 + $0x454] sm:$0xf]  ;;  %v5234_v15 = vor.u32 %v6213_v12, %v5231_v26  ;;  %v5685_v3 = vld [vmem:[#allocation7 + $0x5d8] sm:$0xf]  ;;  %v5430_v44 = vor.u32 %v6266_v35, %v5429_v34 }
 0x299   :  { %v5487_v51 = vld [vmem:[#allocation7 + $0x470] sm:$0xf0]  ;;  %v5077_v12 = vld [vmem:[#allocation7 + $0x118] sm:$0xf] }
 0x29a   :  { %3672 = vmatpush.bf16.msrb.mxu0 %v5074_v4  ;;  %3685 = vmatpush.bf16.msrb.mxu1 %v5330_v37  ;;  %v6341_v18 = vld [vmem:[#allocation7 + $0x654] sm:$0xf]  ;;  %v5490_v25 = vor.u32 %v6277_v21, %v5487_v51  ;;  %v5174_v37 = vor.u32 %v6202_v38, %v5173_v33  ;;  %v6178_v26 = vld [vmem:[#allocation7 + $0x134] sm:$0xf0]  ;;  %v5622_v21 = vor.u32 %v6314_v5, %v5621_v2 }
 0x29b   :  { %3698 = vmatpush.bf16.msrb.mxu2 %v5586_v46  ;;  %3711 = vmatpush.bf16.msrb.mxu3 %v5842_v48  ;;  %v5743_v60 = vld [vmem:[#allocation7 + $0x670] sm:$0xf0]  ;;  %v6194_v46 = vld [vmem:[#allocation7 + $0x1b4] sm:$0xf0]  ;;  %v5686_v48 = vor.u32 %v6330_v1, %v5685_v3 }
 0x29c   :  { %v6141_v49 = vld [vmem:[#allocation7 + $0x14] sm:$0xf]  ;;  %v5746_v13 = vor.u32 %v6341_v18, %v5743_v60  ;;  %v5333_v18 = vld [vmem:[#allocation7 + $0x318] sm:$0xf] }
 0x29d   :  { %v4943_v22 = vld [vmem:[#allocation7 + $0x30] sm:$0xf0]  ;;  %v6242_v60 = vld [vmem:[#allocation7 + $0x334] sm:$0xf0] }
 0x29e   :  { %3673 = vmatpush.bf16.msrb.mxu0 %v5042_v20  ;;  %3686 = vmatpush.bf16.msrb.mxu1 %v5298_v57  ;;  %v6205_v53 = vld [vmem:[#allocation7 + $0x214] sm:$0xf]  ;;  %v4946_v36 = vor.u32 %v6141_v49, %v4943_v22  ;;  %v6386_v20 = vld [vmem:[#allocation7 + $0x7b4] sm:$0xf0]  ;;  %v5142_v57 = vor.u32 %v6194_v46, %v5141_v45 }
 0x29f   :  { %3699 = vmatpush.bf16.msrb.mxu2 %v5554_v7  ;;  %3712 = vmatpush.bf16.msrb.mxu3 %v5810_v62  ;;  %v5199_v23 = vld [vmem:[#allocation7 + $0x230] sm:$0xf0]  ;;  %v6186_v7 = vld [vmem:[#allocation7 + $0x174] sm:$0xf0]  ;;  %v5654_v62 = vor.u32 %v6322_v43, %v5653_v56  ;;  %v5910_v63 = vor.u32 %v6386_v20, %v5909_v14 }
 0x2a0   :  { %v6269_v27 = vld [vmem:[#allocation7 + $0x414] sm:$0xf]  ;;  %v5202_v55 = vor.u32 %v6205_v53, %v5199_v23  ;;  %v5110_v17 = vor.u32 %v6186_v7, %v5109_v58  ;;  %v5589_v49 = vld [vmem:[#allocation7 + $0x518] sm:$0xf]  ;;  %v5078_v53 = vor.u32 %v6178_v26, %v5077_v12  ;;  %v5334_v23 = vor.u32 %v6242_v60, %v5333_v18 }
 0x2a1   :  { %v5455_v28 = vld [vmem:[#allocation7 + $0x430] sm:$0xf0]  ;;  %v6370_v22 = vld [vmem:[#allocation7 + $0x734] sm:$0xf0] }
 0x2a2   :  { %3674 = vmatpush.bf16.msrb.mxu0 %v5010_v8  ;;  %3687 = vmatpush.bf16.msrb.mxu1 %v5266_v9  ;;  %v6333_v31 = vld [vmem:[#allocation7 + $0x614] sm:$0xf]  ;;  %v5458_v40 = vor.u32 %v6269_v27, %v5455_v28  ;;  %v6378_v8 = vld [vmem:[#allocation7 + $0x774] sm:$0xf0] }
 0x2a3   :  { %3700 = vmatpush.bf16.msrb.mxu2 %v5522_v11  ;;  %3713 = vmatpush.bf16.msrb.mxu3 %v5778_v47  ;;  %v5711_v32 = vld [vmem:[#allocation7 + $0x630] sm:$0xf0]  ;;  %v5366_v11 = vor.u32 %v6250_v0, %v5365_v30  ;;  %v5878_v51 = vor.u32 %v6378_v8, %v5877_v6  ;;  %v5557_v33 = vld [vmem:[#allocation7 + $0x4d8] sm:$0xf] }
 0x2a4   :  { %v5714_v4 = vor.u32 %v6333_v31, %v5711_v32  ;;  %v5301_v31 = vld [vmem:[#allocation7 + $0x2d8] sm:$0xf] }
 0x2a5   :  { %v6234_v32 = vld [vmem:[#allocation7 + $0x2f4] sm:$0xf0] }
 0x2a6   :  { %3675 = vmatpush.bf16.msrb.mxu0 %v4978_v61  ;;  %3688 = vmatpush.bf16.msrb.mxu1 %v5234_v15  ;;  %v6306_v61 = vld [vmem:[#allocation7 + $0x534] sm:$0xf0] }
 0x2a7   :  { %3701 = vmatpush.bf16.msrb.mxu2 %v5490_v25  ;;  %3714 = vmatpush.bf16.msrb.mxu3 %v5746_v13  ;;  %v5845_v15 = vld [vmem:[#allocation7 + $0x718] sm:$0xf]  ;;  %v5590_v27 = vor.u32 %v6306_v61, %v5589_v49 }
 0x2a8   :  { %v5045_v25 = vld [vmem:[#allocation7 + $0xd8] sm:$0xf]  ;;  %v5846_v28 = vor.u32 %v6370_v22, %v5845_v15 }
 0x2a9   :  { %v3418_v9 = vpop.f32.mrf.mxu0  ;;  %v3431_v10 = vpop.f32.mrf.mxu1  ;;  %v6170_v13 = vld [vmem:[#allocation7 + $0xf4] sm:$0xf0] }
 0x2aa   :  { %3676 = vmatpush.bf16.msrb.mxu0 %v4946_v36  ;;  %3689 = vmatpush.bf16.msrb.mxu1 %v5202_v55  ;;  %v3432_v47 = vadd.f32 %v3431_v10, %v3418_v9  ;;  %v6298_v35 = vld [vmem:[#allocation7 + $0x4f4] sm:$0xf0]  ;;  %v5046_v39 = vor.u32 %v6170_v13, %v5045_v25 }
 0x2ab   :  { %3702 = vmatpush.bf16.msrb.mxu2 %v5458_v40  ;;  %3715 = vmatpush.bf16.msrb.mxu3 %v5714_v4  ;;  %v5813_v3 = vld [vmem:[#allocation7 + $0x6d8] sm:$0xf]  ;;  %v5302_v40 = vor.u32 %v6234_v32, %v5301_v31  ;;  %v5558_v45 = vor.u32 %v6298_v35, %v5557_v33  ;;  %v6262_v31 = vld [vmem:[#allocation7 + $0x3dc] sm:$0xf] }
 0x2ac   :  { %v6362_v36 = vld [vmem:[#allocation7 + $0x6f4] sm:$0xf0]  ;;  %v5431_v33 = vld [vmem:[#allocation7 + $0x3f8] sm:$0xf0] }
 0x2ad   :  { %3677 = vmatmul.bf16.vlgmr.msrb.gmra.mxu0 %v6816_v16  ;;  %3690 = vmatmul.bf16.vlgmr.msrb.gmra.mxu1 %v6818_v41  ;;  %v5013_v4 = vld [vmem:[#allocation7 + $0x98] sm:$0xf]  ;;  %v5814_v46 = vor.u32 %v6362_v36, %v5813_v3  ;;  %v5687_v3 = vld [vmem:[#allocation7 + $0x5f8] sm:$0xf0] }
 0x2ae   :  { %3721 = vmatpush.bf16.msra.mxu0 %v5174_v37  ;;  %3734 = vmatpush.bf16.msra.mxu1 %v5430_v44  ;;  %v6162_v37 = vld [vmem:[#allocation7 + $0xb4] sm:$0xf0]  ;;  %v6390_v36 = vld [vmem:[#allocation7 + $0x7dc] sm:$0xf] }
 0x2af   :  { %3747 = vmatpush.bf16.msra.mxu2 %v5686_v48  ;;  %3760 = vmatpush.bf16.msra.mxu3 %v5942_v50  ;;  %v5269_v48 = vld [vmem:[#allocation7 + $0x298] sm:$0xf]  ;;  %v5014_v20 = vor.u32 %v6162_v37, %v5013_v4  ;;  %v5434_v4 = vor.u32 %v6262_v31, %v5431_v33  ;;  %v5335_v31 = vld [vmem:[#allocation7 + $0x338] sm:$0xf0] }
 0x2b0   :  { %3703 = vmatmul.bf16.vlgmr.msrb.gmra.mxu2 %v6820_v19  ;;  %3716 = vmatmul.bf16.vlgmr.msrb.gmra.mxu3 %v6822_v59  ;;  %v3444_v38 = vpop.f32.mrf.mxu2  ;;  %v3457_v34 = vpop.f32.mrf.mxu3  ;;  %v6226_v50 = vld [vmem:[#allocation7 + $0x2b4] sm:$0xf0]  ;;  %v5591_v33 = vld [vmem:[#allocation7 + $0x538] sm:$0xf0] }
 0x2b1   :  { %v3445_v55 = vadd.f32 %v3444_v38, %v3432_v47  ;;  %v3420_v1 = vpop.f32.mrf.mxu0  ;;  %v3433_v29 = vpop.f32.mrf.mxu1  ;;  %v6290_v54 = vld [vmem:[#allocation7 + $0x4b4] sm:$0xf0]  ;;  %v6326_v38 = vld [vmem:[#allocation7 + $0x5dc] sm:$0xf] }
 0x2b2   :  { %3722 = vmatpush.bf16.msra.mxu0 %v5142_v57  ;;  %3735 = vmatpush.bf16.msra.mxu1 %v5398_v42  ;;  %v5781_v56 = vld [vmem:[#allocation7 + $0x698] sm:$0xf]  ;;  %v5270_v57 = vor.u32 %v6226_v50, %v5269_v48  ;;  %v5143_v48 = vld [vmem:[#allocation7 + $0x1b8] sm:$0xf0] }
 0x2b3   :  { %3748 = vmatpush.bf16.msra.mxu2 %v5654_v62  ;;  %3761 = vmatpush.bf16.msra.mxu3 %v5910_v63  ;;  %v6848_v44 = vadd.f32 %v3457_v34, %v3445_v55  ;;  %v6354_v43 = vld [vmem:[#allocation7 + $0x6b4] sm:$0xf0]  ;;  %v5526_v62 = vor.u32 %v6290_v54, %v5525_v52  ;;  %v5943_v55 = vld [vmem:[#allocation7 + $0x7f8] sm:$0xf0]  ;;  %v5690_v52 = vor.u32 %v6326_v38, %v5687_v3 }
 0x2b4   :  { %v4981_v42 = vld [vmem:[#allocation7 + $0x58] sm:$0xf]  ;;  %v5782_v63 = vor.u32 %v6354_v43, %v5781_v56  ;;  %v5946_v54 = vor.u32 %v6390_v36, %v5943_v55  ;;  %v6366_v38 = vld [vmem:[#allocation7 + $0x71c] sm:$0xf] }
 0x2b5   :  { %v3827_v14 = vrot.slane %v6848_v44, 4  ;;  %v6154_v58 = vld [vmem:[#allocation7 + $0x74] sm:$0xf0] }
 0x2b6   :  { %3723 = vmatpush.bf16.msra.mxu0 %v5110_v17  ;;  %3736 = vmatpush.bf16.msra.mxu1 %v5366_v11  ;;  %v5237_v30 = vld [vmem:[#allocation7 + $0x258] sm:$0xf] }
 0x2b7   :  { %3749 = vmatpush.bf16.msra.mxu2 %v5622_v21  ;;  %3762 = vmatpush.bf16.msra.mxu3 %v5878_v51  ;;  %v3828_v7 = vadd.f32 %v3827_v14, %v6848_v44  ;;  %v6218_v0 = vld [vmem:[#allocation7 + $0x274] sm:$0xf0]  ;;  %v4982_v21 = vor.u32 %v6154_v58, %v4981_v42  ;;  %v6318_v42 = vld [vmem:[#allocation7 + $0x59c] sm:$0xf] }
 0x2b8   :  { %v5493_v2 = vld [vmem:[#allocation7 + $0x458] sm:$0xf]  ;;  %v3446_v5 = vpop.f32.mrf.mxu2  ;;  %v3459_v6 = vpop.f32.mrf.mxu3  ;;  %v5238_v51 = vor.u32 %v6218_v0, %v5237_v30  ;;  %v5655_v58 = vld [vmem:[#allocation7 + $0x5b8] sm:$0xf0] }
 0x2b9   :  { %v6282_v8 = vld [vmem:[#allocation7 + $0x474] sm:$0xf0]  ;;  %v3829_v17 = vrot.slane %v3828_v7, 2  ;;  %v3470_v11 = vpop.f32.mrf.mxu0  ;;  %v3483_v47 = vpop.f32.mrf.mxu1  ;;  %v6182_v5 = vld [vmem:[#allocation7 + $0x15c] sm:$0xf] }
 0x2ba   :  { %3724 = vmatpush.bf16.msra.mxu0 %v5078_v53  ;;  %3737 = vmatpush.bf16.msra.mxu1 %v5334_v23  ;;  %v5749_v9 = vld [vmem:[#allocation7 + $0x658] sm:$0xf]  ;;  %v3484_v18 = vadd.f32 %v3483_v47, %v3470_v11  ;;  %v5494_v22 = vor.u32 %v6282_v8, %v5493_v2  ;;  %v5111_v6 = vld [vmem:[#allocation7 + $0x178] sm:$0xf0] }
 0x2bb   :  { %3750 = vmatpush.bf16.msra.mxu2 %v5590_v27  ;;  %3763 = vmatpush.bf16.msra.mxu3 %v5846_v28  ;;  %v6346_v10 = vld [vmem:[#allocation7 + $0x674] sm:$0xf0]  ;;  %v3830_v15 = vadd.f32 %v3829_v17, %v3828_v7  ;;  %v6198_v27 = vld [vmem:[#allocation7 + $0x1dc] sm:$0xf] }
 0x2bc   :  { %v4949_v12 = vld [vmem:[#allocation7 + $0x18] sm:$0xf]  ;;  %v5750_v53 = vor.u32 %v6346_v10, %v5749_v9  ;;  %v5175_v28 = vld [vmem:[#allocation7 + $0x1f8] sm:$0xf0] }
 0x2bd   :  { %v6146_v26 = vld [vmem:[#allocation7 + $0x34] sm:$0xf0]  ;;  %v3831_v32 = vrot.slane %v3830_v15, 1  ;;  %v6382_v7 = vld [vmem:[#allocation7 + $0x79c] sm:$0xf] }
 0x2be   :  { %3725 = vmatpush.bf16.msra.mxu0 %v5046_v39  ;;  %3738 = vmatpush.bf16.msra.mxu1 %v5302_v40  ;;  %v5205_v60 = vld [vmem:[#allocation7 + $0x218] sm:$0xf]  ;;  %v4950_v34 = vor.u32 %v6146_v26, %v4949_v12  ;;  %v5178_v40 = vor.u32 %v6198_v27, %v5175_v28  ;;  %v6246_v8 = vld [vmem:[#allocation7 + $0x35c] sm:$0xf] }
 0x2bf   :  { %3751 = vmatpush.bf16.msra.mxu2 %v5558_v45  ;;  %3764 = vmatpush.bf16.msra.mxu3 %v5814_v46  ;;  %v6210_v49 = vld [vmem:[#allocation7 + $0x234] sm:$0xf0]  ;;  %v3832_v1 = vadd.f32 %v3831_v32, %v3830_v15  ;;  %v6190_v46 = vld [vmem:[#allocation7 + $0x19c] sm:$0xf] }
 0x2c0   :  { %v5461_v61 = vld [vmem:[#allocation7 + $0x418] sm:$0xf]  ;;  %v5206_v35 = vor.u32 %v6210_v49, %v5205_v60  ;;  %v3496_v37 = vpop.f32.mrf.mxu2  ;;  %v3509_v45 = vpop.f32.mrf.mxu3  ;;  %v5146_v0 = vor.u32 %v6190_v46, %v5143_v48  ;;  %v5367_v11 = vld [vmem:[#allocation7 + $0x378] sm:$0xf0]  ;;  %v5114_v60 = vor.u32 %v6182_v5, %v5111_v6 }
 0x2c1   :  { %v6274_v23 = vld [vmem:[#allocation7 + $0x434] sm:$0xf0]  ;;  %v3875_v50 = vmul.f32 %v3832_v1, %v6631_v24  ;;  %v3497_v56 = vadd.f32 %v3496_v37, %v3484_v18  ;;  %v3472_v43 = vpop.f32.mrf.mxu0  ;;  %v3485_v14 = vpop.f32.mrf.mxu1  ;;  %v6310_v47 = vld [vmem:[#allocation7 + $0x55c] sm:$0xf]  ;;  %v5370_v49 = vor.u32 %v6246_v8, %v5367_v11 }
 0x2c2   :  { %3726 = vmatpush.bf16.msra.mxu0 %v5014_v20  ;;  %3739 = vmatpush.bf16.msra.mxu1 %v5270_v57  ;;  %v5717_v25 = vld [vmem:[#allocation7 + $0x618] sm:$0xf]  ;;  %v5462_v29 = vor.u32 %v6274_v23, %v5461_v61  ;;  %v6254_v20 = vld [vmem:[#allocation7 + $0x39c] sm:$0xf] }
 0x2c3   :  { %3752 = vmatpush.bf16.msra.mxu2 %v5526_v62  ;;  %3765 = vmatpush.bf16.msra.mxu3 %v5782_v63  ;;  %v6338_v13 = vld [vmem:[#allocation7 + $0x634] sm:$0xf0]  ;;  %v5399_v57 = vld [vmem:[#allocation7 + $0x3b8] sm:$0xf0]  ;;  %v6854_v63 = vsub.f32 %v6848_v44, %v3875_v50  ;;  %v6856_v30 = vadd.f32 %v3509_v45, %v3497_v56  ;;  %v5658_v44 = vor.u32 %v6318_v42, %v5655_v58 }
 0x2c4   :  { %v5718_v39 = vor.u32 %v6338_v13, %v5717_v25  ;;  %v5911_v62 = vld [vmem:[#allocation7 + $0x7b8] sm:$0xf0]  ;;  %v5402_v2 = vor.u32 %v6254_v20, %v5399_v57 }
 0x2c5   :  { %v3891_v9 = vmul.f32 %v6854_v63, %v6854_v63  ;;  %v3833_v10 = vrot.slane %v6856_v30, 4  ;;  %v5914_v17 = vor.u32 %v6382_v7, %v5911_v62  ;;  %v5623_v12 = vld [vmem:[#allocation7 + $0x578] sm:$0xf0] }
 0x2c6   :  { %3727 = vmatpush.bf16.msra.mxu0 %v4982_v21  ;;  %3740 = vmatpush.bf16.msra.mxu1 %v5238_v51  ;;  %v6374_v26 = vld [vmem:[#allocation7 + $0x75c] sm:$0xf]  ;;  %v5626_v27 = vor.u32 %v6310_v47, %v5623_v12 }
 0x2c7   :  { %3753 = vmatpush.bf16.msra.mxu2 %v5494_v22  ;;  %3766 = vmatpush.bf16.msra.mxu3 %v5750_v53  ;;  %v5879_v21 = vld [vmem:[#allocation7 + $0x778] sm:$0xf0]  ;;  %v3899_v51 = vrot.slane %v3891_v9, 4  ;;  %v3834_v18 = vadd.f32 %v3833_v10, %v6856_v30 }
 0x2c8   :  { %v3498_v61 = vpop.f32.mrf.mxu2  ;;  %v3511_v15 = vpop.f32.mrf.mxu3  ;;  %v6174_v22 = vld [vmem:[#allocation7 + $0x11c] sm:$0xf]  ;;  %v5882_v28 = vor.u32 %v6374_v26, %v5879_v21 }
 0x2c9   :  { %v5079_v53 = vld [vmem:[#allocation7 + $0x138] sm:$0xf0]  ;;  %v3900_v25 = vadd.f32 %v3899_v51, %v3891_v9  ;;  %v3835_v13 = vrot.slane %v3834_v18, 2 }
 0x2ca   :  { %3728 = vmatpush.bf16.msra.mxu0 %v4950_v34  ;;  %3741 = vmatpush.bf16.msra.mxu1 %v5206_v35  ;;  %v6238_v23 = vld [vmem:[#allocation7 + $0x31c] sm:$0xf]  ;;  %v3522_v36 = vpop.f32.mrf.mxu0  ;;  %v3535_v55 = vpop.f32.mrf.mxu1 }
 0x2cb   :  { %3754 = vmatpush.bf16.msra.mxu2 %v5462_v29  ;;  %3767 = vmatpush.bf16.msra.mxu3 %v5718_v39  ;;  %v6302_v32 = vld [vmem:[#allocation7 + $0x51c] sm:$0xf]  ;;  %v3901_v35 = vrot.slane %v3900_v25, 2  ;;  %v3836_v3 = vadd.f32 %v3835_v13, %v3834_v18  ;;  %v3536_v29 = vadd.f32 %v3535_v55, %v3522_v36  ;;  %v5082_v39 = vor.u32 %v6174_v22, %v5079_v53 }
 0x2cc   :  { %v5847_v34 = vld [vmem:[#allocation7 + $0x738] sm:$0xf0]  ;;  %v5594_v50 = vor.u32 %v6302_v32, %v5591_v33 }
 0x2cd   :  { %3729 = vmatmul.bf16.vlgmr.msra.gmra.mxu0 %v6816_v16  ;;  %3742 = vmatmul.bf16.vlgmr.msra.gmra.mxu1 %v6818_v41  ;;  %v6166_v1 = vld [vmem:[#allocation7 + $0xdc] sm:$0xf]  ;;  %v3902_v46 = vadd.f32 %v3901_v35, %v3900_v25  ;;  %v3837_v48 = vrot.slane %v3836_v3, 1 }
 0x2ce   :  { %3773 = vmatpush.bf16.msrb.mxu0 %v5178_v40  ;;  %3786 = vmatpush.bf16.msrb.mxu1 %v5434_v4  ;;  %v5338_v40 = vor.u32 %v6238_v23, %v5335_v31  ;;  %v5047_v4 = vld [vmem:[#allocation7 + $0xf8] sm:$0xf0] }
 0x2cf   :  { %3799 = vmatpush.bf16.msrb.mxu2 %v5690_v52  ;;  %3812 = vmatpush.bf16.msrb.mxu3 %v5946_v54  ;;  %v6230_v37 = vld [vmem:[#allocation7 + $0x2dc] sm:$0xf]  ;;  %v5850_v52 = vor.u32 %v6366_v38, %v5847_v34  ;;  %v3903_v20 = vrot.slane %v3902_v46, 1  ;;  %v3838_v57 = vadd.f32 %v3837_v48, %v3836_v3  ;;  %v5050_v7 = vor.u32 %v6166_v1, %v5047_v4 }
 0x2d0   :  { %3755 = vmatmul.bf16.vlgmr.msra.gmra.mxu2 %v6820_v19  ;;  %3768 = vmatmul.bf16.vlgmr.msra.gmra.mxu3 %v6822_v59  ;;  %v5303_v45 = vld [vmem:[#allocation7 + $0x2f8] sm:$0xf0] }
 0x2d1   :  { %v6294_v54 = vld [vmem:[#allocation7 + $0x4dc] sm:$0xf]  ;;  %v5306_v62 = vor.u32 %v6230_v37, %v5303_v45  ;;  %v3904_v8 = vadd.f32 %v3903_v20, %v3902_v46  ;;  %v3876_v9 = vmul.f32 %v3838_v57, %v6631_v24 }
 0x2d2   :  { %3774 = vmatpush.bf16.msrb.mxu0 %v5146_v0  ;;  %3787 = vmatpush.bf16.msrb.mxu1 %v5402_v2  ;;  %v5559_v56 = vld [vmem:[#allocation7 + $0x4f8] sm:$0xf0]  ;;  %v3524_v51 = vpop.f32.mrf.mxu0  ;;  %v3537_v18 = vpop.f32.mrf.mxu1 }
 0x2d3   :  { %3800 = vmatpush.bf16.msrb.mxu2 %v5658_v44  ;;  %3813 = vmatpush.bf16.msrb.mxu3 %v5914_v17  ;;  %v6358_v43 = vld [vmem:[#allocation7 + $0x6dc] sm:$0xf]  ;;  %v5562_v0 = vor.u32 %v6294_v54, %v5559_v56  ;;  %v3548_v47 = vpop.f32.mrf.mxu2  ;;  %v3561_v12 = vpop.f32.mrf.mxu3  ;;  %v6868_v26 = vsub.f32 %v6856_v30, %v3876_v9  ;;  %v3947_v25 = vmul.f32 %v3904_v8, %v6631_v24 }
 0x2d4   :  { %v5815_v14 = vld [vmem:[#allocation7 + $0x6f8] sm:$0xf0]  ;;  %v3549_v21 = vadd.f32 %v3548_v47, %v3536_v29 }
 0x2d5   :  { %v6158_v42 = vld [vmem:[#allocation7 + $0x9c] sm:$0xf]  ;;  %v5818_v10 = vor.u32 %v6358_v43, %v5815_v14  ;;  %v3892_v13 = vmul.f32 %v6868_v26, %v6868_v26 }
 0x2d6   :  { %3775 = vmatpush.bf16.msrb.mxu0 %v5114_v60  ;;  %3788 = vmatpush.bf16.msrb.mxu1 %v5370_v49  ;;  %v5015_v58 = vld [vmem:[#allocation7 + $0xb8] sm:$0xf0]  ;;  %v3562_v30 = vadd.f32 %v3561_v12, %v3549_v21 }
 0x2d7   :  { %3801 = vmatpush.bf16.msrb.mxu2 %v5626_v27  ;;  %3814 = vmatpush.bf16.msrb.mxu3 %v5882_v28  ;;  %v6222_v2 = vld [vmem:[#allocation7 + $0x29c] sm:$0xf]  ;;  %v5018_v60 = vor.u32 %v6158_v42, %v5015_v58  ;;  %v3905_v38 = vrot.slane %v3892_v13, 4 }
 0x2d8   :  { %v5271_v5 = vld [vmem:[#allocation7 + $0x2b8] sm:$0xf0]  ;;  %v3839_v34 = vrot.slane %v3562_v30, 4 }
 0x2d9   :  { %v6286_v6 = vld [vmem:[#allocation7 + $0x49c] sm:$0xf]  ;;  %v5274_v49 = vor.u32 %v6222_v2, %v5271_v5  ;;  %v3906_v4 = vadd.f32 %v3905_v38, %v3892_v13 }
 0x2da   :  { %3776 = vmatpush.bf16.msrb.mxu0 %v5082_v39  ;;  %3789 = vmatpush.bf16.msrb.mxu1 %v5338_v40  ;;  %v5527_v44 = vld [vmem:[#allocation7 + $0x4b8] sm:$0xf0]  ;;  %v6873_v40 = vadd.f32 1e-05, %v3947_v25  ;;  %v3840_v37 = vadd.f32 %v3839_v34, %v3562_v30 }
 0x2db   :  { %3802 = vmatpush.bf16.msrb.mxu2 %v5594_v50  ;;  %3815 = vmatpush.bf16.msrb.mxu3 %v5850_v52  ;;  %v6350_v17 = vld [vmem:[#allocation7 + $0x69c] sm:$0xf]  ;;  %v5530_v61 = vor.u32 %v6286_v6, %v5527_v44  ;;  %v3550_v50 = vpop.f32.mrf.mxu2  ;;  %v3563_v52 = vpop.f32.mrf.mxu3  ;;  %v3907_v43 = vrot.slane %v3906_v4, 2 }
 0x2dc   :  { %v5783_v11 = vld [vmem:[#allocation7 + $0x6b8] sm:$0xf0]  ;;  %v3841_v14 = vrot.slane %v3840_v37, 2  ;;  %6422 = vrsqrt.f32 %v6873_v40  ;;  %vm3969_vm3 = vweird.f32 %v6873_v40 }
 0x2dd   :  { %v5786_v15 = vor.u32 %v6350_v17, %v5783_v11  ;;  %v6150_v22 = vld [vmem:[#allocation7 + $0x5c] sm:$0xf]  ;;  %v3908_v58 = vadd.f32 %v3907_v43, %v3906_v4 }
 0x2de   :  { %3777 = vmatpush.bf16.msrb.mxu0 %v5050_v7  ;;  %3790 = vmatpush.bf16.msrb.mxu1 %v5306_v62  ;;  %v4983_v53 = vld [vmem:[#allocation7 + $0x78] sm:$0xf0]  ;;  %v3842_v7 = vadd.f32 %v3841_v14, %v3840_v37 }
 0x2df   :  { %v6214_v23 = vld [vmem:[#allocation7 + $0x25c] sm:$0xf]  ;;  %3803 = vmatpush.bf16.msrb.mxu2 %v5562_v0  ;;  %3816 = vmatpush.bf16.msrb.mxu3 %v5818_v10  ;;  %v4986_v3 = vor.u32 %v6150_v22, %v4983_v53  ;;  %v3909_v0 = vrot.slane %v3908_v58, 1 }
 0x2e0   :  { %v5239_v27 = vld [vmem:[#allocation7 + $0x278] sm:$0xf0]  ;;  %v3843_v2 = vrot.slane %v3842_v7, 1 }
 0x2e1   :  { %v6278_v28 = vld [vmem:[#allocation7 + $0x45c] sm:$0xf]  ;;  %v5242_v36 = vor.u32 %v6214_v23, %v5239_v27  ;;  %v3910_v5 = vadd.f32 %v3909_v0, %v3908_v58 }
 0x2e2   :  { %v5495_v31 = vld [vmem:[#allocation7 + $0x478] sm:$0xf0]  ;;  %3778 = vmatpush.bf16.msrb.mxu0 %v5018_v60  ;;  %3791 = vmatpush.bf16.msrb.mxu1 %v5274_v49  ;;  %v3844_v6 = vadd.f32 %v3843_v2, %v3842_v7  ;;  %v6423_v8 = vpop.eup %6422 }
 0x2e3   :  { %v6342_v32 = vld [vmem:[#allocation7 + $0x65c] sm:$0xf]  ;;  %v5498_v55 = vor.u32 %v6278_v28, %v5495_v31  ;;  %3804 = vmatpush.bf16.msrb.mxu2 %v5530_v61  ;;  %3817 = vmatpush.bf16.msrb.mxu3 %v5786_v15  ;;  %v3948_v9 = vmul.f32 %v3910_v5, %v6631_v24  ;;  %v3964_v11 = vmul.f32 %v6423_v8, %v6873_v40  ;;  %vm3970_vm0 = vweird.f32 %v6423_v8 }
 0x2e4   :  { %v5751_v33 = vld [vmem:[#allocation7 + $0x678] sm:$0xf0]  ;;  %v3877_v10 = vmul.f32 %v3844_v6, %v6631_v24  ;;  %vm3971_vm4 = vmor %vm3969_vm3, %vm3970_vm0 }
 0x2e5   :  { %v6142_v35 = vld [vmem:[#allocation7 + $0x1c] sm:$0xf]  ;;  %v5754_v45 = vor.u32 %v6342_v32, %v5751_v33  ;;  %v3956_v44 = vadd.f32 1e-05, %v3948_v9  ;;  %v3965_v18 = vmul.f32 %v6423_v8, %v3964_v11 }
 0x2e6   :  { %v4951_v1 = vld [vmem:[#allocation7 + $0x38] sm:$0xf0]  ;;  %3779 = vmatpush.bf16.msrb.mxu0 %v4986_v3  ;;  %3792 = vmatpush.bf16.msrb.mxu1 %v5242_v36  ;;  %v6882_v17 = vsub.f32 %v3562_v30, %v3877_v10 }
 0x2e7   :  { %v6206_v29 = vld [vmem:[#allocation7 + $0x21c] sm:$0xf]  ;;  %v4954_v20 = vor.u32 %v6142_v35, %v4951_v1  ;;  %3805 = vmatpush.bf16.msrb.mxu2 %v5498_v55  ;;  %3818 = vmatpush.bf16.msrb.mxu3 %v5754_v45  ;;  %6424 = vrsqrt.f32 %v3956_v44  ;;  %v3966_v49 = vmul.f32 0.5, %v3965_v18  ;;  %vm3979_vm1 = vweird.f32 %v3956_v44 }
 0x2e8   :  { %v5207_v39 = vld [vmem:[#allocation7 + $0x238] sm:$0xf0]  ;;  %v3893_v47 = vmul.f32 %v6882_v17, %v6882_v17 }
 0x2e9   :  { %v6270_v46 = vld [vmem:[#allocation7 + $0x41c] sm:$0xf]  ;;  %v5210_v57 = vor.u32 %v6206_v29, %v5207_v39  ;;  %v3967_v13 = vsub.f32 1.5, %v3966_v49 }
 0x2ea   :  { %v5463_v48 = vld [vmem:[#allocation7 + $0x438] sm:$0xf0]  ;;  %3780 = vmatpush.bf16.msrb.mxu0 %v4954_v20  ;;  %v3911_v12 = vrot.slane %v3893_v47, 4  ;;  %v3574_v21 = vpop.f32.mrf.mxu0  ;;  %v3587_v51 = vpop.f32.mrf.mxu1 }
 0x2eb   :  { %v6334_v54 = vld [vmem:[#allocation7 + $0x61c] sm:$0xf]  ;;  %v5466_v42 = vor.u32 %v6270_v46, %v5463_v48  ;;  %3793 = vmatpush.bf16.msrb.mxu1 %v5210_v57  ;;  %v3968_v33 = vmul.f32 %v6423_v8, %v3967_v13 }
 0x2ec   :  { %v5719_v56 = vld [vmem:[#allocation7 + $0x638] sm:$0xf0] }
 0x2ed   :  { %v5722_v62 = vor.u32 %v6334_v54, %v5719_v56  ;;  %3806 = vmatpush.bf16.msrb.mxu2 %v5466_v42  ;;  %3781 = vmatmul.bf16.vlgmr.msrb.gmra.mxu0 %v6816_v16  ;;  %v3588_v16 = vadd.f32 %v3587_v51, %v3574_v21  ;;  %v6425_v60 = vpop.eup %6424  ;;  %v3972_v39 = vsel %vm3971_vm4, %v6423_v8, %v3968_v33 }
 0x2ee   :  { %3794 = vmatmul.bf16.vlgmr.msrb.gmra.mxu1 %v6818_v41  ;;  %v3912_v41 = vadd.f32 %v3911_v12, %v3893_v47  ;;  %vm3980_vm14 = vweird.f32 %v6425_v60 }
 0x2ef   :  { %3819 = vmatpush.bf16.msrb.mxu3 %v5722_v62  ;;  %vm3981_vm2 = vmor %vm3979_vm1, %vm3980_vm14  ;;  %vm4061_vm1 = vcmask 1044484  }
 0x2f0   :  { %3807 = vmatmul.bf16.vlgmr.msrb.gmra.mxu2 %v6820_v19  ;;  %v3974_v19 = vmul.f32 %v6425_v60, %v3956_v44  ;;  %v3913_v22 = vrot.slane %v3912_v41, 2 }
 0x2f2   :  { %3820 = vmatmul.bf16.vlgmr.msrb.gmra.mxu3 %v6822_v59  ;;  %v3975_v61 = vmul.f32 %v6425_v60, %v3974_v19  ;;  %v3576_v23 = vpop.f32.mrf.mxu0  ;;  %v3589_v25 = vpop.f32.mrf.mxu1  ;;  %v3914_v31 = vadd.f32 %v3913_v22, %v3912_v41 }
 0x2f3   :  { %v3600_v59 = vpop.f32.mrf.mxu2  ;;  %v3613_v15 = vpop.f32.mrf.mxu3 }
 0x2f4   :  { %v3601_v53 = vadd.f32 %v3600_v59, %v3588_v16  ;;  %v3976_v30 = vmul.f32 0.5, %v3975_v61  ;;  %v3915_v1 = vrot.slane %v3914_v31, 1 }
 0x2f6   :  { %v3614_v27 = vadd.f32 %v3613_v15, %v3601_v53  ;;  %v3977_v28 = vsub.f32 1.5, %v3976_v30  ;;  %v3916_v45 = vadd.f32 %v3915_v1, %v3914_v31 }
 0x2f8   :  { %v3845_v32 = vrot.slane %v3614_v27, 4  ;;  %v3978_v38 = vmul.f32 %v6425_v60, %v3977_v28  ;;  %v3949_v50 = vmul.f32 %v3916_v45, %v6631_v24 }
 0x2fa   :  { %v3846_v34 = vadd.f32 %v3845_v32, %v3614_v27  ;;  %v3982_v35 = vsel %vm3981_vm2, %v6425_v60, %v3978_v38  ;;  %v3957_v54 = vadd.f32 1e-05, %v3949_v50 }
 0x2fb   :  { %v3602_v3 = vpop.f32.mrf.mxu2  ;;  %v3615_v36 = vpop.f32.mrf.mxu3  ;;  %v4051_v55 = vrot.slane %v3982_v35, 7 }
 0x2fc   :  { %v3847_v29 = vrot.slane %v3846_v34, 2  ;;  %6426 = vrsqrt.f32 %v3957_v54  ;;  %vm3989_vm5 = vweird.f32 %v3957_v54 }
 0x2fd   :  { %v6889_v4 = vsel %vm699_vm12, %v3972_v39, %v4051_v55 }
 0x2fe   :  { %v3848_v37 = vadd.f32 %v3847_v29, %v3846_v34 }
 0x300   :  { %v3849_v46 = vrot.slane %v3848_v37, 1 }
 0x302   :  { %v3850_v48 = vadd.f32 %v3849_v46, %v3848_v37  ;;  %v6427_v2 = vpop.eup %6426 }
 0x303   :  { %v3984_v11 = vmul.f32 %v6427_v2, %v3957_v54  ;;  %vm3990_vm12 = vweird.f32 %v6427_v2 }
 0x304   :  { %v3878_v52 = vmul.f32 %v3850_v48, %v6631_v24  ;;  %vm3991_vm7 = vmor %vm3989_vm5, %vm3990_vm12 }
 0x305   :  { %v3985_v18 = vmul.f32 %v6427_v2, %v3984_v11 }
 0x306   :  { %v6893_v40 = vsub.f32 %v3614_v27, %v3878_v52 }
 0x307   :  { %v3986_v19 = vmul.f32 0.5, %v3985_v18 }
 0x308   :  { %v3894_v56 = vmul.f32 %v6893_v40, %v6893_v40 }
 0x309   :  { %v3987_v22 = vsub.f32 1.5, %v3986_v19 }
 0x30a   :  { %v3917_v43 = vrot.slane %v3894_v56, 4  ;;  %v3626_v14 = vpop.f32.mrf.mxu0  ;;  %v3639_v20 = vpop.f32.mrf.mxu1 }
 0x30b   :  { %v3640_v57 = vadd.f32 %v3639_v20, %v3626_v14  ;;  %v3988_v30 = vmul.f32 %v6427_v2, %v3987_v22 }
 0x30c   :  { %v3918_v42 = vadd.f32 %v3917_v43, %v3894_v56 }
 0x30d   :  { %v3992_v34 = vsel %vm3991_vm7, %v6427_v2, %v3988_v30  ;;  %vm4063_vm7 = vcmask 1046534  }
 0x30e   :  { %v3919_v58 = vrot.slane %v3918_v42, 2  ;;  %v4052_v55 = vrot.slane %v3992_v34, 6 }
 0x310   :  { %v3920_v7 = vadd.f32 %v3919_v58, %v3918_v42 }
 0x312   :  { %v3921_v5 = vrot.slane %v3920_v7, 1  ;;  %v3628_v8 = vpop.f32.mrf.mxu0  ;;  %v3641_v9 = vpop.f32.mrf.mxu1 }
 0x313   :  { %v3652_v62 = vpop.f32.mrf.mxu2  ;;  %v3665_v0 = vpop.f32.mrf.mxu3 }
 0x314   :  { %v3653_v6 = vadd.f32 %v3652_v62, %v3640_v57  ;;  %v3922_v10 = vadd.f32 %v3921_v5, %v3920_v7 }
 0x316   :  { %v3666_v44 = vadd.f32 %v3665_v0, %v3653_v6  ;;  %v3950_v47 = vmul.f32 %v3922_v10, %v6631_v24 }
 0x318   :  { %v3851_v12 = vrot.slane %v3666_v44, 4  ;;  %v3958_v21 = vadd.f32 1e-05, %v3950_v47 }
 0x31a   :  { %v3852_v51 = vadd.f32 %v3851_v12, %v3666_v44  ;;  %6428 = vrsqrt.f32 %v3958_v21  ;;  %vm3999_vm8 = vweird.f32 %v3958_v21 }
 0x31b   :  { %v3654_v16 = vpop.f32.mrf.mxu2  ;;  %v3667_v60 = vpop.f32.mrf.mxu3 }
 0x31c   :  { %v3853_v41 = vrot.slane %v3852_v51, 2 }
 0x31e   :  { %v3854_v49 = vadd.f32 %v3853_v41, %v3852_v51 }
 0x320   :  { %v3855_v61 = vrot.slane %v3854_v49, 1  ;;  %v6429_v59 = vpop.eup %6428 }
 0x321   :  { %v3994_v53 = vmul.f32 %v6429_v59, %v3958_v21  ;;  %vm4000_vm6 = vweird.f32 %v6429_v59 }
 0x322   :  { %v3856_v15 = vadd.f32 %v3855_v61, %v3854_v49  ;;  %vm4001_vm9 = vmor %vm3999_vm8, %vm4000_vm6  ;;  %vm4065_vm8 = vcmask 1045508  }
 0x323   :  { %v3995_v25 = vmul.f32 %v6429_v59, %v3994_v53 }
 0x324   :  { %v3879_v23 = vmul.f32 %v3856_v15, %v6631_v24 }
 0x325   :  { %v3996_v27 = vmul.f32 0.5, %v3995_v25 }
 0x326   :  { %v6899_v13 = vsub.f32 %v3666_v44, %v3879_v23 }
 0x327   :  { %v3997_v31 = vsub.f32 1.5, %v3996_v27 }
 0x328   :  { %v3895_v28 = vmul.f32 %v6899_v13, %v6899_v13 }
 0x329   :  { %v3998_v35 = vmul.f32 %v6429_v59, %v3997_v31 }
 0x32a   :  { %v3923_v32 = vrot.slane %v3895_v28, 4  ;;  %v3678_v33 = vpop.f32.mrf.mxu0  ;;  %v3691_v38 = vpop.f32.mrf.mxu1 }
 0x32b   :  { %v3692_v3 = vadd.f32 %v3691_v38, %v3678_v33  ;;  %v4002_v36 = vsel %vm4001_vm9, %v6429_v59, %v3998_v35  ;;  %vm4067_vm9 = vcmask 1043456  }
 0x32c   :  { %v4053_v1 = vrot.slane %v4002_v36, 5  ;;  %v3924_v29 = vadd.f32 %v3923_v32, %v3895_v28 }
 0x32e   :  { %v4059_v39 = vsel %vm701_vm13, %v4052_v55, %v4053_v1  ;;  %v3925_v48 = vrot.slane %v3924_v29, 2 }
 0x32f   :  { %v6906_v37 = vsel %vm703_vm15, %v6889_v4, %v4059_v39 }
 0x330   :  { %v3926_v43 = vadd.f32 %v3925_v48, %v3924_v29 }
 0x332   :  { %v3680_v52 = vpop.f32.mrf.mxu0  ;;  %v3693_v54 = vpop.f32.mrf.mxu1  ;;  %v3927_v58 = vrot.slane %v3926_v43, 1 }
 0x333   :  { %v3704_v45 = vpop.f32.mrf.mxu2  ;;  %v3717_v46 = vpop.f32.mrf.mxu3 }
 0x334   :  { %v3705_v50 = vadd.f32 %v3704_v45, %v3692_v3  ;;  %v3928_v0 = vadd.f32 %v3927_v58, %v3926_v43 }
 0x336   :  { %v3718_v56 = vadd.f32 %v3717_v46, %v3705_v50  ;;  %v3951_v4 = vmul.f32 %v3928_v0, %v6631_v24 }
 0x338   :  { %v3857_v14 = vrot.slane %v3718_v56, 4  ;;  %v3959_v9 = vadd.f32 1e-05, %v3951_v4 }
 0x33a   :  { %v3858_v20 = vadd.f32 %v3857_v14, %v3718_v56  ;;  %6430 = vrsqrt.f32 %v3959_v9  ;;  %vm4009_vm15 = vweird.f32 %v3959_v9 }
 0x33b   :  { %v3706_v57 = vpop.f32.mrf.mxu2  ;;  %v3719_v42 = vpop.f32.mrf.mxu3 }
 0x33c   :  { %v3859_v7 = vrot.slane %v3858_v20, 2 }
 0x33e   :  { %v3860_v62 = vadd.f32 %v3859_v7, %v3858_v20 }
 0x340   :  { %v3861_v2 = vrot.slane %v3860_v62, 1  ;;  %v6431_v41 = vpop.eup %6430 }
 0x341   :  { %v4004_v53 = vmul.f32 %v6431_v41, %v3959_v9  ;;  %vm4010_vm13 = vweird.f32 %v6431_v41 }
 0x342   :  { %v3862_v5 = vadd.f32 %v3861_v2, %v3860_v62  ;;  %vm4011_vm11 = vmor %vm4009_vm15, %vm4010_vm13 }
 0x343   :  { %v4005_v28 = vmul.f32 %v6431_v41, %v4004_v53 }
 0x344   :  { %v3880_v6 = vmul.f32 %v3862_v5, %v6631_v24 }
 0x345   :  { %v4006_v34 = vmul.f32 0.5, %v4005_v28 }
 0x346   :  { %v6910_v8 = vsub.f32 %v3718_v56, %v3880_v6 }
 0x347   :  { %v4007_v55 = vsub.f32 1.5, %v4006_v34 }
 0x348   :  { %v3896_v10 = vmul.f32 %v6910_v8, %v6910_v8 }
 0x349   :  { %v4008_v46 = vmul.f32 %v6431_v41, %v4007_v55 }
 0x34a   :  { %v3929_v44 = vrot.slane %v3896_v10, 4  ;;  %v3730_v11 = vpop.f32.mrf.mxu0  ;;  %v3743_v47 = vpop.f32.mrf.mxu1 }
 0x34b   :  { %v3744_v18 = vadd.f32 %v3743_v47, %v3730_v11  ;;  %v4012_v14 = vsel %vm4011_vm11, %v6431_v41, %v4008_v46 }
 0x34c   :  { %v3930_v12 = vadd.f32 %v3929_v44, %v3896_v10  ;;  %v4054_v58 = vrot.slane %v4012_v14, 4  ;;  %v3825_v14 = vld [vmem:[%s6951_s8] sm:$0xff]  ;;  %s6548_s8 = smov [#allocation8]  }
 0x34e   :  { %v3931_v21 = vrot.slane %v3930_v12, 2 }
 0x350   :  { %v3932_v51 = vadd.f32 %v3931_v21, %v3930_v12 }
 0x352   :  { %v3933_v49 = vrot.slane %v3932_v51, 1  ;;  %v3732_v61 = vpop.f32.mrf.mxu0  ;;  %v3745_v59 = vpop.f32.mrf.mxu1 }
 0x353   :  { %v3756_v16 = vpop.f32.mrf.mxu2  ;;  %v3769_v60 = vpop.f32.mrf.mxu3 }
 0x354   :  { %v3757_v19 = vadd.f32 %v3756_v16, %v3744_v18  ;;  %v3934_v15 = vadd.f32 %v3933_v49, %v3932_v51 }
 0x356   :  { %v3770_v22 = vadd.f32 %v3769_v60, %v3757_v19  ;;  %v3952_v23 = vmul.f32 %v3934_v15, %v6631_v24 }
 0x358   :  { %v3863_v25 = vrot.slane %v3770_v22, 4  ;;  %v3960_v30 = vadd.f32 1e-05, %v3952_v23 }
 0x35a   :  { %v3864_v27 = vadd.f32 %v3863_v25, %v3770_v22  ;;  %6432 = vrsqrt.f32 %v3960_v30  ;;  %vm4019_vm14 = vweird.f32 %v3960_v30 }
 0x35b   :  { %v3758_v31 = vpop.f32.mrf.mxu2  ;;  %v3771_v32 = vpop.f32.mrf.mxu3 }
 0x35c   :  { %v3865_v33 = vrot.slane %v3864_v27, 2 }
 0x35e   :  { %v3866_v38 = vadd.f32 %v3865_v33, %v3864_v27 }
 0x360   :  { %v3867_v35 = vrot.slane %v3866_v38, 1  ;;  %v6433_v3 = vpop.eup %6432 }
 0x361   :  { %v4014_v1 = vmul.f32 %v6433_v3, %v3960_v30  ;;  %vm4020_vm10 = vweird.f32 %v6433_v3 }
 0x362   :  { %v3868_v36 = vadd.f32 %v3867_v35, %v3866_v38  ;;  %vm4021_vm0 = vmor %vm4019_vm14, %vm4020_vm10 }
 0x363   :  { %v4015_v39 = vmul.f32 %v6433_v3, %v4014_v1 }
 0x364   :  { %v3881_v29 = vmul.f32 %v3868_v36, %v6631_v24 }
 0x365   :  { %v4016_v48 = vmul.f32 0.5, %v4015_v39 }
 0x366   :  { %v6916_v45 = vsub.f32 %v3770_v22, %v3881_v29 }
 0x367   :  { %v4017_v52 = vsub.f32 1.5, %v4016_v48 }
 0x368   :  { %v3897_v50 = vmul.f32 %v6916_v45, %v6916_v45 }
 0x369   :  { %v4018_v20 = vmul.f32 %v6433_v3, %v4017_v52 }
 0x36a   :  { %v3782_v54 = vpop.f32.mrf.mxu0  ;;  %v3935_v43 = vrot.slane %v3897_v50, 4 }
 0x36b   :  { %v3795_v56 = vpop.f32.mrf.mxu1  ;;  %v4022_v57 = vsel %vm4021_vm0, %v6433_v3, %v4018_v20 }
 0x36c   :  { %v3936_v42 = vadd.f32 %v3935_v43, %v3897_v50  ;;  %v4055_v7 = vrot.slane %v4022_v57, 3  ;;  %v3796_v62 = vadd.f32 %v3795_v56, %v3782_v54  ;;  %v3826_v43 = vld [vmem:[%s6952_s9] sm:$0xff]  ;;  %s4142_s9 = sshll.u32 %s6548_s8, 4  ;;  %s4143_s9 = int_to_ptr.vmem [resolvable:$true] %s4142_s9 }
 0x36e   :  { %v6920_v0 = vsel %vm4061_vm1, %v4054_v58, %v4055_v7  ;;  %v3937_v4 = vrot.slane %v3936_v42, 2  ;;  %v4104_v58 = vperm.slane %v3826_v43, 7 }
 0x370   :  { %v3938_v11 = vadd.f32 %v3937_v4, %v3936_v42  ;;  %v4100_v4 = vperm.slane %v3826_v43, 3 }
 0x372   :  { %v3784_v9 = vpop.f32.mrf.mxu0  ;;  %v3939_v18 = vrot.slane %v3938_v11, 1 }
 0x373   :  { %v3808_v2 = vpop.f32.mrf.mxu2  ;;  %v3797_v10 = vpop.f32.mrf.mxu1  ;;  %v4102_v9 = vperm.slane %v3826_v43, 5 }
 0x374   :  { %v3809_v6 = vadd.f32 %v3808_v2, %v3796_v62  ;;  %v3940_v41 = vadd.f32 %v3939_v18, %v3938_v11  ;;  %v4097_v62 = vperm.slane %v3826_v43, 0  ;;  %v4098_v2 = vperm.slane %v3826_v43, 1 }
 0x375   :  { %v3821_v5 = vpop.f32.mrf.mxu3  ;;  %v4103_v10 = vperm.slane %v3826_v43, 6 }
 0x376   :  { %v3822_v44 = vadd.f32 %v3821_v5, %v3809_v6  ;;  %v3953_v61 = vmul.f32 %v3940_v41, %v6631_v24  ;;  %v4099_v5 = vperm.slane %v3826_v43, 2  ;;  %v4101_v6 = vperm.slane %v3826_v43, 4 }
 0x378   :  { %v3869_v47 = vrot.slane %v3822_v44, 4  ;;  %v3961_v22 = vadd.f32 1e-05, %v3953_v61 }
 0x37a   :  { %v3870_v12 = vadd.f32 %v3869_v47, %v3822_v44  ;;  %6434 = vrsqrt.f32 %v3961_v22  ;;  %vm4029_vm3 = vweird.f32 %v3961_v22 }
 0x37b   :  { %v3810_v21 = vpop.f32.mrf.mxu2 }
 0x37c   :  { %v3871_v16 = vrot.slane %v3870_v12, 2 }
 0x37d   :  { %v3823_v51 = vpop.f32.mrf.mxu3 }
 0x37e   :  { %v3872_v60 = vadd.f32 %v3871_v16, %v3870_v12 }
 0x380   :  { %v3873_v49 = vrot.slane %v3872_v60, 1  ;;  %v6435_v28 = vpop.eup %6434 }
 0x381   :  { %v4024_v33 = vmul.f32 %v6435_v28, %v3961_v22  ;;  %vm4030_vm2 = vweird.f32 %v6435_v28 }
 0x382   :  { %v3874_v19 = vadd.f32 %v3873_v49, %v3872_v60  ;;  %vm4031_vm12 = vmor %vm4029_vm3, %vm4030_vm2 }
 0x383   :  { %v4025_v35 = vmul.f32 %v6435_v28, %v4024_v33 }
 0x384   :  { %v3882_v59 = vmul.f32 %v3874_v19, %v6631_v24 }
 0x385   :  { %v4026_v3 = vmul.f32 0.5, %v4025_v35 }
 0x386   :  { %v3890_v15 = vsub.f32 %v3822_v44, %v3882_v59 }
 0x387   :  { %v4027_v55 = vsub.f32 1.5, %v4026_v3 }
 0x388   :  { %v3898_v53 = vmul.f32 %v3890_v15, %v3890_v15 }
 0x389   :  { %v4028_v39 = vmul.f32 %v6435_v28, %v4027_v55 }
 0x38a   :  { %v3941_v23 = vrot.slane %v3898_v53, 4 }
 0x38b   :  { %v4032_v50 = vsel %vm4031_vm12, %v6435_v28, %v4028_v39 }
 0x38c   :  { %v3942_v25 = vadd.f32 %v3941_v23, %v3898_v53  ;;  %v4056_v54 = vrot.slane %v4032_v50, 2 }
 0x38e   :  { %v3943_v30 = vrot.slane %v3942_v25, 2 }
 0x390   :  { %v3944_v27 = vadd.f32 %v3943_v30, %v3942_v25 }
 0x392   :  { %v3945_v31 = vrot.slane %v3944_v27, 1 }
 0x394   :  { %v3946_v32 = vadd.f32 %v3945_v31, %v3944_v27 }
 0x396   :  { %v3954_v38 = vmul.f32 %v3946_v32, %v6631_v24 }
 0x398   :  { %v3962_v34 = vadd.f32 1e-05, %v3954_v38 }
 0x39a   :  { %6436 = vrsqrt.f32 %v3962_v34  ;;  %vm4039_vm5 = vweird.f32 %v3962_v34 }
 0x3a0   :  { %v6437_v36 = vpop.eup %6436 }
 0x3a1   :  { %v4034_v1 = vmul.f32 %v6437_v36, %v3962_v34  ;;  %vm4040_vm4 = vweird.f32 %v6437_v36 }
 0x3a2   :  { %vm4041_vm6 = vmor %vm4039_vm5, %vm4040_vm4 }
 0x3a3   :  { %v4035_v29 = vmul.f32 %v6437_v36, %v4034_v1 }
 0x3a5   :  { %v4036_v46 = vmul.f32 0.5, %v4035_v29 }
 0x3a7   :  { %v4037_v48 = vsub.f32 1.5, %v4036_v46 }
 0x3a9   :  { %v4038_v52 = vmul.f32 %v6437_v36, %v4037_v48 }
 0x3ab   :  { %v4042_v24 = vsel %vm4041_vm6, %v6437_v36, %v4038_v52 }
 0x3ac   :  { %v4057_v56 = vrot.slane %v4042_v24, 1 }
 0x3ae   :  { %v4064_v20 = vsel %vm4063_vm7, %v4056_v54, %v4057_v56 }
 0x3af   :  { %v4066_v57 = vsel %vm4065_vm8, %v6920_v0, %v4064_v20 }
 0x3b0   :  { %v4068_v42 = vsel %vm4067_vm9, %v6906_v37, %v4066_v57 }
 0x3b1   :  { %v4070_v7 = vmul.f32 %v4068_v42, %v3825_v14 }
 0x3b3   :  { %v4079_v44 = vperm.slane %v4070_v7, 7  ;;  %v4072_v11 = vperm.slane %v4070_v7, 0  ;;  %v4073_v47 = vperm.slane %v4070_v7, 1  ;;  %v4074_v12 = vperm.slane %v4070_v7, 2 }
 0x3b4   :  { %v4075_v21 = vperm.slane %v4070_v7, 3  ;;  %v4076_v51 = vperm.slane %v4070_v7, 4  ;;  %v4077_v18 = vperm.slane %v4070_v7, 5  ;;  %v4078_v16 = vperm.slane %v4070_v7, 6 }
 0x3b5   :  { %v4095_v0 = vmul.f32 %v4079_v44, %v3890_v15  ;;  %v4088_v37 = vmul.f32 %v4072_v11, %v6854_v63  ;;  %v4089_v60 = vmul.f32 %v4073_v47, %v6868_v26  ;;  %v4090_v41 = vmul.f32 %v4074_v12, %v6882_v17 }
 0x3b6   :  { %v4091_v49 = vmul.f32 %v4075_v21, %v6893_v40  ;;  %v4092_v19 = vmul.f32 %v4076_v51, %v6899_v13  ;;  %v4093_v61 = vmul.f32 %v4077_v18, %v6910_v8  ;;  %v4094_v59 = vmul.f32 %v4078_v16, %v6916_v45 }
 0x3b7   :  { %v4120_v22 = vadd.f32 %v4104_v58, %v4095_v0  ;;  %v4113_v53 = vadd.f32 %v4097_v62, %v4088_v37  ;;  %v4114_v23 = vadd.f32 %v4098_v2, %v4089_v60  ;;  %v4115_v25 = vadd.f32 %v4099_v5, %v4090_v41 }
 0x3b8   :  { %v4116_v30 = vadd.f32 %v4100_v4, %v4091_v49  ;;  %v4117_v15 = vadd.f32 %v4101_v6, %v4092_v19  ;;  %v4118_v63 = vadd.f32 %v4102_v9, %v4093_v61  ;;  %v4119_v31 = vadd.f32 %v4103_v10, %v4094_v59 }
 0x3b9   :  { %v4128_v27 = vmax.f32 %v4120_v22, 0.0  ;;  %v4121_v28 = vmax.f32 %v4113_v53, 0.0  ;;  %v4122_v26 = vmax.f32 %v4114_v23, 0.0  ;;  %v4123_v17 = vmax.f32 %v4115_v25, 0.0 }
 0x3ba   :  { %v4124_v40 = vmax.f32 %v4116_v30, 0.0  ;;  %v4125_v32 = vmax.f32 %v4117_v15, 0.0  ;;  %v4126_v13 = vmax.f32 %v4118_v63, 0.0  ;;  %v4127_v8 = vmax.f32 %v4119_v31, 0.0 }
 0x3bb   :  { %4136 = vst [vmem:[#allocation8 + $0x38] sm:$0xff] %v4128_v27 }
 0x3bc   :  { %4129 = vst [vmem:[#allocation8] sm:$0xff] %v4121_v28 }
 0x3bd   :  { %4130 = vst [vmem:[#allocation8 + $0x8] sm:$0xff] %v4122_v26 }
 0x3be   :  { %4131 = vst [vmem:[#allocation8 + $0x10] sm:$0xff] %v4123_v17 }
 0x3bf   :  { %4132 = vst [vmem:[#allocation8 + $0x18] sm:$0xff] %v4124_v40 }
 0x3c0   :  { %4133 = vst [vmem:[#allocation8 + $0x20] sm:$0xff] %v4125_v32 }
 0x3c1   :  { %4134 = vst [vmem:[#allocation8 + $0x28] sm:$0xff] %v4126_v13 }
 0x3c2   :  { %4135 = vst [vmem:[#allocation8 + $0x30] sm:$0xff] %v4127_v8 }
 0x3c3   :  { %4147 = dma.vmem_to_hbm [thread:$0]  %s4143_s9, 1024, %s4145_s22, [#allocation4]  }
 0x3c4   :  { %6538 = dma.done.wait [#allocation4], 1024  }
 0x3c5   :  { %6539 = vsyncadd [#allocation4], 4294966272 }
 0x3c6   :  { %4152 = vsyncpa [#allocation3], 1 }
 0x3c7   :  { %4153 = vsyncpa [#allocation6], 1 }
 0x3c8   :  { %4154 = vsyncpa [#allocation4], 1 }

</bundles_post_ra>
